<compile_context>
chip_gen: v6e
topology: v6e:2x2x1
jax: 0.10.0
libtpu: 0.0.40
codegen_flags: <defaults>
</compile_context>

<pallas_src>
import functools

import jax
import jax.numpy as jnp
from jax import lax
from jax.experimental import pallas as pl
from jax.experimental.pallas import tpu as pltpu

BN_EPS = 1e-5       # nn.BatchNorm1d default eps
NORM_EPS = 1e-12    # F.normalize default eps


def _vmem_spec():
    return pl.BlockSpec(memory_space=pltpu.MemorySpace.VMEM)


# ----------------------------------------------------------------------------
# Kernel 1: fused encoder towers + momentum EMA.
#   grid = (k_tiles,).  Both views are stacked along rows (M = 2N) and share
#   every weight DMA.  Per K tile: EMA-update the momentum w1 tile, run both
#   first-layer matmuls into f32 VMEM accumulators.  On the last K tile:
#   EMA the remaining momentum params, then BN/ReLU + tail layers in VMEM.
#     query path:  base encoder (Linear-BN-ReLU-Linear-BN) -> predictor
#     key path:    momentum encoder (Linear-BN-ReLU-Linear-BN), updated params
# ----------------------------------------------------------------------------
def _moco_fused_kernel(x_ref,
                       w1_ref, g1_ref, b1_ref, w2_ref,
                       pw1_ref, pg1_ref, pb1_ref, pw2_ref,
                       mw1_ref, mg1_ref, mb1_ref, mw2_ref,
                       q_ref, k_ref,
                       mw1n_ref, mg1n_ref, mb1n_ref, mw2n_ref,
                       acc_b_ref, acc_m_ref, *, m):
    ks = pl.program_id(0)
    c = 1.0 - m

    @pl.when(ks == 0)
    def _init():
        acc_b_ref[...] = jnp.zeros_like(acc_b_ref)
        acc_m_ref[...] = jnp.zeros_like(acc_m_ref)

    # ---- first Linear of both encoders, K-tiled, both views stacked (M = 2N) ----
    xb = x_ref[...]                                   # bf16 (2N, tk)
    w1 = w1_ref[...]                                  # f32 master weight tile
    mw1_new = mw1_ref[...] * m + w1 * c               # fused momentum EMA (exact f32)
    mw1n_ref[...] = mw1_new                           # written back in place (aliased)
    acc_b_ref[...] += jnp.dot(xb, w1.astype(jnp.bfloat16),
                              preferred_element_type=jnp.float32)
    acc_m_ref[...] += jnp.dot(xb, mw1_new.astype(jnp.bfloat16),
                              preferred_element_type=jnp.float32)

    @pl.when(ks == pl.num_programs(0) - 1)
    def _epilogue():
        n = acc_b_ref.shape[0] // 2                   # rows per view

        def bn_view(y, gamma, beta, relu):
            # BatchNorm1d training mode: batch stats, biased variance (one view).
            mean = jnp.mean(y, axis=0, keepdims=True)
            var = jnp.maximum(jnp.mean(y * y, axis=0, keepdims=True) - mean * mean, 0.0)
            yn = (y - mean) * lax.rsqrt(var + BN_EPS)
            if gamma is not None:
                yn = yn * gamma + beta
            if relu:
                yn = jnp.maximum(yn, 0.0)
            return yn

        def bn2(y, gamma, beta, relu):
            # per-view BN on the (2N, F) stacked activation
            return jnp.concatenate([bn_view(y[:n], gamma, beta, relu),
                                    bn_view(y[n:], gamma, beta, relu)], axis=0)

        def mm(a, b):
            return jnp.dot(a.astype(jnp.bfloat16), b.astype(jnp.bfloat16),
                           preferred_element_type=jnp.float32)

        # fused momentum EMA of the remaining momentum-encoder params (exact f32)
        mg1_new = mg1_ref[...] * m + g1_ref[...] * c
        mb1_new = mb1_ref[...] * m + b1_ref[...] * c
        mw2_new = mw2_ref[...] * m + w2_ref[...] * c
        mg1n_ref[...] = mg1_new
        mb1n_ref[...] = mb1_new
        mw2n_ref[...] = mw2_new

        # TODO(synk): at production n / mlp_dim=4096, tile this epilogue over
        # batch rows (fori_loop / emit_pipeline) to bound peak VMEM on v7x.

        # ---- key path: momentum encoder tail (uses the UPDATED momentum params) ----
        acc_m_ref[...] = bn2(acc_m_ref[...], mg1_new, mb1_new, relu=True)      # hm (in place)
        k_ref[...] = bn2(mm(acc_m_ref[...], mw2_new), None, None, relu=False)  # BN(affine=False)

        # ---- query path: base encoder tail + predictor ----
        acc_b_ref[...] = bn2(acc_b_ref[...], g1_ref[...], b1_ref[...], relu=True)   # h (in place)
        z = bn2(mm(acc_b_ref[...], w2_ref[...]), None, None, relu=False)            # (2N, dim)
        acc_b_ref[...] = bn2(mm(z, pw1_ref[...]), pg1_ref[...], pb1_ref[...],
                             relu=True)                                             # h2 reuses acc_b
        q_ref[...] = bn2(mm(acc_b_ref[...], pw2_ref[...]), None, None, relu=False)


def moco_towers_fused(x_all, params_b, params_m, *, m, tk):
    """x_all: (2N, d_in) bf16 (both views stacked).  Returns q, k, new momentum params."""
    n2, d_in = x_all.shape
    mlp_dim = params_b["w1"].shape[1]
    dim = params_b["w2"].shape[1]
    assert d_in % tk == 0 and (tk % 128 == 0 or tk == d_in), "tk must tile d_in lane-densely"
    kt = d_in // tk

    # bf16 streaming of the predictor weights (no momentum counterpart -> no f32 master needed in-kernel)
    pw1 = params_b["pw1"].astype(jnp.bfloat16)
    pw2 = params_b["pw2"].astype(jnp.bfloat16)

    def const_spec(shape):
        nd = len(shape)
        return pl.BlockSpec(shape, lambda k, _nd=nd: (0,) * _nd)

    def ktile_spec(shape):
        return pl.BlockSpec(shape, lambda k: (k, 0))

    # TODO(synk): at production shapes, request pipeline_mode=pl.Buffered(1) on the
    # grid-invariant weight blocks (w2/pw1/pw2/mw2/gammas/betas) to halve their VMEM
    # footprint, and pl.Buffered(3) on the K-tiled inputs on v5e if DMA is exposed.
    in_specs = [
        pl.BlockSpec((n2, tk), lambda k: (0, k)),   # x (bf16, both views)
        ktile_spec((tk, mlp_dim)),                  # base w1 (f32 master)
        const_spec((1, mlp_dim)),                   # base g1
        const_spec((1, mlp_dim)),                   # base b1
        const_spec((mlp_dim, dim)),                 # base w2 (f32 master)
        const_spec((dim, mlp_dim)),                 # pred w1 (bf16)
        const_spec((1, mlp_dim)),                   # pred g1
        const_spec((1, mlp_dim)),                   # pred b1
        const_spec((mlp_dim, dim)),                 # pred w2 (bf16)
        ktile_spec((tk, mlp_dim)),                  # mom  w1 (f32 master)
        const_spec((1, mlp_dim)),                   # mom  g1
        const_spec((1, mlp_dim)),                   # mom  b1
        const_spec((mlp_dim, dim)),                 # mom  w2 (f32 master)
    ]
    out_specs = [
        const_spec((n2, dim)),                      # q  (both views stacked)
        const_spec((n2, dim)),                      # k  (both views stacked)
        ktile_spec((tk, mlp_dim)),                  # mom w1 (updated, aliased in place)
        const_spec((1, mlp_dim)),                   # mom g1 (updated)
        const_spec((1, mlp_dim)),                   # mom b1 (updated)
        const_spec((mlp_dim, dim)),                 # mom w2 (updated)
    ]
    out_shape = [
        jax.ShapeDtypeStruct((n2, dim), jnp.float32),
        jax.ShapeDtypeStruct((n2, dim), jnp.float32),
        jax.ShapeDtypeStruct((d_in, mlp_dim), jnp.float32),
        jax.ShapeDtypeStruct((1, mlp_dim), jnp.float32),
        jax.ShapeDtypeStruct((1, mlp_dim), jnp.float32),
        jax.ShapeDtypeStruct((mlp_dim, dim), jnp.float32),
    ]

    q, k, mw1n, mg1n, mb1n, mw2n = pl.pallas_call(
        functools.partial(_moco_fused_kernel, m=float(m)),
        grid=(kt,),
        in_specs=in_specs,
        out_specs=out_specs,
        out_shape=out_shape,
        scratch_shapes=[pltpu.VMEM((n2, mlp_dim), jnp.float32),
                        pltpu.VMEM((n2, mlp_dim), jnp.float32)],
        # momentum params updated in place
        input_output_aliases={9: 2, 10: 3, 11: 4, 12: 5},
        compiler_params=pltpu.CompilerParams(
            dimension_semantics=("arbitrary",),
            # explicit budget: within v7x's 64 MiB physical VMEM; demo usage << this.
            vmem_limit_bytes=64 * 1024 * 1024),
    )(x_all,
      params_b["w1"], params_b["g1"], params_b["b1"], params_b["w2"],
      pw1, params_b["pg1"], params_b["pb1"], pw2,
      params_m["w1"], params_m["g1"], params_m["b1"], params_m["w2"])

    params_m_new = {"w1": mw1n, "g1": mg1n, "b1": mb1n, "w2": mw2n}
    return q, k, params_m_new


# ----------------------------------------------------------------------------
# Kernel 2: both CACR-RBF loss terms in one launch.
#   Default forward path: q_list has a single entry per k, so the RBF softmax
#   weight p == 1; world_size=1 => gathered k == k, labels == arange(N).
#   Similarity matrix AND its diagonal are computed in f32 (consistent).
# ----------------------------------------------------------------------------
def _cacr_pair_kernel(q_ref, k_ref, o_ref, *, T):
    inv_T = 1.0 / T
    n = q_ref.shape[0] // 2

    def l2_normalize(x):
        ss = jnp.sum(x * x, axis=1, keepdims=True)
        return x * lax.rsqrt(jnp.maximum(ss, NORM_EPS * NORM_EPS))

    q = q_ref[...]
    kk = k_ref[...]

    def one_loss(qv, kv):
        qn = l2_normalize(qv)
        kn = l2_normalize(kv)
        # sim[i, j] = <qn_i, kn_j> / T   (f32)
        sim = lax.dot_general(qn, kn, (((1,), (1,)), ((), ())),
                              preferred_element_type=jnp.float32) * inv_T
        diag = jnp.sum(qn * kn, axis=1, keepdims=True) * inv_T
        mx = jnp.max(sim, axis=1, keepdims=True)
        lse = jnp.log(jnp.sum(jnp.exp(sim - mx), axis=1, keepdims=True)) + mx
        ce = lse - diag                                       # CE w/ labels=arange(N)
        return jnp.sum(ce, keepdims=True) * (2.0 * T / n)     # (1,1), p == 1

    # i=0 -> q_list without k1's index = [q2] vs k1 ;  i=1 -> [q1] vs k2
    la = one_loss(q[n:], kk[:n])
    lb = one_loss(q[:n], kk[n:])
    o_ref[...] = jnp.broadcast_to((la + lb) * 0.5, o_ref.shape)   # lane-dense store


def cacr_pair_loss(q_all, k_all, T):
    out = pl.pallas_call(
        functools.partial(_cacr_pair_kernel, T=float(T)),
        out_shape=jax.ShapeDtypeStruct((8, 128), jnp.float32),
        in_specs=[_vmem_spec(), _vmem_spec()],
        out_specs=_vmem_spec(),
    )(q_all, k_all)
    return out[0, 0]


# ----------------------------------------------------------------------------
# Plain-JAX glue: parameter construction + forward wiring
# ----------------------------------------------------------------------------
def init_params(key, d_in, mlp_dim, dim):
    # lane-dense feature dims (multiples of 128); on v6e/v7x production prefer
    # multiples of 256 for dim / mlp_dim / tk to fill the 256-wide MXU.
    assert d_in % 128 == 0 and mlp_dim % 128 == 0 and dim % 128 == 0, (
        "feature dims must be multiples of 128 (zero-pad externally if needed)")
    ks = jax.random.split(key, 4)
    scale = 0.02
    return {
        # encoder(+projector)
        "w1": scale * jax.random.normal(ks[0], (d_in, mlp_dim), jnp.float32),
        "g1": jnp.ones((1, mlp_dim), jnp.float32),
        "b1": jnp.zeros((1, mlp_dim), jnp.float32),
        "w2": scale * jax.random.normal(ks[1], (mlp_dim, dim), jnp.float32),
        # predictor
        "pw1": scale * jax.random.normal(ks[2], (dim, mlp_dim), jnp.float32),
        "pg1": jnp.ones((1, mlp_dim), jnp.float32),
        "pb1": jnp.zeros((1, mlp_dim), jnp.float32),
        "pw2": scale * jax.random.normal(ks[3], (mlp_dim, dim), jnp.float32),
    }


def moco_forward(params_b, params_m, x1, x2, m, T=1.0, tk=None):
    n = x1.shape[0]
    # NCHW -> (N, C*H*W); stack the two views along rows so M = 2N for every matmul.
    x_all = jnp.concatenate([x1.reshape(n, -1), x2.reshape(n, -1)], axis=0)
    x_all = x_all.astype(jnp.bfloat16)                 # bf16 activation streaming
    d_in = x_all.shape[-1]
    if tk is None:
        # single K step when the (tk, mlp_dim) f32 weight tiles fit VMEM comfortably
        tk = d_in if d_in <= 2048 else 512

    # Fused: momentum EMA (in place) + base encoder + predictor (q) + momentum
    # encoder (k), both views, in one K-tiled kernel.  (Doing the EMA inside is
    # equivalent to the reference ordering: the update never reads q / base grads.)
    q_all, k_all, params_m_new = moco_towers_fused(x_all, params_b, params_m, m=m, tk=tk)

    # TODO(synk): concat_all_gather / get_rank assume single-device semantics
    # (world_size=1, rank=0), so gathered k == k and labels == arange(N).
    loss = cacr_pair_loss(q_all, k_all, T)
    return loss, params_m_new


# ----------------------------------------------------------------------------
# Pure-JAX reference (tolerance check only)
# ----------------------------------------------------------------------------
def _ref_mm(a, b):
    return jnp.dot(a.astype(jnp.bfloat16), b.astype(jnp.bfloat16),
                   preferred_element_type=jnp.float32)


def _ref_bn(y, gamma=None, beta=None, relu=False):
    mean = jnp.mean(y, axis=0, keepdims=True)
    var = jnp.maximum(jnp.mean(y * y, axis=0, keepdims=True) - mean * mean, 0.0)
    yn = (y - mean) * lax.rsqrt(var + BN_EPS)
    if gamma is not None:
        yn = yn * gamma + beta
    if relu:
        yn = jnp.maximum(yn, 0.0)
    return yn


def _ref_encoder(x, w1, g1, b1, w2):
    h = _ref_bn(_ref_mm(x, w1), g1, b1, relu=True)
    return _ref_bn(_ref_mm(h, w2))


def _ref_predictor(z, pw1, pg1, pb1, pw2):
    h = _ref_bn(_ref_mm(z, pw1), pg1, pb1, relu=True)
    return _ref_bn(_ref_mm(h, pw2))


def _ref_normalize(x):
    ss = jnp.sum(x * x, axis=1, keepdims=True)
    return x * lax.rsqrt(jnp.maximum(ss, NORM_EPS * NORM_EPS))


def _ref_rbf_loss(q, k, T):
    qn, kn = _ref_normalize(q), _ref_normalize(k)
    sim = jnp.dot(qn, kn.T, preferred_element_type=jnp.float32) / T
    diag = jnp.sum(qn * kn, axis=1) / T
    mx = jnp.max(sim, axis=1)
    lse = jnp.log(jnp.sum(jnp.exp(sim - mx[:, None]), axis=1)) + mx
    return jnp.mean(lse - diag) * (2.0 * T)


def moco_forward_ref(pb, pm, x1, x2, m, T=1.0):
    n = x1.shape[0]
    xa = x1.reshape(n, -1).astype(jnp.bfloat16)
    xb = x2.reshape(n, -1).astype(jnp.bfloat16)
    pm_new = {k_: pm[k_] * m + pb[k_] * (1.0 - m) for k_ in pm}
    q1 = _ref_predictor(_ref_encoder(xa, pb["w1"], pb["g1"], pb["b1"], pb["w2"]),
                        pb["pw1"], pb["pg1"], pb["pb1"], pb["pw2"])
    q2 = _ref_predictor(_ref_encoder(xb, pb["w1"], pb["g1"], pb["b1"], pb["w2"]),
                        pb["pw1"], pb["pg1"], pb["pb1"], pb["pw2"])
    k1 = _ref_encoder(xa, pm_new["w1"], pm_new["g1"], pm_new["b1"], pm_new["w2"])
    k2 = _ref_encoder(xb, pm_new["w1"], pm_new["g1"], pm_new["b1"], pm_new["w2"])
    loss = 0.5 * (_ref_rbf_loss(q2, k1, T) + _ref_rbf_loss(q1, k2, T))
    return loss, pm_new


if __name__ == "__main__":
    # small, lane-dense synthetic shapes consistent with the module's forward
    N, C, H, W = 32, 4, 8, 8         # d_in = 256; batch 32 (multiple of 16 sublanes)
    DIM, MLP_DIM = 128, 256          # multiples of 128 (lane-dense); use 256-mults at prod
    T_TEMP = 1.0
    MOMENTUM = 0.99

    key = jax.random.PRNGKey(0)
    k_x1, k_x2, k_par = jax.random.split(key, 3)
    x1 = jax.random.normal(k_x1, (N, C, H, W), jnp.float32)
    x2 = jax.random.normal(k_x2, (N, C, H, W), jnp.float32)

    params_b = init_params(k_par, C * H * W, MLP_DIM, DIM)
    # momentum encoder initialized as a copy of the base encoder (as in __init__)
    params_m = {nm: jnp.copy(params_b[nm]) for nm in ("w1", "g1", "b1", "w2")}

    @functools.partial(jax.jit, static_argnames=("tk",))
    def fwd(pb, pm, a, b, tk=None):
        return moco_forward(pb, pm, a, b, m=MOMENTUM, T=T_TEMP, tk=tk)

    # default config: single K step (tk = d_in); second run exercises the K-tiled path
    loss1, pm1 = fwd(params_b, params_m, x1, x2)
    loss2, pm2 = fwd(params_b, params_m, x1, x2, tk=128)
    (loss1, pm1, loss2, pm2) = jax.block_until_ready((loss1, pm1, loss2, pm2))

    loss_ref, pm_ref = jax.jit(
        functools.partial(moco_forward_ref, m=MOMENTUM, T=T_TEMP))(params_b, params_m, x1, x2)
    loss_ref = jax.block_until_ready(loss_ref)

    assert jnp.isfinite(loss1) and jnp.isfinite(loss2), "loss is not finite"
    assert abs(float(loss1) - float(loss_ref)) < 2e-2, (float(loss1), float(loss_ref))
    assert abs(float(loss1) - float(loss2)) < 2e-2, (float(loss1), float(loss2))
    for nm in ("w1", "g1", "b1", "w2"):
        assert jnp.allclose(pm1[nm], pm_ref[nm], atol=1e-5, rtol=1e-5), nm
        assert jnp.allclose(pm2[nm], pm_ref[nm], atol=1e-5, rtol=1e-5), nm
    print("KERNEL_OK")
</pallas_src>

<mosaic_0001>
module attributes {stable_mosaic.version = 11 : i64} {
  func.func @_cacr_pair_kernel(%arg0: memref<64x128xf32, #tpu.memory_space<vmem>>, %arg1: memref<64x128xf32, #tpu.memory_space<vmem>>, %arg2: memref<8x128xf32, #tpu.memory_space<vmem>>) attributes {dimension_semantics = [], scalar_prefetch = 0 : i64, scratch_operands = 0 : i64, tpu.core_type = #tpu.core_type<tc>} {
    %c0 = arith.constant 0 : index
    %c0_0 = arith.constant 0 : index
    %0 = vector.load %arg0[%c0, %c0_0] : memref<64x128xf32, #tpu.memory_space<vmem>>, vector<64x128xf32>
    %c0_1 = arith.constant 0 : index
    %c0_2 = arith.constant 0 : index
    %1 = vector.load %arg1[%c0_1, %c0_2] : memref<64x128xf32, #tpu.memory_space<vmem>>, vector<64x128xf32>
    %2 = vector.extract_strided_slice %0 {offsets = [32, 0], sizes = [32, 128], strides = [1, 1]} : vector<64x128xf32> to vector<32x128xf32>
    %3 = vector.extract_strided_slice %1 {offsets = [0, 0], sizes = [32, 128], strides = [1, 1]} : vector<64x128xf32> to vector<32x128xf32>
    %4 = arith.mulf %2, %2 : vector<32x128xf32>
    %cst = arith.constant dense<0.000000e+00> : vector<32xf32>
    %5 = vector.multi_reduction <add>, %4, %cst [1] : vector<32x128xf32> to vector<32xf32>
    %6 = vector.shape_cast %5 : vector<32xf32> to vector<32x1xf32>
    %cst_3 = arith.constant 1.000000e-24 : f32
    %7 = vector.broadcast %cst_3 : f32 to vector<32x1xf32>
    %8 = arith.maximumf %6, %7 : vector<32x1xf32>
    %9 = math.rsqrt %8 : vector<32x1xf32>
    %10 = vector.broadcast %9 : vector<32x1xf32> to vector<32x128xf32>
    %11 = arith.mulf %2, %10 : vector<32x128xf32>
    %12 = arith.mulf %3, %3 : vector<32x128xf32>
    %cst_4 = arith.constant dense<0.000000e+00> : vector<32xf32>
    %13 = vector.multi_reduction <add>, %12, %cst_4 [1] : vector<32x128xf32> to vector<32xf32>
    %14 = vector.shape_cast %13 : vector<32xf32> to vector<32x1xf32>
    %cst_5 = arith.constant 1.000000e-24 : f32
    %15 = vector.broadcast %cst_5 : f32 to vector<32x1xf32>
    %16 = arith.maximumf %14, %15 : vector<32x1xf32>
    %17 = math.rsqrt %16 : vector<32x1xf32>
    %18 = vector.broadcast %17 : vector<32x1xf32> to vector<32x128xf32>
    %19 = arith.mulf %3, %18 : vector<32x128xf32>
    %cst_6 = arith.constant dense<0.000000e+00> : vector<32x32xf32>
    %20 = tpu.matmul %11, %19, %cst_6 {dimension_numbers = #tpu.dot_dimension_numbers<[1], [1], [0], [0], [0, 0, 1, 0], [], []>} : vector<32x128xf32>, vector<32x128xf32>, vector<32x32xf32> -> vector<32x32xf32>
    %cst_7 = arith.constant 1.000000e+00 : f32
    %21 = vector.broadcast %cst_7 : f32 to vector<32x32xf32>
    %22 = arith.mulf %20, %21 : vector<32x32xf32>
    %23 = arith.mulf %11, %19 : vector<32x128xf32>
    %cst_8 = arith.constant dense<0.000000e+00> : vector<32xf32>
    %24 = vector.multi_reduction <add>, %23, %cst_8 [1] : vector<32x128xf32> to vector<32xf32>
    %25 = vector.shape_cast %24 : vector<32xf32> to vector<32x1xf32>
    %cst_9 = arith.constant 1.000000e+00 : f32
    %26 = vector.broadcast %cst_9 : f32 to vector<32x1xf32>
    %27 = arith.mulf %25, %26 : vector<32x1xf32>
    %cst_10 = arith.constant dense<0xFF800000> : vector<32xf32>
    %28 = vector.multi_reduction <maximumf>, %22, %cst_10 [1] : vector<32x32xf32> to vector<32xf32>
    %29 = vector.shape_cast %28 : vector<32xf32> to vector<32x1xf32>
    %30 = vector.broadcast %29 : vector<32x1xf32> to vector<32x32xf32>
    %31 = arith.subf %22, %30 : vector<32x32xf32>
    %32 = math.exp %31 : vector<32x32xf32>
    %cst_11 = arith.constant dense<0.000000e+00> : vector<32xf32>
    %33 = vector.multi_reduction <add>, %32, %cst_11 [1] : vector<32x32xf32> to vector<32xf32>
    %34 = vector.shape_cast %33 : vector<32xf32> to vector<32x1xf32>
    %35 = math.log %34 : vector<32x1xf32>
    %36 = arith.addf %35, %29 : vector<32x1xf32>
    %37 = arith.subf %36, %27 : vector<32x1xf32>
    %38 = vector.shape_cast %37 : vector<32x1xf32> to vector<1x32x1xf32>
    %cst_12 = arith.constant dense<0.000000e+00> : vector<1xf32>
    %39 = vector.multi_reduction <add>, %38, %cst_12 [1, 2] : vector<1x32x1xf32> to vector<1xf32>
    %40 = vector.shape_cast %39 : vector<1xf32> to vector<1x1x1xf32>
    %41 = vector.extract %40[0, 0, 0] : f32 from vector<1x1x1xf32>
    %42 = vector.broadcast %41 : f32 to vector<1x1xf32>
    %cst_13 = arith.constant 6.250000e-02 : f32
    %43 = vector.broadcast %cst_13 : f32 to vector<1x1xf32>
    %44 = arith.mulf %42, %43 : vector<1x1xf32>
    %45 = vector.extract_strided_slice %0 {offsets = [0, 0], sizes = [32, 128], strides = [1, 1]} : vector<64x128xf32> to vector<32x128xf32>
    %46 = vector.extract_strided_slice %1 {offsets = [32, 0], sizes = [32, 128], strides = [1, 1]} : vector<64x128xf32> to vector<32x128xf32>
    %47 = arith.mulf %45, %45 : vector<32x128xf32>
    %cst_14 = arith.constant dense<0.000000e+00> : vector<32xf32>
    %48 = vector.multi_reduction <add>, %47, %cst_14 [1] : vector<32x128xf32> to vector<32xf32>
    %49 = vector.shape_cast %48 : vector<32xf32> to vector<32x1xf32>
    %cst_15 = arith.constant 1.000000e-24 : f32
    %50 = vector.broadcast %cst_15 : f32 to vector<32x1xf32>
    %51 = arith.maximumf %49, %50 : vector<32x1xf32>
    %52 = math.rsqrt %51 : vector<32x1xf32>
    %53 = vector.broadcast %52 : vector<32x1xf32> to vector<32x128xf32>
    %54 = arith.mulf %45, %53 : vector<32x128xf32>
    %55 = arith.mulf %46, %46 : vector<32x128xf32>
    %cst_16 = arith.constant dense<0.000000e+00> : vector<32xf32>
    %56 = vector.multi_reduction <add>, %55, %cst_16 [1] : vector<32x128xf32> to vector<32xf32>
    %57 = vector.shape_cast %56 : vector<32xf32> to vector<32x1xf32>
    %cst_17 = arith.constant 1.000000e-24 : f32
    %58 = vector.broadcast %cst_17 : f32 to vector<32x1xf32>
    %59 = arith.maximumf %57, %58 : vector<32x1xf32>
    %60 = math.rsqrt %59 : vector<32x1xf32>
    %61 = vector.broadcast %60 : vector<32x1xf32> to vector<32x128xf32>
    %62 = arith.mulf %46, %61 : vector<32x128xf32>
    %cst_18 = arith.constant dense<0.000000e+00> : vector<32x32xf32>
    %63 = tpu.matmul %54, %62, %cst_18 {dimension_numbers = #tpu.dot_dimension_numbers<[1], [1], [0], [0], [0, 0, 1, 0], [], []>} : vector<32x128xf32>, vector<32x128xf32>, vector<32x32xf32> -> vector<32x32xf32>
    %cst_19 = arith.constant 1.000000e+00 : f32
    %64 = vector.broadcast %cst_19 : f32 to vector<32x32xf32>
    %65 = arith.mulf %63, %64 : vector<32x32xf32>
    %66 = arith.mulf %54, %62 : vector<32x128xf32>
    %cst_20 = arith.constant dense<0.000000e+00> : vector<32xf32>
    %67 = vector.multi_reduction <add>, %66, %cst_20 [1] : vector<32x128xf32> to vector<32xf32>
    %68 = vector.shape_cast %67 : vector<32xf32> to vector<32x1xf32>
    %cst_21 = arith.constant 1.000000e+00 : f32
    %69 = vector.broadcast %cst_21 : f32 to vector<32x1xf32>
    %70 = arith.mulf %68, %69 : vector<32x1xf32>
    %cst_22 = arith.constant dense<0xFF800000> : vector<32xf32>
    %71 = vector.multi_reduction <maximumf>, %65, %cst_22 [1] : vector<32x32xf32> to vector<32xf32>
    %72 = vector.shape_cast %71 : vector<32xf32> to vector<32x1xf32>
    %73 = vector.broadcast %72 : vector<32x1xf32> to vector<32x32xf32>
    %74 = arith.subf %65, %73 : vector<32x32xf32>
    %75 = math.exp %74 : vector<32x32xf32>
    %cst_23 = arith.constant dense<0.000000e+00> : vector<32xf32>
    %76 = vector.multi_reduction <add>, %75, %cst_23 [1] : vector<32x32xf32> to vector<32xf32>
    %77 = vector.shape_cast %76 : vector<32xf32> to vector<32x1xf32>
    %78 = math.log %77 : vector<32x1xf32>
    %79 = arith.addf %78, %72 : vector<32x1xf32>
    %80 = arith.subf %79, %70 : vector<32x1xf32>
    %81 = vector.shape_cast %80 : vector<32x1xf32> to vector<1x32x1xf32>
    %cst_24 = arith.constant dense<0.000000e+00> : vector<1xf32>
    %82 = vector.multi_reduction <add>, %81, %cst_24 [1, 2] : vector<1x32x1xf32> to vector<1xf32>
    %83 = vector.shape_cast %82 : vector<1xf32> to vector<1x1x1xf32>
    %84 = vector.extract %83[0, 0, 0] : f32 from vector<1x1x1xf32>
    %85 = vector.broadcast %84 : f32 to vector<1x1xf32>
    %cst_25 = arith.constant 6.250000e-02 : f32
    %86 = vector.broadcast %cst_25 : f32 to vector<1x1xf32>
    %87 = arith.mulf %85, %86 : vector<1x1xf32>
    %88 = arith.addf %44, %87 : vector<1x1xf32>
    %cst_26 = arith.constant 5.000000e-01 : f32
    %89 = vector.broadcast %cst_26 : f32 to vector<1x1xf32>
    %90 = arith.mulf %88, %89 : vector<1x1xf32>
    %91 = vector.shape_cast %90 : vector<1x1xf32> to vector<1x1xf32>
    %92 = vector.broadcast %91 : vector<1x1xf32> to vector<8x128xf32>
    %c0_27 = arith.constant 0 : index
    %c0_28 = arith.constant 0 : index
    %93 = vector.load %arg2[%c0_27, %c0_28] : memref<8x128xf32, #tpu.memory_space<vmem>>, vector<8x128xf32>
    tpu.vector_store %arg2[%c0_27, %c0_28], %92 {strides = array<i32>} : memref<8x128xf32, #tpu.memory_space<vmem>>, vector<8x128xf32>,
    return
  }
}

module attributes {stable_mosaic.version = 11 : i64} {
  func.func @_moco_fused_kernel(%arg0: i32, %arg1: memref<64x256xbf16, #tpu.memory_space<vmem>>, %arg2: memref<256x256xf32, #tpu.memory_space<vmem>>, %arg3: memref<1x256xf32, #tpu.memory_space<vmem>>, %arg4: memref<1x256xf32, #tpu.memory_space<vmem>>, %arg5: memref<256x128xf32, #tpu.memory_space<vmem>>, %arg6: memref<128x256xbf16, #tpu.memory_space<vmem>>, %arg7: memref<1x256xf32, #tpu.memory_space<vmem>>, %arg8: memref<1x256xf32, #tpu.memory_space<vmem>>, %arg9: memref<256x128xbf16, #tpu.memory_space<vmem>>, %arg10: memref<256x256xf32, #tpu.memory_space<vmem>>, %arg11: memref<1x256xf32, #tpu.memory_space<vmem>>, %arg12: memref<1x256xf32, #tpu.memory_space<vmem>>, %arg13: memref<256x128xf32, #tpu.memory_space<vmem>>, %arg14: memref<64x128xf32, #tpu.memory_space<vmem>>, %arg15: memref<64x128xf32, #tpu.memory_space<vmem>>, %arg16: memref<256x256xf32, #tpu.memory_space<vmem>>, %arg17: memref<1x256xf32, #tpu.memory_space<vmem>>, %arg18: memref<1x256xf32, #tpu.memory_space<vmem>>, %arg19: memref<256x128xf32, #tpu.memory_space<vmem>>, %arg20: memref<64x256xf32, #tpu.memory_space<vmem>>, %arg21: memref<64x256xf32, #tpu.memory_space<vmem>>) attributes {dimension_semantics = [#tpu.dimension_semantics<arbitrary>], iteration_bounds = array<i64: 1>, scalar_prefetch = 0 : i64, scratch_operands = 2 : i64, tpu.core_type = #tpu.core_type<tc>, window_params = [{transform_indices = @transform_0, window_bounds = array<i64: 64, 256>}, {transform_indices = @transform_1, window_bounds = array<i64: 256, 256>}, {pipeline_mode = #tpu.pipeline_mode<synchronous>, transform_indices = @transform_2, window_bounds = array<i64: 1, 256>}, {pipeline_mode = #tpu.pipeline_mode<synchronous>, transform_indices = @transform_3, window_bounds = array<i64: 1, 256>}, {pipeline_mode = #tpu.pipeline_mode<synchronous>, transform_indices = @transform_4, window_bounds = array<i64: 256, 128>}, {pipeline_mode = #tpu.pipeline_mode<synchronous>, transform_indices = @transform_5, window_bounds = array<i64: 128, 256>}, {pipeline_mode = #tpu.pipeline_mode<synchronous>, transform_indices = @transform_6, window_bounds = array<i64: 1, 256>}, {pipeline_mode = #tpu.pipeline_mode<synchronous>, transform_indices = @transform_7, window_bounds = array<i64: 1, 256>}, {pipeline_mode = #tpu.pipeline_mode<synchronous>, transform_indices = @transform_8, window_bounds = array<i64: 256, 128>}, {transform_indices = @transform_9, window_bounds = array<i64: 256, 256>}, {pipeline_mode = #tpu.pipeline_mode<synchronous>, transform_indices = @transform_10, window_bounds = array<i64: 1, 256>}, {pipeline_mode = #tpu.pipeline_mode<synchronous>, transform_indices = @transform_11, window_bounds = array<i64: 1, 256>}, {pipeline_mode = #tpu.pipeline_mode<synchronous>, transform_indices = @transform_12, window_bounds = array<i64: 256, 128>}, {pipeline_mode = #tpu.pipeline_mode<synchronous>, transform_indices = @transform_13, window_bounds = array<i64: 64, 128>}, {pipeline_mode = #tpu.pipeline_mode<synchronous>, transform_indices = @transform_14, window_bounds = array<i64: 64, 128>}, {transform_indices = @transform_15, window_bounds = array<i64: 256, 256>}, {pipeline_mode = #tpu.pipeline_mode<synchronous>, transform_indices = @transform_16, window_bounds = array<i64: 1, 256>}, {pipeline_mode = #tpu.pipeline_mode<synchronous>, transform_indices = @transform_17, window_bounds = array<i64: 1, 256>}, {pipeline_mode = #tpu.pipeline_mode<synchronous>, transform_indices = @transform_18, window_bounds = array<i64: 256, 128>}]} {
    %c0_i32 = arith.constant 0 : i32
    %0 = arith.cmpi eq, %arg0, %c0_i32 : i32
    %1 = arith.extui %0 : i1 to i32
    %c0_i32_0 = arith.constant 0 : i32
    %2 = arith.cmpi ne, %1, %c0_i32_0 : i32
    scf.if %2 {
      %cst_21 = arith.constant 0.000000e+00 : f32
      %25 = vector.broadcast %cst_21 : f32 to vector<64x256xf32>
      %c0_22 = arith.constant 0 : index
      %c0_23 = arith.constant 0 : index
      %26 = vector.load %arg20[%c0_22, %c0_23] : memref<64x256xf32, #tpu.memory_space<vmem>>, vector<64x256xf32>
      tpu.vector_store %arg20[%c0_22, %c0_23], %25 {strides = array<i32>} : memref<64x256xf32, #tpu.memory_space<vmem>>, vector<64x256xf32>,
      %cst_24 = arith.constant 0.000000e+00 : f32
      %27 = vector.broadcast %cst_24 : f32 to vector<64x256xf32>
      %c0_25 = arith.constant 0 : index
      %c0_26 = arith.constant 0 : index
      %28 = vector.load %arg21[%c0_25, %c0_26] : memref<64x256xf32, #tpu.memory_space<vmem>>, vector<64x256xf32>
      tpu.vector_store %arg21[%c0_25, %c0_26], %27 {strides = array<i32>} : memref<64x256xf32, #tpu.memory_space<vmem>>, vector<64x256xf32>,
    } else {
    }
    %c0 = arith.constant 0 : index
    %c0_1 = arith.constant 0 : index
    %3 = vector.load %arg1[%c0, %c0_1] : memref<64x256xbf16, #tpu.memory_space<vmem>>, vector<64x256xbf16>
    %c0_2 = arith.constant 0 : index
    %c0_3 = arith.constant 0 : index
    %4 = vector.load %arg2[%c0_2, %c0_3] : memref<256x256xf32, #tpu.memory_space<vmem>>, vector<256x256xf32>
    %c0_4 = arith.constant 0 : index
    %c0_5 = arith.constant 0 : index
    %5 = vector.load %arg10[%c0_4, %c0_5] : memref<256x256xf32, #tpu.memory_space<vmem>>, vector<256x256xf32>
    %cst = arith.constant 9.900000e-01 : f32
    %6 = vector.broadcast %cst : f32 to vector<256x256xf32>
    %7 = arith.mulf %5, %6 : vector<256x256xf32>
    %cst_6 = arith.constant 0.00999999977 : f32
    %8 = vector.broadcast %cst_6 : f32 to vector<256x256xf32>
    %9 = arith.mulf %4, %8 : vector<256x256xf32>
    %10 = arith.addf %7, %9 : vector<256x256xf32>
    %c0_7 = arith.constant 0 : index
    %c0_8 = arith.constant 0 : index
    %11 = vector.load %arg16[%c0_7, %c0_8] : memref<256x256xf32, #tpu.memory_space<vmem>>, vector<256x256xf32>
    tpu.vector_store %arg16[%c0_7, %c0_8], %10 {strides = array<i32>} : memref<256x256xf32, #tpu.memory_space<vmem>>, vector<256x256xf32>,
    %c0_9 = arith.constant 0 : index
    %c0_10 = arith.constant 0 : index
    %12 = vector.load %arg20[%c0_9, %c0_10] : memref<64x256xf32, #tpu.memory_space<vmem>>, vector<64x256xf32>
    %13 = arith.truncf %4 : vector<256x256xf32> to vector<256x256xbf16>
    %cst_11 = arith.constant dense<0.000000e+00> : vector<64x256xf32>
    %14 = tpu.matmul %3, %13, %cst_11 {dimension_numbers = #tpu.dot_dimension_numbers<[1], [0], [0], [1], [0, 0, 1, 1], [], []>} : vector<64x256xbf16>, vector<256x256xbf16>, vector<64x256xf32> -> vector<64x256xf32>
    %15 = arith.addf %12, %14 : vector<64x256xf32>
    %c0_12 = arith.constant 0 : index
    %c0_13 = arith.constant 0 : index
    %16 = vector.load %arg20[%c0_12, %c0_13] : memref<64x256xf32, #tpu.memory_space<vmem>>, vector<64x256xf32>
    tpu.vector_store %arg20[%c0_12, %c0_13], %15 {strides = array<i32>} : memref<64x256xf32, #tpu.memory_space<vmem>>, vector<64x256xf32>,
    %c0_14 = arith.constant 0 : index
    %c0_15 = arith.constant 0 : index
    %17 = vector.load %arg21[%c0_14, %c0_15] : memref<64x256xf32, #tpu.memory_space<vmem>>, vector<64x256xf32>
    %18 = arith.truncf %10 : vector<256x256xf32> to vector<256x256xbf16>
    %cst_16 = arith.constant dense<0.000000e+00> : vector<64x256xf32>
    %19 = tpu.matmul %3, %18, %cst_16 {dimension_numbers = #tpu.dot_dimension_numbers<[1], [0], [0], [1], [0, 0, 1, 1], [], []>} : vector<64x256xbf16>, vector<256x256xbf16>, vector<64x256xf32> -> vector<64x256xf32>
    %20 = arith.addf %17, %19 : vector<64x256xf32>
    %c0_17 = arith.constant 0 : index
    %c0_18 = arith.constant 0 : index
    %21 = vector.load %arg21[%c0_17, %c0_18] : memref<64x256xf32, #tpu.memory_space<vmem>>, vector<64x256xf32>
    tpu.vector_store %arg21[%c0_17, %c0_18], %20 {strides = array<i32>} : memref<64x256xf32, #tpu.memory_space<vmem>>, vector<64x256xf32>,
    %c0_i32_19 = arith.constant 0 : i32
    %22 = arith.cmpi eq, %arg0, %c0_i32_19 : i32
    %23 = arith.extui %22 : i1 to i32
    %c0_i32_20 = arith.constant 0 : i32
    %24 = arith.cmpi ne, %23, %c0_i32_20 : i32
    scf.if %24 {
      %c0_21 = arith.constant 0 : index
      %c0_22 = arith.constant 0 : index
      %25 = vector.load %arg11[%c0_21, %c0_22] : memref<1x256xf32, #tpu.memory_space<vmem>>, vector<1x256xf32>
      %cst_23 = arith.constant 9.900000e-01 : f32
      %26 = vector.broadcast %cst_23 : f32 to vector<1x256xf32>
      %27 = arith.mulf %25, %26 : vector<1x256xf32>
      %c0_24 = arith.constant 0 : index
      %c0_25 = arith.constant 0 : index
      %28 = vector.load %arg3[%c0_24, %c0_25] : memref<1x256xf32, #tpu.memory_space<vmem>>, vector<1x256xf32>
      %cst_26 = arith.constant 0.00999999977 : f32
      %29 = vector.broadcast %cst_26 : f32 to vector<1x256xf32>
      %30 = arith.mulf %28, %29 : vector<1x256xf32>
      %31 = arith.addf %27, %30 : vector<1x256xf32>
      %c0_27 = arith.constant 0 : index
      %c0_28 = arith.constant 0 : index
      %32 = vector.load %arg12[%c0_27, %c0_28] : memref<1x256xf32, #tpu.memory_space<vmem>>, vector<1x256xf32>
      %cst_29 = arith.constant 9.900000e-01 : f32
      %33 = vector.broadcast %cst_29 : f32 to vector<1x256xf32>
      %34 = arith.mulf %32, %33 : vector<1x256xf32>
      %c0_30 = arith.constant 0 : index
      %c0_31 = arith.constant 0 : index
      %35 = vector.load %arg4[%c0_30, %c0_31] : memref<1x256xf32, #tpu.memory_space<vmem>>, vector<1x256xf32>
      %cst_32 = arith.constant 0.00999999977 : f32
      %36 = vector.broadcast %cst_32 : f32 to vector<1x256xf32>
      %37 = arith.mulf %35, %36 : vector<1x256xf32>
      %38 = arith.addf %34, %37 : vector<1x256xf32>
      %c0_33 = arith.constant 0 : index
      %c0_34 = arith.constant 0 : index
      %39 = vector.load %arg13[%c0_33, %c0_34] : memref<256x128xf32, #tpu.memory_space<vmem>>, vector<256x128xf32>
      %cst_35 = arith.constant 9.900000e-01 : f32
      %40 = vector.broadcast %cst_35 : f32 to vector<256x128xf32>
      %41 = arith.mulf %39, %40 : vector<256x128xf32>
      %c0_36 = arith.constant 0 : index
      %c0_37 = arith.constant 0 : index
      %42 = vector.load %arg5[%c0_36, %c0_37] : memref<256x128xf32, #tpu.memory_space<vmem>>, vector<256x128xf32>
      %cst_38 = arith.constant 0.00999999977 : f32
      %43 = vector.broadcast %cst_38 : f32 to vector<256x128xf32>
      %44 = arith.mulf %42, %43 : vector<256x128xf32>
      %45 = arith.addf %41, %44 : vector<256x128xf32>
      %c0_39 = arith.constant 0 : index
      %c0_40 = arith.constant 0 : index
      %46 = vector.load %arg17[%c0_39, %c0_40] : memref<1x256xf32, #tpu.memory_space<vmem>>, vector<1x256xf32>
      tpu.vector_store %arg17[%c0_39, %c0_40], %31 {strides = array<i32>} : memref<1x256xf32, #tpu.memory_space<vmem>>, vector<1x256xf32>,
      %c0_41 = arith.constant 0 : index
      %c0_42 = arith.constant 0 : index
      %47 = vector.load %arg18[%c0_41, %c0_42] : memref<1x256xf32, #tpu.memory_space<vmem>>, vector<1x256xf32>
      tpu.vector_store %arg18[%c0_41, %c0_42], %38 {strides = array<i32>} : memref<1x256xf32, #tpu.memory_space<vmem>>, vector<1x256xf32>,
      %c0_43 = arith.constant 0 : index
      %c0_44 = arith.constant 0 : index
      %48 = vector.load %arg19[%c0_43, %c0_44] : memref<256x128xf32, #tpu.memory_space<vmem>>, vector<256x128xf32>
      tpu.vector_store %arg19[%c0_43, %c0_44], %45 {strides = array<i32>} : memref<256x128xf32, #tpu.memory_space<vmem>>, vector<256x128xf32>,
      %c0_45 = arith.constant 0 : index
      %c0_46 = arith.constant 0 : index
      %49 = vector.load %arg21[%c0_45, %c0_46] : memref<64x256xf32, #tpu.memory_space<vmem>>, vector<64x256xf32>
      %50 = vector.extract_strided_slice %49 {offsets = [0, 0], sizes = [32, 256], strides = [1, 1]} : vector<64x256xf32> to vector<32x256xf32>
      %cst_47 = arith.constant dense<0.000000e+00> : vector<256xf32>
      %51 = vector.multi_reduction <add>, %50, %cst_47 [0] : vector<32x256xf32> to vector<256xf32>
      %52 = vector.shape_cast %51 : vector<256xf32> to vector<1x256xf32>
      %cst_48 = arith.constant 3.200000e+01 : f32
      %53 = vector.broadcast %cst_48 : f32 to vector<1x256xf32>
      %54 = arith.divf %52, %53 : vector<1x256xf32>
      %55 = arith.mulf %50, %50 : vector<32x256xf32>
      %cst_49 = arith.constant dense<0.000000e+00> : vector<256xf32>
      %56 = vector.multi_reduction <add>, %55, %cst_49 [0] : vector<32x256xf32> to vector<256xf32>
      %57 = vector.shape_cast %56 : vector<256xf32> to vector<1x256xf32>
      %cst_50 = arith.constant 3.200000e+01 : f32
      %58 = vector.broadcast %cst_50 : f32 to vector<1x256xf32>
      %59 = arith.divf %57, %58 : vector<1x256xf32>
      %60 = arith.mulf %54, %54 : vector<1x256xf32>
      %61 = arith.subf %59, %60 : vector<1x256xf32>
      %cst_51 = arith.constant 0.000000e+00 : f32
      %62 = vector.broadcast %cst_51 : f32 to vector<1x256xf32>
      %63 = arith.maximumf %61, %62 : vector<1x256xf32>
      %64 = vector.broadcast %54 : vector<1x256xf32> to vector<32x256xf32>
      %65 = arith.subf %50, %64 : vector<32x256xf32>
      %cst_52 = arith.constant 9.99999974E-6 : f32
      %66 = vector.broadcast %cst_52 : f32 to vector<1x256xf32>
      %67 = arith.addf %63, %66 : vector<1x256xf32>
      %68 = math.rsqrt %67 : vector<1x256xf32>
      %69 = vector.broadcast %68 : vector<1x256xf32> to vector<32x256xf32>
      %70 = arith.mulf %65, %69 : vector<32x256xf32>
      %71 = vector.broadcast %31 : vector<1x256xf32> to vector<32x256xf32>
      %72 = arith.mulf %70, %71 : vector<32x256xf32>
      %73 = vector.broadcast %38 : vector<1x256xf32> to vector<32x256xf32>
      %74 = arith.addf %72, %73 : vector<32x256xf32>
      %cst_53 = arith.constant 0.000000e+00 : f32
      %75 = vector.broadcast %cst_53 : f32 to vector<32x256xf32>
      %76 = arith.maximumf %74, %75 : vector<32x256xf32>
      %77 = vector.extract_strided_slice %49 {offsets = [32, 0], sizes = [32, 256], strides = [1, 1]} : vector<64x256xf32> to vector<32x256xf32>
      %cst_54 = arith.constant dense<0.000000e+00> : vector<256xf32>
      %78 = vector.multi_reduction <add>, %77, %cst_54 [0] : vector<32x256xf32> to vector<256xf32>
      %79 = vector.shape_cast %78 : vector<256xf32> to vector<1x256xf32>
      %cst_55 = arith.constant 3.200000e+01 : f32
      %80 = vector.broadcast %cst_55 : f32 to vector<1x256xf32>
      %81 = arith.divf %79, %80 : vector<1x256xf32>
      %82 = arith.mulf %77, %77 : vector<32x256xf32>
      %cst_56 = arith.constant dense<0.000000e+00> : vector<256xf32>
      %83 = vector.multi_reduction <add>, %82, %cst_56 [0] : vector<32x256xf32> to vector<256xf32>
      %84 = vector.shape_cast %83 : vector<256xf32> to vector<1x256xf32>
      %cst_57 = arith.constant 3.200000e+01 : f32
      %85 = vector.broadcast %cst_57 : f32 to vector<1x256xf32>
      %86 = arith.divf %84, %85 : vector<1x256xf32>
      %87 = arith.mulf %81, %81 : vector<1x256xf32>
      %88 = arith.subf %86, %87 : vector<1x256xf32>
      %cst_58 = arith.constant 0.000000e+00 : f32
      %89 = vector.broadcast %cst_58 : f32 to vector<1x256xf32>
      %90 = arith.maximumf %88, %89 : vector<1x256xf32>
      %91 = vector.broadcast %81 : vector<1x256xf32> to vector<32x256xf32>
      %92 = arith.subf %77, %91 : vector<32x256xf32>
      %cst_59 = arith.constant 9.99999974E-6 : f32
      %93 = vector.broadcast %cst_59 : f32 to vector<1x256xf32>
      %94 = arith.addf %90, %93 : vector<1x256xf32>
      %95 = math.rsqrt %94 : vector<1x256xf32>
      %96 = vector.broadcast %95 : vector<1x256xf32> to vector<32x256xf32>
      %97 = arith.mulf %92, %96 : vector<32x256xf32>
      %98 = vector.broadcast %31 : vector<1x256xf32> to vector<32x256xf32>
      %99 = arith.mulf %97, %98 : vector<32x256xf32>
      %100 = vector.broadcast %38 : vector<1x256xf32> to vector<32x256xf32>
      %101 = arith.addf %99, %100 : vector<32x256xf32>
      %cst_60 = arith.constant 0.000000e+00 : f32
      %102 = vector.broadcast %cst_60 : f32 to vector<32x256xf32>
      %103 = arith.maximumf %101, %102 : vector<32x256xf32>
      %104 = tpu.concatenate %76, %103 in 0 : vector<32x256xf32>, vector<32x256xf32> -> vector<64x256xf32>
      %c0_61 = arith.constant 0 : index
      %c0_62 = arith.constant 0 : index
      %105 = vector.load %arg21[%c0_61, %c0_62] : memref<64x256xf32, #tpu.memory_space<vmem>>, vector<64x256xf32>
      tpu.vector_store %arg21[%c0_61, %c0_62], %104 {strides = array<i32>} : memref<64x256xf32, #tpu.memory_space<vmem>>, vector<64x256xf32>,
      %c0_63 = arith.constant 0 : index
      %c0_64 = arith.constant 0 : index
      %106 = vector.load %arg21[%c0_63, %c0_64] : memref<64x256xf32, #tpu.memory_space<vmem>>, vector<64x256xf32>
      %107 = arith.truncf %106 : vector<64x256xf32> to vector<64x256xbf16>
      %108 = arith.truncf %45 : vector<256x128xf32> to vector<256x128xbf16>
      %cst_65 = arith.constant dense<0.000000e+00> : vector<64x128xf32>
      %109 = tpu.matmul %107, %108, %cst_65 {dimension_numbers = #tpu.dot_dimension_numbers<[1], [0], [0], [1], [0, 0, 1, 1], [], []>} : vector<64x256xbf16>, vector<256x128xbf16>, vector<64x128xf32> -> vector<64x128xf32>
      %110 = vector.extract_strided_slice %109 {offsets = [0, 0], sizes = [32, 128], strides = [1, 1]} : vector<64x128xf32> to vector<32x128xf32>
      %cst_66 = arith.constant dense<0.000000e+00> : vector<128xf32>
      %111 = vector.multi_reduction <add>, %110, %cst_66 [0] : vector<32x128xf32> to vector<128xf32>
      %112 = vector.shape_cast %111 : vector<128xf32> to vector<1x128xf32>
      %cst_67 = arith.constant 3.200000e+01 : f32
      %113 = vector.broadcast %cst_67 : f32 to vector<1x128xf32>
      %114 = arith.divf %112, %113 : vector<1x128xf32>
      %115 = arith.mulf %110, %110 : vector<32x128xf32>
      %cst_68 = arith.constant dense<0.000000e+00> : vector<128xf32>
      %116 = vector.multi_reduction <add>, %115, %cst_68 [0] : vector<32x128xf32> to vector<128xf32>
      %117 = vector.shape_cast %116 : vector<128xf32> to vector<1x128xf32>
      %cst_69 = arith.constant 3.200000e+01 : f32
      %118 = vector.broadcast %cst_69 : f32 to vector<1x128xf32>
      %119 = arith.divf %117, %118 : vector<1x128xf32>
      %120 = arith.mulf %114, %114 : vector<1x128xf32>
      %121 = arith.subf %119, %120 : vector<1x128xf32>
      %cst_70 = arith.constant 0.000000e+00 : f32
      %122 = vector.broadcast %cst_70 : f32 to vector<1x128xf32>
      %123 = arith.maximumf %121, %122 : vector<1x128xf32>
      %124 = vector.broadcast %114 : vector<1x128xf32> to vector<32x128xf32>
      %125 = arith.subf %110, %124 : vector<32x128xf32>
      %cst_71 = arith.constant 9.99999974E-6 : f32
      %126 = vector.broadcast %cst_71 : f32 to vector<1x128xf32>
      %127 = arith.addf %123, %126 : vector<1x128xf32>
      %128 = math.rsqrt %127 : vector<1x128xf32>
      %129 = vector.broadcast %128 : vector<1x128xf32> to vector<32x128xf32>
      %130 = arith.mulf %125, %129 : vector<32x128xf32>
      %131 = vector.extract_strided_slice %109 {offsets = [32, 0], sizes = [32, 128], strides = [1, 1]} : vector<64x128xf32> to vector<32x128xf32>
      %cst_72 = arith.constant dense<0.000000e+00> : vector<128xf32>
      %132 = vector.multi_reduction <add>, %131, %cst_72 [0] : vector<32x128xf32> to vector<128xf32>
      %133 = vector.shape_cast %132 : vector<128xf32> to vector<1x128xf32>
      %cst_73 = arith.constant 3.200000e+01 : f32
      %134 = vector.broadcast %cst_73 : f32 to vector<1x128xf32>
      %135 = arith.divf %133, %134 : vector<1x128xf32>
      %136 = arith.mulf %131, %131 : vector<32x128xf32>
      %cst_74 = arith.constant dense<0.000000e+00> : vector<128xf32>
      %137 = vector.multi_reduction <add>, %136, %cst_74 [0] : vector<32x128xf32> to vector<128xf32>
      %138 = vector.shape_cast %137 : vector<128xf32> to vector<1x128xf32>
      %cst_75 = arith.constant 3.200000e+01 : f32
      %139 = vector.broadcast %cst_75 : f32 to vector<1x128xf32>
      %140 = arith.divf %138, %139 : vector<1x128xf32>
      %141 = arith.mulf %135, %135 : vector<1x128xf32>
      %142 = arith.subf %140, %141 : vector<1x128xf32>
      %cst_76 = arith.constant 0.000000e+00 : f32
      %143 = vector.broadcast %cst_76 : f32 to vector<1x128xf32>
      %144 = arith.maximumf %142, %143 : vector<1x128xf32>
      %145 = vector.broadcast %135 : vector<1x128xf32> to vector<32x128xf32>
      %146 = arith.subf %131, %145 : vector<32x128xf32>
      %cst_77 = arith.constant 9.99999974E-6 : f32
      %147 = vector.broadcast %cst_77 : f32 to vector<1x128xf32>
      %148 = arith.addf %144, %147 : vector<1x128xf32>
      %149 = math.rsqrt %148 : vector<1x128xf32>
      %150 = vector.broadcast %149 : vector<1x128xf32> to vector<32x128xf32>
      %151 = arith.mulf %146, %150 : vector<32x128xf32>
      %152 = tpu.concatenate %130, %151 in 0 : vector<32x128xf32>, vector<32x128xf32> -> vector<64x128xf32>
      %c0_78 = arith.constant 0 : index
      %c0_79 = arith.constant 0 : index
      %153 = vector.load %arg15[%c0_78, %c0_79] : memref<64x128xf32, #tpu.memory_space<vmem>>, vector<64x128xf32>
      tpu.vector_store %arg15[%c0_78, %c0_79], %152 {strides = array<i32>} : memref<64x128xf32, #tpu.memory_space<vmem>>, vector<64x128xf32>,
      %c0_80 = arith.constant 0 : index
      %c0_81 = arith.constant 0 : index
      %154 = vector.load %arg20[%c0_80, %c0_81] : memref<64x256xf32, #tpu.memory_space<vmem>>, vector<64x256xf32>
      %c0_82 = arith.constant 0 : index
      %c0_83 = arith.constant 0 : index
      %155 = vector.load %arg3[%c0_82, %c0_83] : memref<1x256xf32, #tpu.memory_space<vmem>>, vector<1x256xf32>
      %c0_84 = arith.constant 0 : index
      %c0_85 = arith.constant 0 : index
      %156 = vector.load %arg4[%c0_84, %c0_85] : memref<1x256xf32, #tpu.memory_space<vmem>>, vector<1x256xf32>
      %157 = vector.extract_strided_slice %154 {offsets = [0, 0], sizes = [32, 256], strides = [1, 1]} : vector<64x256xf32> to vector<32x256xf32>
      %cst_86 = arith.constant dense<0.000000e+00> : vector<256xf32>
      %158 = vector.multi_reduction <add>, %157, %cst_86 [0] : vector<32x256xf32> to vector<256xf32>
      %159 = vector.shape_cast %158 : vector<256xf32> to vector<1x256xf32>
      %cst_87 = arith.constant 3.200000e+01 : f32
      %160 = vector.broadcast %cst_87 : f32 to vector<1x256xf32>
      %161 = arith.divf %159, %160 : vector<1x256xf32>
      %162 = arith.mulf %157, %157 : vector<32x256xf32>
      %cst_88 = arith.constant dense<0.000000e+00> : vector<256xf32>
      %163 = vector.multi_reduction <add>, %162, %cst_88 [0] : vector<32x256xf32> to vector<256xf32>
      %164 = vector.shape_cast %163 : vector<256xf32> to vector<1x256xf32>
      %cst_89 = arith.constant 3.200000e+01 : f32
      %165 = vector.broadcast %cst_89 : f32 to vector<1x256xf32>
      %166 = arith.divf %164, %165 : vector<1x256xf32>
      %167 = arith.mulf %161, %161 : vector<1x256xf32>
      %168 = arith.subf %166, %167 : vector<1x256xf32>
      %cst_90 = arith.constant 0.000000e+00 : f32
      %169 = vector.broadcast %cst_90 : f32 to vector<1x256xf32>
      %170 = arith.maximumf %168, %169 : vector<1x256xf32>
      %171 = vector.broadcast %161 : vector<1x256xf32> to vector<32x256xf32>
      %172 = arith.subf %157, %171 : vector<32x256xf32>
      %cst_91 = arith.constant 9.99999974E-6 : f32
      %173 = vector.broadcast %cst_91 : f32 to vector<1x256xf32>
      %174 = arith.addf %170, %173 : vector<1x256xf32>
      %175 = math.rsqrt %174 : vector<1x256xf32>
      %176 = vector.broadcast %175 : vector<1x256xf32> to vector<32x256xf32>
      %177 = arith.mulf %172, %176 : vector<32x256xf32>
      %178 = vector.broadcast %155 : vector<1x256xf32> to vector<32x256xf32>
      %179 = arith.mulf %177, %178 : vector<32x256xf32>
      %180 = vector.broadcast %156 : vector<1x256xf32> to vector<32x256xf32>
      %181 = arith.addf %179, %180 : vector<32x256xf32>
      %cst_92 = arith.constant 0.000000e+00 : f32
      %182 = vector.broadcast %cst_92 : f32 to vector<32x256xf32>
      %183 = arith.maximumf %181, %182 : vector<32x256xf32>
      %184 = vector.extract_strided_slice %154 {offsets = [32, 0], sizes = [32, 256], strides = [1, 1]} : vector<64x256xf32> to vector<32x256xf32>
      %cst_93 = arith.constant dense<0.000000e+00> : vector<256xf32>
      %185 = vector.multi_reduction <add>, %184, %cst_93 [0] : vector<32x256xf32> to vector<256xf32>
      %186 = vector.shape_cast %185 : vector<256xf32> to vector<1x256xf32>
      %cst_94 = arith.constant 3.200000e+01 : f32
      %187 = vector.broadcast %cst_94 : f32 to vector<1x256xf32>
      %188 = arith.divf %186, %187 : vector<1x256xf32>
      %189 = arith.mulf %184, %184 : vector<32x256xf32>
      %cst_95 = arith.constant dense<0.000000e+00> : vector<256xf32>
      %190 = vector.multi_reduction <add>, %189, %cst_95 [0] : vector<32x256xf32> to vector<256xf32>
      %191 = vector.shape_cast %190 : vector<256xf32> to vector<1x256xf32>
      %cst_96 = arith.constant 3.200000e+01 : f32
      %192 = vector.broadcast %cst_96 : f32 to vector<1x256xf32>
      %193 = arith.divf %191, %192 : vector<1x256xf32>
      %194 = arith.mulf %188, %188 : vector<1x256xf32>
      %195 = arith.subf %193, %194 : vector<1x256xf32>
      %cst_97 = arith.constant 0.000000e+00 : f32
      %196 = vector.broadcast %cst_97 : f32 to vector<1x256xf32>
      %197 = arith.maximumf %195, %196 : vector<1x256xf32>
      %198 = vector.broadcast %188 : vector<1x256xf32> to vector<32x256xf32>
      %199 = arith.subf %184, %198 : vector<32x256xf32>
      %cst_98 = arith.constant 9.99999974E-6 : f32
      %200 = vector.broadcast %cst_98 : f32 to vector<1x256xf32>
      %201 = arith.addf %197, %200 : vector<1x256xf32>
      %202 = math.rsqrt %201 : vector<1x256xf32>
      %203 = vector.broadcast %202 : vector<1x256xf32> to vector<32x256xf32>
      %204 = arith.mulf %199, %203 : vector<32x256xf32>
      %205 = vector.broadcast %155 : vector<1x256xf32> to vector<32x256xf32>
      %206 = arith.mulf %204, %205 : vector<32x256xf32>
      %207 = vector.broadcast %156 : vector<1x256xf32> to vector<32x256xf32>
      %208 = arith.addf %206, %207 : vector<32x256xf32>
      %cst_99 = arith.constant 0.000000e+00 : f32
      %209 = vector.broadcast %cst_99 : f32 to vector<32x256xf32>
      %210 = arith.maximumf %208, %209 : vector<32x256xf32>
      %211 = tpu.concatenate %183, %210 in 0 : vector<32x256xf32>, vector<32x256xf32> -> vector<64x256xf32>
      %c0_100 = arith.constant 0 : index
      %c0_101 = arith.constant 0 : index
      %212 = vector.load %arg20[%c0_100, %c0_101] : memref<64x256xf32, #tpu.memory_space<vmem>>, vector<64x256xf32>
      tpu.vector_store %arg20[%c0_100, %c0_101], %211 {strides = array<i32>} : memref<64x256xf32, #tpu.memory_space<vmem>>, vector<64x256xf32>,
      %c0_102 = arith.constant 0 : index
      %c0_103 = arith.constant 0 : index
      %213 = vector.load %arg20[%c0_102, %c0_103] : memref<64x256xf32, #tpu.memory_space<vmem>>, vector<64x256xf32>
      %c0_104 = arith.constant 0 : index
      %c0_105 = arith.constant 0 : index
      %214 = vector.load %arg5[%c0_104, %c0_105] : memref<256x128xf32, #tpu.memory_space<vmem>>, vector<256x128xf32>
      %215 = arith.truncf %213 : vector<64x256xf32> to vector<64x256xbf16>
      %216 = arith.truncf %214 : vector<256x128xf32> to vector<256x128xbf16>
      %cst_106 = arith.constant dense<0.000000e+00> : vector<64x128xf32>
      %217 = tpu.matmul %215, %216, %cst_106 {dimension_numbers = #tpu.dot_dimension_numbers<[1], [0], [0], [1], [0, 0, 1, 1], [], []>} : vector<64x256xbf16>, vector<256x128xbf16>, vector<64x128xf32> -> vector<64x128xf32>
      %218 = vector.extract_strided_slice %217 {offsets = [0, 0], sizes = [32, 128], strides = [1, 1]} : vector<64x128xf32> to vector<32x128xf32>
      %cst_107 = arith.constant dense<0.000000e+00> : vector<128xf32>
      %219 = vector.multi_reduction <add>, %218, %cst_107 [0] : vector<32x128xf32> to vector<128xf32>
      %220 = vector.shape_cast %219 : vector<128xf32> to vector<1x128xf32>
      %cst_108 = arith.constant 3.200000e+01 : f32
      %221 = vector.broadcast %cst_108 : f32 to vector<1x128xf32>
      %222 = arith.divf %220, %221 : vector<1x128xf32>
      %223 = arith.mulf %218, %218 : vector<32x128xf32>
      %cst_109 = arith.constant dense<0.000000e+00> : vector<128xf32>
      %224 = vector.multi_reduction <add>, %223, %cst_109 [0] : vector<32x128xf32> to vector<128xf32>
      %225 = vector.shape_cast %224 : vector<128xf32> to vector<1x128xf32>
      %cst_110 = arith.constant 3.200000e+01 : f32
      %226 = vector.broadcast %cst_110 : f32 to vector<1x128xf32>
      %227 = arith.divf %225, %226 : vector<1x128xf32>
      %228 = arith.mulf %222, %222 : vector<1x128xf32>
      %229 = arith.subf %227, %228 : vector<1x128xf32>
      %cst_111 = arith.constant 0.000000e+00 : f32
      %230 = vector.broadcast %cst_111 : f32 to vector<1x128xf32>
      %231 = arith.maximumf %229, %230 : vector<1x128xf32>
      %232 = vector.broadcast %222 : vector<1x128xf32> to vector<32x128xf32>
      %233 = arith.subf %218, %232 : vector<32x128xf32>
      %cst_112 = arith.constant 9.99999974E-6 : f32
      %234 = vector.broadcast %cst_112 : f32 to vector<1x128xf32>
      %235 = arith.addf %231, %234 : vector<1x128xf32>
      %236 = math.rsqrt %235 : vector<1x128xf32>
      %237 = vector.broadcast %236 : vector<1x128xf32> to vector<32x128xf32>
      %238 = arith.mulf %233, %237 : vector<32x128xf32>
      %239 = vector.extract_strided_slice %217 {offsets = [32, 0], sizes = [32, 128], strides = [1, 1]} : vector<64x128xf32> to vector<32x128xf32>
      %cst_113 = arith.constant dense<0.000000e+00> : vector<128xf32>
      %240 = vector.multi_reduction <add>, %239, %cst_113 [0] : vector<32x128xf32> to vector<128xf32>
      %241 = vector.shape_cast %240 : vector<128xf32> to vector<1x128xf32>
      %cst_114 = arith.constant 3.200000e+01 : f32
      %242 = vector.broadcast %cst_114 : f32 to vector<1x128xf32>
      %243 = arith.divf %241, %242 : vector<1x128xf32>
      %244 = arith.mulf %239, %239 : vector<32x128xf32>
      %cst_115 = arith.constant dense<0.000000e+00> : vector<128xf32>
      %245 = vector.multi_reduction <add>, %244, %cst_115 [0] : vector<32x128xf32> to vector<128xf32>
      %246 = vector.shape_cast %245 : vector<128xf32> to vector<1x128xf32>
      %cst_116 = arith.constant 3.200000e+01 : f32
      %247 = vector.broadcast %cst_116 : f32 to vector<1x128xf32>
      %248 = arith.divf %246, %247 : vector<1x128xf32>
      %249 = arith.mulf %243, %243 : vector<1x128xf32>
      %250 = arith.subf %248, %249 : vector<1x128xf32>
      %cst_117 = arith.constant 0.000000e+00 : f32
      %251 = vector.broadcast %cst_117 : f32 to vector<1x128xf32>
      %252 = arith.maximumf %250, %251 : vector<1x128xf32>
      %253 = vector.broadcast %243 : vector<1x128xf32> to vector<32x128xf32>
      %254 = arith.subf %239, %253 : vector<32x128xf32>
      %cst_118 = arith.constant 9.99999974E-6 : f32
      %255 = vector.broadcast %cst_118 : f32 to vector<1x128xf32>
      %256 = arith.addf %252, %255 : vector<1x128xf32>
      %257 = math.rsqrt %256 : vector<1x128xf32>
      %258 = vector.broadcast %257 : vector<1x128xf32> to vector<32x128xf32>
      %259 = arith.mulf %254, %258 : vector<32x128xf32>
      %260 = tpu.concatenate %238, %259 in 0 : vector<32x128xf32>, vector<32x128xf32> -> vector<64x128xf32>
      %c0_119 = arith.constant 0 : index
      %c0_120 = arith.constant 0 : index
      %261 = vector.load %arg6[%c0_119, %c0_120] : memref<128x256xbf16, #tpu.memory_space<vmem>>, vector<128x256xbf16>
      %262 = arith.truncf %260 : vector<64x128xf32> to vector<64x128xbf16>
      %cst_121 = arith.constant dense<0.000000e+00> : vector<64x256xf32>
      %263 = tpu.matmul %262, %261, %cst_121 {dimension_numbers = #tpu.dot_dimension_numbers<[1], [0], [0], [1], [0, 0, 1, 1], [], []>} : vector<64x128xbf16>, vector<128x256xbf16>, vector<64x256xf32> -> vector<64x256xf32>
      %c0_122 = arith.constant 0 : index
      %c0_123 = arith.constant 0 : index
      %264 = vector.load %arg7[%c0_122, %c0_123] : memref<1x256xf32, #tpu.memory_space<vmem>>, vector<1x256xf32>
      %c0_124 = arith.constant 0 : index
      %c0_125 = arith.constant 0 : index
      %265 = vector.load %arg8[%c0_124, %c0_125] : memref<1x256xf32, #tpu.memory_space<vmem>>, vector<1x256xf32>
      %266 = vector.extract_strided_slice %263 {offsets = [0, 0], sizes = [32, 256], strides = [1, 1]} : vector<64x256xf32> to vector<32x256xf32>
      %cst_126 = arith.constant dense<0.000000e+00> : vector<256xf32>
      %267 = vector.multi_reduction <add>, %266, %cst_126 [0] : vector<32x256xf32> to vector<256xf32>
      %268 = vector.shape_cast %267 : vector<256xf32> to vector<1x256xf32>
      %cst_127 = arith.constant 3.200000e+01 : f32
      %269 = vector.broadcast %cst_127 : f32 to vector<1x256xf32>
      %270 = arith.divf %268, %269 : vector<1x256xf32>
      %271 = arith.mulf %266, %266 : vector<32x256xf32>
      %cst_128 = arith.constant dense<0.000000e+00> : vector<256xf32>
      %272 = vector.multi_reduction <add>, %271, %cst_128 [0] : vector<32x256xf32> to vector<256xf32>
      %273 = vector.shape_cast %272 : vector<256xf32> to vector<1x256xf32>
      %cst_129 = arith.constant 3.200000e+01 : f32
      %274 = vector.broadcast %cst_129 : f32 to vector<1x256xf32>
      %275 = arith.divf %273, %274 : vector<1x256xf32>
      %276 = arith.mulf %270, %270 : vector<1x256xf32>
      %277 = arith.subf %275, %276 : vector<1x256xf32>
      %cst_130 = arith.constant 0.000000e+00 : f32
      %278 = vector.broadcast %cst_130 : f32 to vector<1x256xf32>
      %279 = arith.maximumf %277, %278 : vector<1x256xf32>
      %280 = vector.broadcast %270 : vector<1x256xf32> to vector<32x256xf32>
      %281 = arith.subf %266, %280 : vector<32x256xf32>
      %cst_131 = arith.constant 9.99999974E-6 : f32
      %282 = vector.broadcast %cst_131 : f32 to vector<1x256xf32>
      %283 = arith.addf %279, %282 : vector<1x256xf32>
      %284 = math.rsqrt %283 : vector<1x256xf32>
      %285 = vector.broadcast %284 : vector<1x256xf32> to vector<32x256xf32>
      %286 = arith.mulf %281, %285 : vector<32x256xf32>
      %287 = vector.broadcast %264 : vector<1x256xf32> to vector<32x256xf32>
      %288 = arith.mulf %286, %287 : vector<32x256xf32>
      %289 = vector.broadcast %265 : vector<1x256xf32> to vector<32x256xf32>
      %290 = arith.addf %288, %289 : vector<32x256xf32>
      %cst_132 = arith.constant 0.000000e+00 : f32
      %291 = vector.broadcast %cst_132 : f32 to vector<32x256xf32>
      %292 = arith.maximumf %290, %291 : vector<32x256xf32>
      %293 = vector.extract_strided_slice %263 {offsets = [32, 0], sizes = [32, 256], strides = [1, 1]} : vector<64x256xf32> to vector<32x256xf32>
      %cst_133 = arith.constant dense<0.000000e+00> : vector<256xf32>
      %294 = vector.multi_reduction <add>, %293, %cst_133 [0] : vector<32x256xf32> to vector<256xf32>
      %295 = vector.shape_cast %294 : vector<256xf32> to vector<1x256xf32>
      %cst_134 = arith.constant 3.200000e+01 : f32
      %296 = vector.broadcast %cst_134 : f32 to vector<1x256xf32>
      %297 = arith.divf %295, %296 : vector<1x256xf32>
      %298 = arith.mulf %293, %293 : vector<32x256xf32>
      %cst_135 = arith.constant dense<0.000000e+00> : vector<256xf32>
      %299 = vector.multi_reduction <add>, %298, %cst_135 [0] : vector<32x256xf32> to vector<256xf32>
      %300 = vector.shape_cast %299 : vector<256xf32> to vector<1x256xf32>
      %cst_136 = arith.constant 3.200000e+01 : f32
      %301 = vector.broadcast %cst_136 : f32 to vector<1x256xf32>
      %302 = arith.divf %300, %301 : vector<1x256xf32>
      %303 = arith.mulf %297, %297 : vector<1x256xf32>
      %304 = arith.subf %302, %303 : vector<1x256xf32>
      %cst_137 = arith.constant 0.000000e+00 : f32
      %305 = vector.broadcast %cst_137 : f32 to vector<1x256xf32>
      %306 = arith.maximumf %304, %305 : vector<1x256xf32>
      %307 = vector.broadcast %297 : vector<1x256xf32> to vector<32x256xf32>
      %308 = arith.subf %293, %307 : vector<32x256xf32>
      %cst_138 = arith.constant 9.99999974E-6 : f32
      %309 = vector.broadcast %cst_138 : f32 to vector<1x256xf32>
      %310 = arith.addf %306, %309 : vector<1x256xf32>
      %311 = math.rsqrt %310 : vector<1x256xf32>
      %312 = vector.broadcast %311 : vector<1x256xf32> to vector<32x256xf32>
      %313 = arith.mulf %308, %312 : vector<32x256xf32>
      %314 = vector.broadcast %264 : vector<1x256xf32> to vector<32x256xf32>
      %315 = arith.mulf %313, %314 : vector<32x256xf32>
      %316 = vector.broadcast %265 : vector<1x256xf32> to vector<32x256xf32>
      %317 = arith.addf %315, %316 : vector<32x256xf32>
      %cst_139 = arith.constant 0.000000e+00 : f32
      %318 = vector.broadcast %cst_139 : f32 to vector<32x256xf32>
      %319 = arith.maximumf %317, %318 : vector<32x256xf32>
      %320 = tpu.concatenate %292, %319 in 0 : vector<32x256xf32>, vector<32x256xf32> -> vector<64x256xf32>
      %c0_140 = arith.constant 0 : index
      %c0_141 = arith.constant 0 : index
      %321 = vector.load %arg20[%c0_140, %c0_141] : memref<64x256xf32, #tpu.memory_space<vmem>>, vector<64x256xf32>
      tpu.vector_store %arg20[%c0_140, %c0_141], %320 {strides = array<i32>} : memref<64x256xf32, #tpu.memory_space<vmem>>, vector<64x256xf32>,
      %c0_142 = arith.constant 0 : index
      %c0_143 = arith.constant 0 : index
      %322 = vector.load %arg20[%c0_142, %c0_143] : memref<64x256xf32, #tpu.memory_space<vmem>>, vector<64x256xf32>
      %c0_144 = arith.constant 0 : index
      %c0_145 = arith.constant 0 : index
      %323 = vector.load %arg9[%c0_144, %c0_145] : memref<256x128xbf16, #tpu.memory_space<vmem>>, vector<256x128xbf16>
      %324 = arith.truncf %322 : vector<64x256xf32> to vector<64x256xbf16>
      %cst_146 = arith.constant dense<0.000000e+00> : vector<64x128xf32>
      %325 = tpu.matmul %324, %323, %cst_146 {dimension_numbers = #tpu.dot_dimension_numbers<[1], [0], [0], [1], [0, 0, 1, 1], [], []>} : vector<64x256xbf16>, vector<256x128xbf16>, vector<64x128xf32> -> vector<64x128xf32>
      %326 = vector.extract_strided_slice %325 {offsets = [0, 0], sizes = [32, 128], strides = [1, 1]} : vector<64x128xf32> to vector<32x128xf32>
      %cst_147 = arith.constant dense<0.000000e+00> : vector<128xf32>
      %327 = vector.multi_reduction <add>, %326, %cst_147 [0] : vector<32x128xf32> to vector<128xf32>
      %328 = vector.shape_cast %327 : vector<128xf32> to vector<1x128xf32>
      %cst_148 = arith.constant 3.200000e+01 : f32
      %329 = vector.broadcast %cst_148 : f32 to vector<1x128xf32>
      %330 = arith.divf %328, %329 : vector<1x128xf32>
      %331 = arith.mulf %326, %326 : vector<32x128xf32>
      %cst_149 = arith.constant dense<0.000000e+00> : vector<128xf32>
      %332 = vector.multi_reduction <add>, %331, %cst_149 [0] : vector<32x128xf32> to vector<128xf32>
      %333 = vector.shape_cast %332 : vector<128xf32> to vector<1x128xf32>
      %cst_150 = arith.constant 3.200000e+01 : f32
      %334 = vector.broadcast %cst_150 : f32 to vector<1x128xf32>
      %335 = arith.divf %333, %334 : vector<1x128xf32>
      %336 = arith.mulf %330, %330 : vector<1x128xf32>
      %337 = arith.subf %335, %336 : vector<1x128xf32>
      %cst_151 = arith.constant 0.000000e+00 : f32
      %338 = vector.broadcast %cst_151 : f32 to vector<1x128xf32>
      %339 = arith.maximumf %337, %338 : vector<1x128xf32>
      %340 = vector.broadcast %330 : vector<1x128xf32> to vector<32x128xf32>
      %341 = arith.subf %326, %340 : vector<32x128xf32>
      %cst_152 = arith.constant 9.99999974E-6 : f32
      %342 = vector.broadcast %cst_152 : f32 to vector<1x128xf32>
      %343 = arith.addf %339, %342 : vector<1x128xf32>
      %344 = math.rsqrt %343 : vector<1x128xf32>
      %345 = vector.broadcast %344 : vector<1x128xf32> to vector<32x128xf32>
      %346 = arith.mulf %341, %345 : vector<32x128xf32>
      %347 = vector.extract_strided_slice %325 {offsets = [32, 0], sizes = [32, 128], strides = [1, 1]} : vector<64x128xf32> to vector<32x128xf32>
      %cst_153 = arith.constant dense<0.000000e+00> : vector<128xf32>
      %348 = vector.multi_reduction <add>, %347, %cst_153 [0] : vector<32x128xf32> to vector<128xf32>
      %349 = vector.shape_cast %348 : vector<128xf32> to vector<1x128xf32>
      %cst_154 = arith.constant 3.200000e+01 : f32
      %350 = vector.broadcast %cst_154 : f32 to vector<1x128xf32>
      %351 = arith.divf %349, %350 : vector<1x128xf32>
      %352 = arith.mulf %347, %347 : vector<32x128xf32>
      %cst_155 = arith.constant dense<0.000000e+00> : vector<128xf32>
      %353 = vector.multi_reduction <add>, %352, %cst_155 [0] : vector<32x128xf32> to vector<128xf32>
      %354 = vector.shape_cast %353 : vector<128xf32> to vector<1x128xf32>
      %cst_156 = arith.constant 3.200000e+01 : f32
      %355 = vector.broadcast %cst_156 : f32 to vector<1x128xf32>
      %356 = arith.divf %354, %355 : vector<1x128xf32>
      %357 = arith.mulf %351, %351 : vector<1x128xf32>
      %358 = arith.subf %356, %357 : vector<1x128xf32>
      %cst_157 = arith.constant 0.000000e+00 : f32
      %359 = vector.broadcast %cst_157 : f32 to vector<1x128xf32>
      %360 = arith.maximumf %358, %359 : vector<1x128xf32>
      %361 = vector.broadcast %351 : vector<1x128xf32> to vector<32x128xf32>
      %362 = arith.subf %347, %361 : vector<32x128xf32>
      %cst_158 = arith.constant 9.99999974E-6 : f32
      %363 = vector.broadcast %cst_158 : f32 to vector<1x128xf32>
      %364 = arith.addf %360, %363 : vector<1x128xf32>
      %365 = math.rsqrt %364 : vector<1x128xf32>
      %366 = vector.broadcast %365 : vector<1x128xf32> to vector<32x128xf32>
      %367 = arith.mulf %362, %366 : vector<32x128xf32>
      %368 = tpu.concatenate %346, %367 in 0 : vector<32x128xf32>, vector<32x128xf32> -> vector<64x128xf32>
      %c0_159 = arith.constant 0 : index
      %c0_160 = arith.constant 0 : index
      %369 = vector.load %arg14[%c0_159, %c0_160] : memref<64x128xf32, #tpu.memory_space<vmem>>, vector<64x128xf32>
      tpu.vector_store %arg14[%c0_159, %c0_160], %368 {strides = array<i32>} : memref<64x128xf32, #tpu.memory_space<vmem>>, vector<64x128xf32>,
    } else {
    }
    return
  }
  func.func @transform_0(%arg0: i32) -> (i32, i32) {
    %c0_i32 = arith.constant 0 : i32
    %c0_i32_0 = arith.constant 0 : i32
    return %c0_i32, %arg0 : i32, i32
  }
  func.func @transform_1(%arg0: i32) -> (i32, i32) {
    %c0_i32 = arith.constant 0 : i32
    %c0_i32_0 = arith.constant 0 : i32
    return %arg0, %c0_i32 : i32, i32
  }
  func.func @transform_2(%arg0: i32) -> (i32, i32) {
    %c0_i32 = arith.constant 0 : i32
    %c0_i32_0 = arith.constant 0 : i32
    %c0_i32_1 = arith.constant 0 : i32
    return %c0_i32, %c0_i32_0 : i32, i32
  }
  func.func @transform_3(%arg0: i32) -> (i32, i32) {
    %c0_i32 = arith.constant 0 : i32
    %c0_i32_0 = arith.constant 0 : i32
    %c0_i32_1 = arith.constant 0 : i32
    return %c0_i32, %c0_i32_0 : i32, i32
  }
  func.func @transform_4(%arg0: i32) -> (i32, i32) {
    %c0_i32 = arith.constant 0 : i32
    %c0_i32_0 = arith.constant 0 : i32
    %c0_i32_1 = arith.constant 0 : i32
    return %c0_i32, %c0_i32_0 : i32, i32
  }
  func.func @transform_5(%arg0: i32) -> (i32, i32) {
    %c0_i32 = arith.constant 0 : i32
    %c0_i32_0 = arith.constant 0 : i32
    %c0_i32_1 = arith.constant 0 : i32
    return %c0_i32, %c0_i32_0 : i32, i32
  }
  func.func @transform_6(%arg0: i32) -> (i32, i32) {
    %c0_i32 = arith.constant 0 : i32
    %c0_i32_0 = arith.constant 0 : i32
    %c0_i32_1 = arith.constant 0 : i32
    return %c0_i32, %c0_i32_0 : i32, i32
  }
  func.func @transform_7(%arg0: i32) -> (i32, i32) {
    %c0_i32 = arith.constant 0 : i32
    %c0_i32_0 = arith.constant 0 : i32
    %c0_i32_1 = arith.constant 0 : i32
    return %c0_i32, %c0_i32_0 : i32, i32
  }
  func.func @transform_8(%arg0: i32) -> (i32, i32) {
    %c0_i32 = arith.constant 0 : i32
    %c0_i32_0 = arith.constant 0 : i32
    %c0_i32_1 = arith.constant 0 : i32
    return %c0_i32, %c0_i32_0 : i32, i32
  }
  func.func @transform_9(%arg0: i32) -> (i32, i32) {
    %c0_i32 = arith.constant 0 : i32
    %c0_i32_0 = arith.constant 0 : i32
    return %arg0, %c0_i32 : i32, i32
  }
  func.func @transform_10(%arg0: i32) -> (i32, i32) {
    %c0_i32 = arith.constant 0 : i32
    %c0_i32_0 = arith.constant 0 : i32
    %c0_i32_1 = arith.constant 0 : i32
    return %c0_i32, %c0_i32_0 : i32, i32
  }
  func.func @transform_11(%arg0: i32) -> (i32, i32) {
    %c0_i32 = arith.constant 0 : i32
    %c0_i32_0 = arith.constant 0 : i32
    %c0_i32_1 = arith.constant 0 : i32
    return %c0_i32, %c0_i32_0 : i32, i32
  }
  func.func @transform_12(%arg0: i32) -> (i32, i32) {
    %c0_i32 = arith.constant 0 : i32
    %c0_i32_0 = arith.constant 0 : i32
    %c0_i32_1 = arith.constant 0 : i32
    return %c0_i32, %c0_i32_0 : i32, i32
  }
  func.func @transform_13(%arg0: i32) -> (i32, i32) {
    %c0_i32 = arith.constant 0 : i32
    %c0_i32_0 = arith.constant 0 : i32
    %c0_i32_1 = arith.constant 0 : i32
    return %c0_i32, %c0_i32_0 : i32, i32
  }
  func.func @transform_14(%arg0: i32) -> (i32, i32) {
    %c0_i32 = arith.constant 0 : i32
    %c0_i32_0 = arith.constant 0 : i32
    %c0_i32_1 = arith.constant 0 : i32
    return %c0_i32, %c0_i32_0 : i32, i32
  }
  func.func @transform_15(%arg0: i32) -> (i32, i32) {
    %c0_i32 = arith.constant 0 : i32
    %c0_i32_0 = arith.constant 0 : i32
    return %arg0, %c0_i32 : i32, i32
  }
  func.func @transform_16(%arg0: i32) -> (i32, i32) {
    %c0_i32 = arith.constant 0 : i32
    %c0_i32_0 = arith.constant 0 : i32
    %c0_i32_1 = arith.constant 0 : i32
    return %c0_i32, %c0_i32_0 : i32, i32
  }
  func.func @transform_17(%arg0: i32) -> (i32, i32) {
    %c0_i32 = arith.constant 0 : i32
    %c0_i32_0 = arith.constant 0 : i32
    %c0_i32_1 = arith.constant 0 : i32
    return %c0_i32, %c0_i32_0 : i32, i32
  }
  func.func @transform_18(%arg0: i32) -> (i32, i32) {
    %c0_i32 = arith.constant 0 : i32
    %c0_i32_0 = arith.constant 0 : i32
    %c0_i32_1 = arith.constant 0 : i32
    return %c0_i32, %c0_i32_0 : i32, i32
  }
}

</mosaic_0001>

<bundles_post_ra>
// kernel: fwd.3
= control target key start
LH: loop header
LB: loop body
LE: loop exit
PB: predicated region body
PF: predicated region fallthrough
CT: control target
= control target key end

     0   :  { %vm172_vm0 = vcmask 261120   ;;  %vm225_vm1 = vcmask 7168   ;;  %s819_s1 = inlined_call_operand.vmem [shape: f32[64,128], index: 1, kind: input, shape index: {}]   ;;  %s820_s0 = inlined_call_operand.vmem [shape: f32[64,128], index: 0, kind: input, shape index: {}]   ;;  %s821_s2 = inlined_call_operand.vmem [shape: f32[8,128], index: 2, kind: output, shape index: {}]  }
   0x1   :  { %v596_v0 = vld [vmem:[%s819_s1 + $0x18] sm:$0xff]  ;;  %v601_v1 = vld [vmem:[%s819_s1 + $0x10] sm:$0xff]  ;;  %v624_v8 = vld [vmem:[%s819_s1 + $0x28] sm:$0xff] }
   0x2   :  { %v606_v2 = vld [vmem:[%s819_s1 + $0x38] sm:$0xff]  ;;  %v54_v3 = vmul.f32 %v596_v0, %v596_v0  ;;  %v53_v4 = vmul.f32 %v601_v1, %v601_v1  ;;  %v615_v5 = vld [vmem:[%s819_s1 + $0x30] sm:$0xff]  ;;  %v629_v9 = vld [vmem:[%s819_s1 + $0x8] sm:$0xff]  ;;  %v269_v10 = vmul.f32 %v624_v8, %v624_v8 }
   0x3   :  { %v271_v6 = vmul.f32 %v606_v2, %v606_v2  ;;  %v270_v7 = vmul.f32 %v615_v5, %v615_v5  ;;  %v52_v11 = vmul.f32 %v629_v9, %v629_v9  ;;  %v638_v12 = vld [vmem:[%s819_s1 + $0x20] sm:$0xff]  ;;  %v666_v20 = vld [vmem:[%s820_s0 + $0x28] sm:$0xff]  ;;  %v680_v24 = vld [vmem:[%s820_s0 + $0x30] sm:$0xff] }
   0x4   :  { %61 = vadd.xlane.f32.xlu0 %v54_v3  ;;  %59 = vadd.xlane.f32.xlu1 %v53_v4  ;;  %v643_v13 = vld [vmem:[%s819_s1] sm:$0xff]  ;;  %v268_v14 = vmul.f32 %v638_v12, %v638_v12  ;;  %v671_v21 = vld [vmem:[%s820_s0 + $0x8] sm:$0xff]  ;;  %v28_v22 = vmul.f32 %v666_v20, %v666_v20  ;;  %v685_v25 = vld [vmem:[%s820_s0 + $0x10] sm:$0xff]  ;;  %v29_v26 = vmul.f32 %v680_v24, %v680_v24 }
   0x5   :  { %v51_v15 = vmul.f32 %v643_v13, %v643_v13  ;;  %v652_v16 = vld [vmem:[%s820_s0 + $0x20] sm:$0xff]  ;;  %v245_v23 = vmul.f32 %v671_v21, %v671_v21  ;;  %v246_v27 = vmul.f32 %v685_v25, %v685_v25  ;;  %v694_v28 = vld [vmem:[%s820_s0 + $0x38] sm:$0xff] }
   0x6   :  { %v657_v17 = vld [vmem:[%s820_s0] sm:$0xff]  ;;  %v27_v18 = vmul.f32 %v652_v16, %v652_v16  ;;  %v699_v29 = vld [vmem:[%s820_s0 + $0x18] sm:$0xff]  ;;  %v30_v30 = vmul.f32 %v694_v28, %v694_v28 }
   0x7   :  { %v244_v19 = vmul.f32 %v657_v17, %v657_v17  ;;  %v247_v31 = vmul.f32 %v699_v29, %v699_v29 }
   0x8   :  { %278 = vadd.xlane.f32.xlu0 %v271_v6  ;;  %276 = vadd.xlane.f32.xlu1 %v270_v7 }
   0xc   :  { %274 = vadd.xlane.f32.xlu1 %v269_v10  ;;  %57 = vadd.xlane.f32.xlu0 %v52_v11 }
  0x10   :  { %272 = vadd.xlane.f32.xlu1 %v268_v14  ;;  %55 = vadd.xlane.f32.xlu0 %v51_v15 }
  0x14   :  { %31 = vadd.xlane.f32.xlu0 %v27_v18  ;;  %248 = vadd.xlane.f32.xlu1 %v244_v19 }
  0x18   :  { %33 = vadd.xlane.f32.xlu0 %v28_v22  ;;  %250 = vadd.xlane.f32.xlu1 %v245_v23 }
  0x1c   :  { %35 = vadd.xlane.f32.xlu0 %v29_v26  ;;  %252 = vadd.xlane.f32.xlu1 %v246_v27 }
  0x20   :  { %37 = vadd.xlane.f32.xlu0 %v30_v30  ;;  %254 = vadd.xlane.f32.xlu1 %v247_v31 }
  0x8d   :  { %v62_v32 = vpop.xlane.xlu0 %61  ;;  %v60_v33 = vpop.xlane.xlu1 %59 }
  0x8e   :  { %v66_v34 = vmax.f32 %v62_v32, 1e-24  ;;  %v65_v35 = vmax.f32 %v60_v33, 1e-24 }
  0x90   :  { %514 = vrsqrt.f32 %v66_v34 }
  0x91   :  { %516 = vrsqrt.f32 %v65_v35  ;;  %v279_v36 = vpop.xlane.xlu0 %278  ;;  %v277_v37 = vpop.xlane.xlu1 %276 }
  0x92   :  { %v283_v38 = vmax.f32 %v279_v36, 1e-24  ;;  %v282_v39 = vmax.f32 %v277_v37, 1e-24 }
  0x94   :  { %518 = vrsqrt.f32 %v283_v38 }
  0x95   :  { %520 = vrsqrt.f32 %v282_v39  ;;  %v275_v40 = vpop.xlane.xlu1 %274  ;;  %v58_v41 = vpop.xlane.xlu0 %57 }
  0x96   :  { %v281_v42 = vmax.f32 %v275_v40, 1e-24  ;;  %v64_v43 = vmax.f32 %v58_v41, 1e-24 }
  0x98   :  { %522 = vrsqrt.f32 %v281_v42 }
  0x99   :  { %524 = vrsqrt.f32 %v64_v43  ;;  %v273_v44 = vpop.xlane.xlu1 %272  ;;  %v56_v45 = vpop.xlane.xlu0 %55 }
  0x9a   :  { %v280_v46 = vmax.f32 %v273_v44, 1e-24  ;;  %v63_v47 = vmax.f32 %v56_v45, 1e-24 }
  0x9c   :  { %526 = vrsqrt.f32 %v280_v46 }
  0x9d   :  { %v515_v48 = vpop.eup %514  ;;  %528 = vrsqrt.f32 %v63_v47  ;;  %v32_v49 = vpop.xlane.xlu0 %31 }
  0x9e   :  { %v249_v50 = vpop.xlane.xlu1 %248  ;;  %v517_v51 = vpop.eup %516  ;;  %v39_v52 = vmax.f32 %v32_v49, 1e-24  ;;  %v706_v54 = vmul.f32 %v515_v48, %v596_v0 }
  0x9f   :  { %v256_v53 = vmax.f32 %v249_v50, 1e-24  ;;  %v710_v55 = vmul.f32 %v517_v51, %v601_v1 }
  0xa0   :  { %530 = vrsqrt.f32 %v39_v52  ;;  %482 = vmatprep.subr.mxu0 %v706_v54 }
  0xa1   :  { %v519_v56 = vpop.eup %518  ;;  %532 = vrsqrt.f32 %v256_v53  ;;  %483 = vmatpush3.xpose.msra.mxu0 %v706_v54  ;;  %v34_v57 = vpop.xlane.xlu0 %33 }
  0xa2   :  { %v251_v58 = vpop.xlane.xlu1 %250  ;;  %v521_v59 = vpop.eup %520  ;;  %v40_v60 = vmax.f32 %v34_v57, 1e-24  ;;  %484 = vmatprep.subr.mxu0 %v710_v55  ;;  %v715_v62 = vmul.f32 %v519_v56, %v606_v2 }
  0xa3   :  { %v257_v61 = vmax.f32 %v251_v58, 1e-24  ;;  %v290_v63 = vmul.f32 %v521_v59, %v615_v5 }
  0xa4   :  { %534 = vrsqrt.f32 %v40_v60  ;;  %496 = vmatprep.subr.mxu1 %v715_v62 }
  0xa5   :  { %v523_v0 = vpop.eup %522  ;;  %536 = vrsqrt.f32 %v257_v61  ;;  %485 = vmatpush3.xpose.msra.mxu0 %v710_v55  ;;  %497 = vmatpush3.xpose.msra.mxu1 %v715_v62  ;;  %v36_v1 = vpop.xlane.xlu0 %35 }
  0xa6   :  { %v253_v3 = vpop.xlane.xlu1 %252  ;;  %v525_v4 = vpop.eup %524  ;;  %v41_v6 = vmax.f32 %v36_v1, 1e-24  ;;  %498 = vmatprep.subr.mxu1 %v290_v63  ;;  %v289_v10 = vmul.f32 %v523_v0, %v624_v8 }
  0xa7   :  { %v258_v7 = vmax.f32 %v253_v3, 1e-24  ;;  %v72_v2 = vmul.f32 %v525_v4, %v629_v9 }
  0xa8   :  { %538 = vrsqrt.f32 %v41_v6 }
  0xa9   :  { %v527_v11 = vpop.eup %526  ;;  %540 = vrsqrt.f32 %v258_v7  ;;  %486 = vmatprep.subr.mxu0 %v72_v2  ;;  %499 = vmatpush3.xpose.msra.mxu1 %v290_v63  ;;  %v38_v5 = vpop.xlane.xlu0 %37 }
  0xaa   :  { %v255_v14 = vpop.xlane.xlu1 %254  ;;  %v529_v15 = vpop.eup %528  ;;  %487 = vmatpush3.xpose.msra.mxu0 %v72_v2  ;;  %v42_v18 = vmax.f32 %v38_v5, 1e-24  ;;  %500 = vmatprep.subr.mxu1 %v289_v10  ;;  %v288_v23 = vmul.f32 %v527_v11, %v638_v12 }
  0xab   :  { %v259_v19 = vmax.f32 %v255_v14, 1e-24  ;;  %v71_v22 = vmul.f32 %v529_v15, %v643_v13 }
  0xac   :  { %542 = vrsqrt.f32 %v42_v18 }
  0xad   :  { %v531_v9 = vpop.eup %530  ;;  %544 = vrsqrt.f32 %v259_v19  ;;  %488 = vmatprep.subr.mxu0 %v71_v22  ;;  %501 = vmatpush3.xpose.msra.mxu1 %v289_v10 }
  0xae   :  { %v533_v8 = vpop.eup %532  ;;  %489 = vmatpush3.xpose.msra.mxu0 %v71_v22  ;;  %502 = vmatprep.subr.mxu1 %v288_v23  ;;  %v47_v26 = vmul.f32 %v531_v9, %v652_v16 }
  0xaf   :  { %v264_v27 = vmul.f32 %v533_v8, %v657_v17 }
  0xb0   :  { %490 = vmatprep.mubr.f32.mxu0 %v47_v26  ;;  %v727_v30 = vmul.f32 %v71_v22, %v47_v26 }
  0xb1   :  { %v535_v31 = vpop.eup %534  ;;  %504 = vmatprep.mubr.f32.mxu1 %v264_v27  ;;  %503 = vmatpush3.xpose.msra.mxu1 %v288_v23  ;;  %v729_v13 = vmul.f32 %v288_v23, %v264_v27 }
  0xb2   :  { %v537_v12 = vpop.eup %536  ;;  %v48_v32 = vmul.f32 %v535_v31, %v666_v20 }
  0xb3   :  { %v265_v33 = vmul.f32 %v537_v12, %v671_v21 }
  0xb4   :  { %491 = vmatmul.mubr.f32.vlgmr.msra.gmra.mxu0 %v48_v32  ;;  %v733_v34 = vmul.f32 %v72_v2, %v48_v32 }
  0xb5   :  { %v539_v35 = vpop.eup %538  ;;  %505 = vmatmul.mubr.f32.vlgmr.msra.gmra.mxu1 %v265_v33  ;;  %v735_v16 = vmul.f32 %v289_v10, %v265_v33 }
  0xb6   :  { %v541_v17 = vpop.eup %540  ;;  %v49_v36 = vmul.f32 %v539_v35, %v680_v24 }
  0xb7   :  { %v266_v37 = vmul.f32 %v541_v17, %v685_v25 }
  0xb8   :  { %493 = vmatprep.mubr.f32.mxu0 %v49_v36  ;;  %v740_v38 = vmul.f32 %v710_v55, %v49_v36 }
  0xb9   :  { %v543_v39 = vpop.eup %542  ;;  %507 = vmatprep.mubr.f32.mxu1 %v266_v37  ;;  %v742_v20 = vmul.f32 %v290_v63, %v266_v37 }
  0xba   :  { %v545_v21 = vpop.eup %544  ;;  %v50_v40 = vmul.f32 %v543_v39, %v694_v28 }
  0xbb   :  { %v267_v41 = vmul.f32 %v545_v21, %v699_v29 }
  0xbc   :  { %494 = vmatmul.mubr.f32.gmra.mxu0 %v50_v40  ;;  %v747_v42 = vmul.f32 %v706_v54, %v50_v40 }
  0xbd   :  { %508 = vmatmul.mubr.f32.gmra.mxu1 %v267_v41  ;;  %v750_v24 = vmul.f32 %v715_v62, %v267_v41 }
 0x174   :  { %v492_v25 = vpop.f32.mrf.mxu0 }
 0x175   :  { %v506_v43 = vpop.f32.mrf.mxu1  ;;  %v176_v44 = vsel %vm172_vm0, %v492_v25, -inf }
 0x176   :  { %v141_v45 = vpop.f32.mrf.mxu0  ;;  %177 = vmax.xlane.f32.xlu1 %v176_v44  ;;  %v392_v29 = vsel %vm172_vm0, %v506_v43, -inf }
 0x177   :  { %v173_v46 = vsel %vm172_vm0, %v141_v45, -inf  ;;  %v358_v28 = vpop.f32.mrf.mxu1 }
 0x178   :  { %174 = vmax.xlane.f32.xlu0 %v173_v46  ;;  %v389_v47 = vsel %vm172_vm0, %v358_v28, -inf }
 0x17a   :  { %393 = vmax.xlane.f32.xlu1 %v392_v29 }
 0x17c   :  { %v495_v48 = vpop.f32.mrf.mxu0  ;;  %390 = vmax.xlane.f32.xlu0 %v389_v47 }
 0x17d   :  { %v509_v49 = vpop.f32.mrf.mxu1  ;;  %v182_v54 = vsel %vm172_vm0, %v495_v48, -inf }
 0x17e   :  { %v151_v50 = vpop.f32.mrf.mxu0  ;;  %v398_v55 = vsel %vm172_vm0, %v509_v49, -inf }
 0x17f   :  { %v368_v51 = vpop.f32.mrf.mxu1  ;;  %v179_v52 = vsel %vm172_vm0, %v151_v50, -inf }
 0x180   :  { %180 = vmax.xlane.f32.xlu0 %v179_v52  ;;  %v395_v53 = vsel %vm172_vm0, %v368_v51, -inf }
 0x181   :  { %396 = vmax.xlane.f32.xlu1 %v395_v53 }
 0x184   :  { %183 = vmax.xlane.f32.xlu0 %v182_v54 }
 0x185   :  { %399 = vmax.xlane.f32.xlu1 %v398_v55 }
 0x1ff   :  { %v760_v56 = vpop.xlane.xlu1 %177 }
 0x200   :  { %v186_v57 = vsub.f32 %v492_v25, %v760_v56 }
 0x201   :  { %v763_v58 = vpop.xlane.xlu0 %174 }
 0x202   :  { %v191_v59 = vmul.f32 1.442695, %v186_v57  ;;  %v185_v60 = vsub.f32 %v141_v45, %v763_v58 }
 0x203   :  { %v766_v61 = vpop.xlane.xlu1 %393 }
 0x204   :  { %546 = vpow2.f32 %v191_v59  ;;  %v189_v62 = vmul.f32 1.442695, %v185_v60  ;;  %v402_v63 = vsub.f32 %v506_v43, %v766_v61 }
 0x205   :  { %v769_v0 = vpop.xlane.xlu0 %390 }
 0x206   :  { %548 = vpow2.f32 %v189_v62  ;;  %v407_v1 = vmul.f32 1.442695, %v402_v63  ;;  %v401_v3 = vsub.f32 %v358_v28, %v769_v0 }
 0x208   :  { %550 = vpow2.f32 %v407_v1  ;;  %v405_v4 = vmul.f32 1.442695, %v401_v3 }
 0x209   :  { %v772_v6 = vpop.xlane.xlu0 %180 }
 0x20a   :  { %552 = vpow2.f32 %v405_v4  ;;  %v187_v7 = vsub.f32 %v151_v50, %v772_v6  ;;  %v775_v2 = vpop.xlane.xlu1 %396 }
 0x20b   :  { %v403_v10 = vsub.f32 %v368_v51, %v775_v2 }
 0x20c   :  { %v193_v11 = vmul.f32 1.442695, %v187_v7 }
 0x20d   :  { %v409_v5 = vmul.f32 1.442695, %v403_v10  ;;  %v778_v14 = vpop.xlane.xlu0 %183 }
 0x20e   :  { %554 = vpow2.f32 %v193_v11  ;;  %v188_v15 = vsub.f32 %v495_v48, %v778_v14  ;;  %v781_v18 = vpop.xlane.xlu1 %399 }
 0x20f   :  { %556 = vpow2.f32 %v409_v5  ;;  %v404_v19 = vsub.f32 %v509_v49, %v781_v18 }
 0x210   :  { %v195_v22 = vmul.f32 1.442695, %v188_v15 }
 0x211   :  { %v547_v23 = vpop.eup %546  ;;  %v411_v9 = vmul.f32 1.442695, %v404_v19 }
 0x212   :  { %558 = vpow2.f32 %v195_v22  ;;  %v200_v8 = vsel %vm172_vm0, %v547_v23, 0.0 }
 0x213   :  { %v549_v26 = vpop.eup %548  ;;  %560 = vpow2.f32 %v411_v9  ;;  %201 = vadd.xlane.f32.xlu1 %v200_v8 }
 0x214   :  { %v197_v27 = vsel %vm172_vm0, %v549_v26, 0.0 }
 0x215   :  { %v551_v31 = vpop.eup %550  ;;  %198 = vadd.xlane.f32.xlu0 %v197_v27 }
 0x216   :  { %v416_v12 = vsel %vm172_vm0, %v551_v31, 0.0 }
 0x217   :  { %v553_v32 = vpop.eup %552  ;;  %417 = vadd.xlane.f32.xlu1 %v416_v12 }
 0x218   :  { %v413_v33 = vsel %vm172_vm0, %v553_v32, 0.0 }
 0x219   :  { %414 = vadd.xlane.f32.xlu0 %v413_v33 }
 0x21b   :  { %v555_v35 = vpop.eup %554 }
 0x21c   :  { %v557_v17 = vpop.eup %556  ;;  %v203_v36 = vsel %vm172_vm0, %v555_v35, 0.0 }
 0x21d   :  { %204 = vadd.xlane.f32.xlu0 %v203_v36  ;;  %v419_v37 = vsel %vm172_vm0, %v557_v17, 0.0 }
 0x21e   :  { %420 = vadd.xlane.f32.xlu1 %v419_v37 }
 0x21f   :  { %v559_v39 = vpop.eup %558 }
 0x220   :  { %v561_v21 = vpop.eup %560  ;;  %v206_v40 = vsel %vm172_vm0, %v559_v39, 0.0 }
 0x221   :  { %207 = vadd.xlane.f32.xlu0 %v206_v40  ;;  %v422_v41 = vsel %vm172_vm0, %v561_v21, 0.0 }
 0x222   :  { %423 = vadd.xlane.f32.xlu1 %v422_v41 }
 0x225   :  { %164 = vadd.xlane.f32.xlu0 %v727_v30 }
 0x226   :  { %166 = vadd.xlane.f32.xlu1 %v733_v34 }
 0x229   :  { %381 = vadd.xlane.f32.xlu0 %v729_v13 }
 0x22a   :  { %383 = vadd.xlane.f32.xlu1 %v735_v16 }
 0x22d   :  { %168 = vadd.xlane.f32.xlu0 %v740_v38 }
 0x22e   :  { %385 = vadd.xlane.f32.xlu1 %v742_v20 }
 0x231   :  { %170 = vadd.xlane.f32.xlu0 %v747_v42 }
 0x232   :  { %387 = vadd.xlane.f32.xlu1 %v750_v24 }
 0x29c   :  { %v202_v25 = vpop.xlane.xlu1 %201 }
 0x29d   :  { %562 = vlog2.f32 %v202_v25 }
 0x29e   :  { %v199_v43 = vpop.xlane.xlu0 %198 }
 0x29f   :  { %564 = vlog2.f32 %v199_v43 }
 0x2a0   :  { %v418_v44 = vpop.xlane.xlu1 %417 }
 0x2a1   :  { %566 = vlog2.f32 %v418_v44 }
 0x2a2   :  { %v415_v30 = vpop.xlane.xlu0 %414 }
 0x2a3   :  { %568 = vlog2.f32 %v415_v30 }
 0x2a6   :  { %v205_v34 = vpop.xlane.xlu0 %204 }
 0x2a7   :  { %570 = vlog2.f32 %v205_v34  ;;  %v421_v13 = vpop.xlane.xlu1 %420 }
 0x2a8   :  { %572 = vlog2.f32 %v421_v13 }
 0x2aa   :  { %v208_v16 = vpop.xlane.xlu0 %207  ;;  %v563_v38 = vpop.eup %562 }
 0x2ab   :  { %574 = vlog2.f32 %v208_v16  ;;  %v424_v20 = vpop.xlane.xlu1 %423  ;;  %v212_v28 = vmul.f32 0.6931472, %v563_v38 }
 0x2ac   :  { %v565_v45 = vpop.eup %564  ;;  %576 = vlog2.f32 %v424_v20 }
 0x2ad   :  { %v210_v42 = vmul.f32 0.6931472, %v565_v45  ;;  %v218_v52 = vadd.f32 %v212_v28, %v760_v56 }
 0x2ae   :  { %v567_v24 = vpop.eup %566  ;;  %v165_v46 = vpop.xlane.xlu0 %164 }
 0x2af   :  { %v167_v29 = vpop.xlane.xlu1 %166  ;;  %v428_v48 = vmul.f32 0.6931472, %v567_v24  ;;  %v217_v50 = vadd.f32 %v210_v42, %v763_v58 }
 0x2b0   :  { %v569_v47 = vpop.eup %568  ;;  %v222_v4 = vsub.f32 %v218_v52, %v167_v29 }
 0x2b1   :  { %v426_v49 = vmul.f32 0.6931472, %v569_v47  ;;  %v434_v57 = vadd.f32 %v428_v48, %v766_v61  ;;  %v221_v62 = vsub.f32 %v217_v50, %v165_v46 }
 0x2b2   :  { %v382_v51 = vpop.xlane.xlu0 %381  ;;  %v227_v9 = vsel %vm225_vm1, %v222_v4, 0.0 }
 0x2b3   :  { %v433_v53 = vadd.f32 %v426_v49, %v769_v0  ;;  %v384_v54 = vpop.xlane.xlu1 %383  ;;  %v226_v15 = vsel %vm225_vm1, %v221_v62, 0.0 }
 0x2b4   :  { %v571_v55 = vpop.eup %570  ;;  %v438_v11 = vsub.f32 %v434_v57, %v384_v54  ;;  %v228_v26 = vadd.f32 %v227_v9, %v226_v15 }
 0x2b5   :  { %v573_v59 = vpop.eup %572  ;;  %v214_v60 = vmul.f32 0.6931472, %v571_v55  ;;  %v437_v1 = vsub.f32 %v433_v53, %v382_v51 }
 0x2b6   :  { %v430_v63 = vmul.f32 0.6931472, %v573_v59  ;;  %v169_v3 = vpop.xlane.xlu0 %168  ;;  %v442_v27 = vsel %vm225_vm1, %v438_v11, 0.0 }
 0x2b7   :  { %v219_v7 = vadd.f32 %v214_v60, %v772_v6  ;;  %v386_v10 = vpop.xlane.xlu1 %385  ;;  %v441_v22 = vsel %vm225_vm1, %v437_v1, 0.0 }
 0x2b8   :  { %v575_v58 = vpop.eup %574  ;;  %v435_v56 = vadd.f32 %v430_v63, %v775_v2  ;;  %v443_v32 = vadd.f32 %v442_v27, %v441_v22 }
 0x2b9   :  { %v577_v0 = vpop.eup %576  ;;  %v216_v5 = vmul.f32 0.6931472, %v575_v58  ;;  %v223_v61 = vsub.f32 %v219_v7, %v169_v3 }
 0x2ba   :  { %v432_v19 = vmul.f32 0.6931472, %v577_v0  ;;  %v439_v23 = vsub.f32 %v435_v56, %v386_v10  ;;  %v171_v31 = vpop.xlane.xlu0 %170 }
 0x2bb   :  { %v229_v8 = vsel %vm225_vm1, %v223_v61, 0.0  ;;  %v220_v6 = vadd.f32 %v216_v5, %v778_v14  ;;  %v388_v35 = vpop.xlane.xlu1 %387 }
 0x2bc   :  { %v444_v2 = vsel %vm225_vm1, %v439_v23, 0.0  ;;  %v436_v12 = vadd.f32 %v432_v19, %v781_v18  ;;  %v230_v36 = vadd.f32 %v229_v8, %v228_v26 }
 0x2bd   :  { %v224_v33 = vsub.f32 %v220_v6, %v171_v31  ;;  %v445_v39 = vadd.f32 %v444_v2, %v443_v32 }
 0x2be   :  { %v440_v17 = vsub.f32 %v436_v12, %v388_v35 }
 0x2bf   :  { %v231_v37 = vsel %vm225_vm1, %v224_v33, 0.0 }
 0x2c0   :  { %v232_v21 = vadd.f32 %v231_v37, %v230_v36  ;;  %v446_v40 = vsel %vm225_vm1, %v440_v17, 0.0 }
 0x2c1   :  { %v447_v14 = vadd.f32 %v446_v40, %v445_v39 }
 0x2c2   :  { %233 = vadd.xlane.f32.xlu0 %v232_v21 }
 0x2c3   :  { %448 = vadd.xlane.f32.xlu1 %v447_v14 }
 0x34b   :  { %v234_v41 = vpop.xlane.xlu0 %233 }
 0x34c   :  { %v235_v25 = vrot.slane %v234_v41, 4  ;;  %v449_v43 = vpop.xlane.xlu1 %448 }
 0x34d   :  { %v450_v44 = vrot.slane %v449_v43, 4 }
 0x34e   :  { %v236_v30 = vadd.f32 %v235_v25, %v234_v41 }
 0x34f   :  { %v451_v18 = vadd.f32 %v450_v44, %v449_v43 }
 0x350   :  { %v237_v34 = vrot.slane %v236_v30, 2 }
 0x351   :  { %v452_v13 = vrot.slane %v451_v18, 2 }
 0x352   :  { %v238_v16 = vadd.f32 %v237_v34, %v236_v30 }
 0x353   :  { %v453_v38 = vadd.f32 %v452_v13, %v451_v18 }
 0x354   :  { %v239_v20 = vrot.slane %v238_v16, 1 }
 0x355   :  { %v454_v45 = vrot.slane %v453_v38, 1 }
 0x356   :  { %v240_v42 = vadd.f32 %v239_v20, %v238_v16 }
 0x357   :  { %v455_v24 = vadd.f32 %v454_v45, %v453_v38 }
 0x358   :  { %510 = vpush %v240_v42 }
 0x359   :  { %512 = vpush %v455_v24 }
 0x389   :  { %s511_s0 = spop %510 }
 0x38a   :  { %v242_v46 = vstv %s511_s0  ;;  %s513_s12 = spop %512 }
 0x38b   :  { %v243_v28 = vmul.f32 0.0625, %v242_v46  ;;  %v457_v29 = vstv %s513_s12 }
 0x38c   :  { %v458_v47 = vmul.f32 0.0625, %v457_v29 }
 0x38e   :  { %v459_v48 = vadd.f32 %v458_v47, %v243_v28 }
 0x390   :  { %v460_v49 = vmul.f32 0.5, %v459_v48 }
 0x392   :  { %461 = vst [vmem:[%s821_s2] sm:$0xff] %v460_v49 }

// kernel: fwd.2
= control target key start
LH: loop header
LB: loop body
LE: loop exit
PB: predicated region body
PF: predicated region fallthrough
CT: control target
= control target key end

     0   :  { %s5456_s1 = inlined_call_operand.vmem [shape: f32[256,256], index: 1, kind: input, shape index: {}]   ;;  %s5457_s0 = inlined_call_operand.vmem [shape: bf16[64,256], index: 0, kind: input, shape index: {}]   ;;  %s5458_s9 = inlined_call_operand.vmem [shape: f32[256,256], index: 9, kind: input, shape index: {}, may-alias: {9,15}]   ;;  %s5459_s15 = inlined_call_operand.vmem [shape: f32[256,256], index: 15, kind: output, shape index: {2}, may-alias: {9,15}]   ;;  %s5460_s4 = inlined_call_operand.vmem [shape: f32[256,128], index: 4, kind: input, shape index: {}]   ;;  %s5461_s2 = inlined_call_operand.vmem [shape: f32[1,256], index: 2, kind: input, shape index: {}]   ;;  %s5462_s10 = inlined_call_operand.vmem [shape: f32[1,256], index: 10, kind: input, shape index: {}, may-alias: {10,16}]   ;;  %s5463_s16 = inlined_call_operand.vmem [shape: f32[1,256], index: 16, kind: output, shape index: {3}, may-alias: {10,16}]   ;;  %s5464_s3 = inlined_call_operand.vmem [shape: f32[1,256], index: 3, kind: input, shape index: {}]   ;;  %s5465_s12 = inlined_call_operand.vmem [shape: f32[256,128], index: 12, kind: input, shape index: {}, may-alias: {12,18}]   ;;  %s5466_s18 = inlined_call_operand.vmem [shape: f32[256,128], index: 18, kind: output, shape index: {5}, may-alias: {12,18}]   ;;  %s5467_s11 = inlined_call_operand.vmem [shape: f32[1,256], index: 11, kind: input, shape index: {}, may-alias: {11,17}]   ;;  %s5468_s17 = inlined_call_operand.vmem [shape: f32[1,256], index: 17, kind: output, shape index: {4}, may-alias: {11,17}]   ;;  %s5469_s5 = inlined_call_operand.vmem [shape: bf16[128,256], index: 5, kind: input, shape index: {}]   ;;  %s5470_s14 = inlined_call_operand.vmem [shape: f32[64,128], index: 14, kind: output, shape index: {1}]   ;;  %s5471_s8 = inlined_call_operand.vmem [shape: bf16[256,128], index: 8, kind: input, shape index: {}]   ;;  %s5472_s6 = inlined_call_operand.vmem [shape: f32[1,256], index: 6, kind: input, shape index: {}]   ;;  %s5473_s7 = inlined_call_operand.vmem [shape: f32[1,256], index: 7, kind: input, shape index: {}]   ;;  %s5474_s13 = inlined_call_operand.vmem [shape: f32[64,128], index: 13, kind: output, shape index: {0}]  }
   0x1   :  { %5480 = sst [smem:[#allocation34_spill]] %s5456_s1 }
   0x2   :  { %5481 = sst [smem:[#allocation35_spill]] %s5457_s0 }
   0x3   :  { %5482 = sst [smem:[#allocation36_spill]] %s5458_s9 }
   0x4   :  { %s5483_s29 = sld [smem:[#allocation34_spill]] }
   0x5   :  { %s5506_s30 = sld [smem:[#allocation35_spill]] }
   0x6   :  { %s5515_s26 = sld [smem:[#allocation36_spill]] }
   0xa   :  { %v124_v0 = vld [vmem:[%s5483_s29 + $0xe8] sm:$0xff]  ;;  %v126_v1 = vld [vmem:[%s5483_s29 + $0xf8] sm:$0xff]  ;;  %v123_v2 = vld [vmem:[%s5483_s29 + $0xe0] sm:$0xff] }
   0xb   :  { %v510_v3 = vpack.c.bf16 %v126_v1, %v124_v0  ;;  %v125_v4 = vld [vmem:[%s5483_s29 + $0xf0] sm:$0xff]  ;;  %v120_v5 = vld [vmem:[%s5483_s29 + $0xc8] sm:$0xff]  ;;  %v122_v7 = vld [vmem:[%s5483_s29 + $0xd8] sm:$0xff]  ;;  %v3066_v19 = vmul.f32 0.01, %v124_v0 }
   0xc   :  { %v509_v6 = vpack.c.bf16 %v125_v4, %v123_v2  ;;  %v119_v8 = vld [vmem:[%s5483_s29 + $0xc0] sm:$0xff]  ;;  %v508_v9 = vpack.c.bf16 %v122_v7, %v120_v5  ;;  %v121_v10 = vld [vmem:[%s5483_s29 + $0xd0] sm:$0xff]  ;;  %v116_v11 = vld [vmem:[%s5483_s29 + $0xa8] sm:$0xff]  ;;  %v3068_v20 = vmul.f32 0.01, %v126_v1 }
   0xd   :  { %567 = vmatprep.subr.bf16.mxu0 %v510_v3  ;;  %v507_v12 = vpack.c.bf16 %v121_v10, %v119_v8  ;;  %v118_v13 = vld [vmem:[%s5483_s29 + $0xb8] sm:$0xff]  ;;  %v115_v15 = vld [vmem:[%s5483_s29 + $0xa0] sm:$0xff]  ;;  %v117_v16 = vld [vmem:[%s5483_s29 + $0xb0] sm:$0xff]  ;;  %v3070_v21 = vmul.f32 0.01, %v123_v2 }
   0xe   :  { %568 = vmatpush1.bf16.msra.mxu0 %v509_v6  ;;  %v506_v14 = vpack.c.bf16 %v118_v13, %v116_v11  ;;  %v112_v17 = vld [vmem:[%s5483_s29 + $0x88] sm:$0xff]  ;;  %v114_v18 = vld [vmem:[%s5483_s29 + $0x98] sm:$0xff]  ;;  %v3072_v22 = vmul.f32 0.01, %v125_v4  ;;  %v505_v23 = vpack.c.bf16 %v117_v16, %v115_v15  ;;  %v3074_v24 = vmul.f32 0.01, %v120_v5 }
   0xf   :  { %569 = vmatprep.subr.bf16.mxu0 %v508_v9  ;;  %v3076_v25 = vmul.f32 0.01, %v122_v7  ;;  %v504_v26 = vpack.c.bf16 %v114_v18, %v112_v17  ;;  %v111_v27 = vld [vmem:[%s5483_s29 + $0x80] sm:$0xff]  ;;  %v113_v28 = vld [vmem:[%s5483_s29 + $0x90] sm:$0xff]  ;;  %v3084_v29 = vmul.f32 0.01, %v119_v8 }
  0x10   :  { %v3086_v30 = vmul.f32 0.01, %v121_v10  ;;  %v108_v31 = vld [vmem:[%s5483_s29 + $0x68] sm:$0xff]  ;;  %v110_v32 = vld [vmem:[%s5483_s29 + $0x78] sm:$0xff]  ;;  %v3094_v33 = vmul.f32 0.01, %v116_v11  ;;  %v503_v39 = vpack.c.bf16 %v113_v28, %v111_v27 }
  0x11   :  { %v3096_v34 = vmul.f32 0.01, %v118_v13  ;;  %v3098_v35 = vmul.f32 0.01, %v115_v15  ;;  %v3100_v36 = vmul.f32 0.01, %v117_v16  ;;  %v502_v42 = vpack.c.bf16 %v110_v32, %v108_v31 }
  0x12   :  { %570 = vmatpush1.bf16.msra.mxu0 %v507_v12  ;;  %v3102_v37 = vmul.f32 0.01, %v112_v17  ;;  %v3104_v38 = vmul.f32 0.01, %v114_v18  ;;  %v3106_v40 = vmul.f32 0.01, %v111_v27 }
  0x13   :  { %571 = vmatprep.subr.bf16.mxu0 %v506_v14  ;;  %v3108_v41 = vmul.f32 0.01, %v113_v28  ;;  %v107_v43 = vld [vmem:[%s5483_s29 + $0x60] sm:$0xff]  ;;  %v109_v44 = vld [vmem:[%s5483_s29 + $0x70] sm:$0xff]  ;;  %v3116_v45 = vmul.f32 0.01, %v108_v31 }
  0x14   :  { %v3118_v46 = vmul.f32 0.01, %v110_v32  ;;  %v104_v47 = vld [vmem:[%s5483_s29 + $0x48] sm:$0xff]  ;;  %v106_v48 = vld [vmem:[%s5483_s29 + $0x58] sm:$0xff]  ;;  %v3126_v49 = vmul.f32 0.01, %v107_v43  ;;  %v501_v52 = vpack.c.bf16 %v109_v44, %v107_v43 }
  0x15   :  { %v3128_v50 = vmul.f32 0.01, %v109_v44  ;;  %v103_v51 = vld [vmem:[%s5483_s29 + $0x40] sm:$0xff]  ;;  %v3133_v53 = vmul.f32 0.01, %v104_v47  ;;  %v105_v55 = vld [vmem:[%s5483_s29 + $0x50] sm:$0xff]  ;;  %v500_v57 = vpack.c.bf16 %v106_v48, %v104_v47 }
  0x16   :  { %572 = vmatpush1.bf16.msra.mxu0 %v505_v23  ;;  %v3135_v54 = vmul.f32 0.01, %v106_v48  ;;  %v100_v56 = vld [vmem:[%s5483_s29 + $0x28] sm:$0xff]  ;;  %v3143_v58 = vmul.f32 0.01, %v103_v51  ;;  %v102_v60 = vld [vmem:[%s5483_s29 + $0x38] sm:$0xff]  ;;  %v499_v6 = vpack.c.bf16 %v105_v55, %v103_v51 }
  0x17   :  { %573 = vmatprep.subr.bf16.mxu0 %v504_v26  ;;  %v3145_v59 = vmul.f32 0.01, %v105_v55  ;;  %v99_v61 = vld [vmem:[%s5483_s29 + $0x20] sm:$0xff]  ;;  %v3153_v62 = vmul.f32 0.01, %v100_v56  ;;  %v101_v0 = vld [vmem:[%s5483_s29 + $0x30] sm:$0xff]  ;;  %v498_v11 = vpack.c.bf16 %v102_v60, %v100_v56 }
  0x18   :  { %v3155_v63 = vmul.f32 0.01, %v102_v60  ;;  %v96_v1 = vld [vmem:[%s5483_s29 + $0x8] sm:$0xff]  ;;  %v3163_v2 = vmul.f32 0.01, %v99_v61  ;;  %v98_v4 = vld [vmem:[%s5483_s29 + $0x18] sm:$0xff]  ;;  %v497_v32 = vpack.c.bf16 %v101_v0, %v99_v61 }
  0x19   :  { %v3165_v3 = vmul.f32 0.01, %v101_v0  ;;  %v95_v5 = vld [vmem:[%s5483_s29] sm:$0xff]  ;;  %v3173_v7 = vmul.f32 0.01, %v96_v1  ;;  %v97_v9 = vld [vmem:[%s5483_s29 + $0x10] sm:$0xff]  ;;  %v496_v47 = vpack.c.bf16 %v98_v4, %v96_v1 }
  0x1a   :  { %574 = vmatpush1.bf16.msra.mxu0 %v503_v39  ;;  %v3175_v8 = vmul.f32 0.01, %v98_v4  ;;  %v156_v10 = vld [vmem:[%s5483_s29 + $0x1e8] sm:$0xff]  ;;  %v3183_v12 = vmul.f32 0.01, %v95_v5  ;;  %v158_v14 = vld [vmem:[%s5483_s29 + $0x1f8] sm:$0xff] }
  0x1b   :  { %575 = vmatprep.subr.bf16.mxu0 %v502_v42  ;;  %v3185_v13 = vmul.f32 0.01, %v97_v9  ;;  %v3193_v15 = vld [vmem:[%s5483_s29 + $0x1e0] sm:$0xff]  ;;  %v3195_v16 = vmul.f32 0.01, %v156_v10  ;;  %v3202_v18 = vld [vmem:[%s5483_s29 + $0x1f0] sm:$0xff] }
  0x1c   :  { %v3197_v17 = vmul.f32 0.01, %v158_v14  ;;  %v3207_v23 = vld [vmem:[%s5483_s29 + $0x1c8] sm:$0xff]  ;;  %v3210_v26 = vmul.f32 0.01, %v3193_v15  ;;  %v3218_v28 = vld [vmem:[%s5483_s29 + $0x1d8] sm:$0xff] }
  0x1d   :  { %5484 = vst [vmem:[#allocation4_spill] sm:$0xff] %v3195_v16  ;;  %v3213_v27 = vmul.f32 0.01, %v3202_v18  ;;  %v3223_v31 = vld [vmem:[%s5483_s29 + $0x1c0] sm:$0xff]  ;;  %v3226_v39 = vmul.f32 0.01, %v3207_v23 }
  0x1e   :  { %576 = vmatpush1.bf16.msra.mxu0 %v501_v52  ;;  %5485 = vst [vmem:[#allocation5_spill] sm:$0xff] %v3197_v17  ;;  %5486 = vst [vmem:[#allocation6_spill] sm:$0xff] %v3210_v26  ;;  %v3229_v42 = vmul.f32 0.01, %v3218_v28  ;;  %v3234_v43 = vld [vmem:[%s5483_s29 + $0x1d0] sm:$0xff]  ;;  %v3239_v44 = vld [vmem:[%s5483_s29 + $0x1a8] sm:$0xff] }
  0x1f   :  { %577 = vmatprep.subr.bf16.mxu0 %v500_v57  ;;  %5487 = vst [vmem:[#allocation7_spill] sm:$0xff] %v3213_v27  ;;  %5488 = vst [vmem:[#allocation8_spill] sm:$0xff] %v3226_v39  ;;  %v3242_v48 = vmul.f32 0.01, %v3223_v31  ;;  %v3245_v51 = vmul.f32 0.01, %v3234_v43 }
  0x20   :  { %5489 = vst [vmem:[#allocation9_spill] sm:$0xff] %v3229_v42  ;;  %v3250_v52 = vld [vmem:[%s5483_s29 + $0x1b8] sm:$0xff]  ;;  %v3255_v55 = vld [vmem:[%s5483_s29 + $0x1a0] sm:$0xff]  ;;  %v3258_v56 = vmul.f32 0.01, %v3239_v44  ;;  %v3266_v60 = vld [vmem:[%s5483_s29 + $0x1b0] sm:$0xff] }
  0x21   :  { %5490 = vst [vmem:[#allocation10_spill] sm:$0xff] %v3242_v48  ;;  %5491 = vst [vmem:[#allocation11_spill] sm:$0xff] %v3245_v51  ;;  %v3261_v57 = vmul.f32 0.01, %v3250_v52  ;;  %v3271_v61 = vld [vmem:[%s5483_s29 + $0x188] sm:$0xff]  ;;  %v3282_v4 = vld [vmem:[%s5483_s29 + $0x198] sm:$0xff]  ;;  %v526_v51 = vpack.c.bf16 %v158_v14, %v156_v10 }
  0x22   :  { %578 = vmatpush1.bf16.msra.mxu0 %v499_v6  ;;  %5492 = vst [vmem:[#allocation12_spill] sm:$0xff] %v3258_v56  ;;  %v3274_v0 = vmul.f32 0.01, %v3255_v55  ;;  %v3277_v1 = vmul.f32 0.01, %v3266_v60  ;;  %v3287_v6 = vld [vmem:[%s5483_s29 + $0x180] sm:$0xff] }
  0x23   :  { %579 = vmatprep.subr.bf16.mxu0 %v498_v11  ;;  %5493 = vst [vmem:[#allocation13_spill] sm:$0xff] %v3261_v57  ;;  %v495_v11 = vpack.c.bf16 %v97_v9, %v95_v5  ;;  %v3290_v57 = vmul.f32 0.01, %v3271_v61  ;;  %v3303_v56 = vld [vmem:[%s5483_s29 + $0x168] sm:$0xff]  ;;  %v3306_v5 = vmul.f32 0.01, %v3287_v6 }
  0x24   :  { %5494 = vst [vmem:[#allocation14_spill] sm:$0xff] %v3274_v0  ;;  %5495 = vst [vmem:[#allocation15_spill] sm:$0xff] %v3277_v1  ;;  %v3293_v0 = vmul.f32 0.01, %v3282_v4  ;;  %v3298_v1 = vld [vmem:[%s5483_s29 + $0x190] sm:$0xff]  ;;  %v3356_v42 = vld [vmem:[%s5483_s29 + $0x140] sm:$0xff] }
  0x25   :  { %5496 = vst [vmem:[#allocation16_spill] sm:$0xff] %v3290_v57  ;;  %5498 = vst [vmem:[#allocation18_spill] sm:$0xff] %v3306_v5  ;;  %v3309_v9 = vmul.f32 0.01, %v3298_v1  ;;  %v3322_v57 = vmul.f32 0.01, %v3303_v56 }
  0x26   :  { %580 = vmatpush1.bf16.msra.mxu0 %v497_v32  ;;  %5497 = vst [vmem:[#allocation17_spill] sm:$0xff] %v3293_v0  ;;  %v3314_v32 = vld [vmem:[%s5483_s29 + $0x178] sm:$0xff]  ;;  %v3319_v0 = vld [vmem:[%s5483_s29 + $0x160] sm:$0xff]  ;;  %v3330_v14 = vld [vmem:[%s5483_s29 + $0x170] sm:$0xff] }
  0x27   :  { %581 = vmatprep.subr.bf16.mxu0 %v496_v47  ;;  %5499 = vst [vmem:[#allocation19_spill] sm:$0xff] %v3309_v9  ;;  %5500 = vst [vmem:[#allocation20_spill] sm:$0xff] %v3322_v57  ;;  %v3325_v10 = vmul.f32 0.01, %v3314_v32  ;;  %v3335_v47 = vld [vmem:[%s5483_s29 + $0x148] sm:$0xff]  ;;  %v525_v57 = vpack.c.bf16 %v3202_v18, %v3193_v15 }
  0x28   :  { %v3338_v9 = vmul.f32 0.01, %v3319_v0  ;;  %v3341_v5 = vmul.f32 0.01, %v3330_v14  ;;  %v3351_v48 = vmul.f32 0.01, %v3335_v47 }
  0x29   :  { %5501 = vst [vmem:[#allocation21_spill] sm:$0xff] %v3325_v10  ;;  %v3346_v10 = vld [vmem:[%s5483_s29 + $0x158] sm:$0xff]  ;;  %v2832_v15 = vld [vmem:[%s5506_s30 + $0x4] ss:$8 sps:$4 sm:$0xff]   ;;  %v3372_v18 = vmul.f32 0.01, %v3356_v42 }
  0x2a   :  { %5502 = vst [vmem:[#allocation22_spill] sm:$0xff] %v3338_v9  ;;  %5503 = vst [vmem:[#allocation23_spill] sm:$0xff] %v3341_v5  ;;  %582 = vmatpush1.bf16.msra.mxu0 %v495_v11  ;;  %v524_v5 = vpack.c.bf16 %v3218_v28, %v3207_v23  ;;  %v3361_v9 = vmul.f32 0.01, %v3346_v10  ;;  %v3366_v11 = vld [vmem:[%s5483_s29 + $0x150] sm:$0xff]  ;;  %v3380_v23 = vld [vmem:[%s5483_s29 + $0x128] sm:$0xff]  ;;  %v523_v28 = vpack.c.bf16 %v3234_v43, %v3223_v31  ;;  %599 = vmatprep.mubr.bf16.mxu0 %v2832_v15 }
  0x2b   :  { %5504 = vst [vmem:[#allocation24_spill] sm:$0xff] %v3351_v48  ;;  %583 = vmatprep.subr.bf16.mxu0 %v526_v51  ;;  %5507 = vst [vmem:[#allocation26_spill] sm:$0xff] %v3372_v18  ;;  %v3375_v51 = vmul.f32 0.01, %v3366_v11  ;;  %v3389_v48 = vld [vmem:[%s5483_s29 + $0x138] sm:$0xff]  ;;  %752 = vmatprep.mubr.bf16.mxu1 %v2832_v15  ;;  %v521_v31 = vpack.c.bf16 %v3266_v60, %v3255_v55 }
  0x2c   :  { %5505 = vst [vmem:[#allocation25_spill] sm:$0xff] %v3361_v9  ;;  %v522_v9 = vpack.c.bf16 %v3250_v52, %v3239_v44  ;;  %v3392_v18 = vmul.f32 0.01, %v3380_v23  ;;  %v3406_v52 = vmul.f32 0.01, %v3389_v48  ;;  %v188_v44 = vld [vmem:[%s5515_s26 + $0xe8] sm:$0xff] }
  0x2d   :  { %5508 = vst [vmem:[#allocation27_spill] sm:$0xff] %v3375_v51  ;;  %v3397_v51 = vld [vmem:[%s5483_s29 + $0x120] sm:$0xff]  ;;  %v252_v43 = vmul.f32 0.99, %v188_v44  ;;  %v184_v44 = vld [vmem:[%s5515_s26 + $0xc8] sm:$0xff] }
  0x2e   :  { %5509 = vst [vmem:[#allocation28_spill] sm:$0xff] %v3392_v18  ;;  %5510 = vst [vmem:[#allocation29_spill] sm:$0xff] %v3397_v51  ;;  %584 = vmatpush2.bf16.msra.mxu0 %v525_v57  ;;  %v3411_v18 = vld [vmem:[%s5483_s29 + $0x130] sm:$0xff]  ;;  %v3418_v60 = vmul.f32 0.01, %v3397_v51 }
  0x2f   :  { %5511 = vst [vmem:[#allocation30_spill] sm:$0xff] %v3406_v52  ;;  %5512 = vst [vmem:[#allocation31_spill] sm:$0xff] %v3411_v18  ;;  %585 = vmatprep.subr.bf16.mxu0 %v524_v5  ;;  %v3421_v15 = vmul.f32 0.01, %v3411_v18  ;;  %v190_v5 = vld [vmem:[%s5515_s26 + $0xf8] sm:$0xff]  ;;  %v380_v55 = vadd.f32 %v3066_v19, %v252_v43  ;;  %v180_v19 = vld [vmem:[%s5515_s26 + $0xa8] sm:$0xff] }
  0x30   :  { %5513 = vst [vmem:[#allocation32_spill] sm:$0xff] %v3418_v60  ;;  %v254_v52 = vmul.f32 0.99, %v190_v5  ;;  %v189_v60 = vld [vmem:[%s5515_s26 + $0xf0] sm:$0xff]  ;;  %v186_v5 = vld [vmem:[%s5515_s26 + $0xd8] sm:$0xff] }
  0x31   :  { %5514 = vst [vmem:[#allocation33_spill] sm:$0xff] %v3421_v15  ;;  %v187_v15 = vld [vmem:[%s5515_s26 + $0xe0] sm:$0xff]  ;;  %v253_v26 = vmul.f32 0.99, %v189_v60  ;;  %v248_v16 = vmul.f32 0.99, %v184_v44 }
  0x32   :  { %v251_v57 = vmul.f32 0.99, %v187_v15  ;;  %586 = vmatpush2.bf16.msra.mxu0 %v523_v28  ;;  %v382_v17 = vadd.f32 %v3068_v20, %v254_v52  ;;  %v250_v39 = vmul.f32 0.99, %v186_v5  ;;  %v183_v15 = vld [vmem:[%s5515_s26 + $0xc0] sm:$0xff]  ;;  %v185_v60 = vld [vmem:[%s5515_s26 + $0xd0] sm:$0xff] }
  0x33   :  { %587 = vmatprep.subr.bf16.mxu0 %v522_v9  ;;  %v381_v51 = vadd.f32 %v3072_v22, %v253_v26  ;;  %v247_v28 = vmul.f32 0.99, %v183_v15  ;;  %v249_v18 = vmul.f32 0.99, %v185_v60  ;;  %v182_v20 = vld [vmem:[%s5515_s26 + $0xb8] sm:$0xff]  ;;  %v376_v22 = vadd.f32 %v3074_v24, %v248_v16 }
  0x34   :  { %v379_v27 = vadd.f32 %v3070_v21, %v251_v57  ;;  %444 = vst [vmem:[%s5459_s15 + $0xe8] sm:$0xff] %v380_v55  ;;  %446 = vst [vmem:[%s5459_s15 + $0xf8] sm:$0xff] %v382_v17  ;;  %v703_v21 = vpack.c.bf16 %v382_v17, %v380_v55  ;;  %v378_v26 = vadd.f32 %v3076_v25, %v250_v39  ;;  %v244_v9 = vmul.f32 0.99, %v180_v19 }
  0x35   :  { %v375_v25 = vadd.f32 %v3084_v29, %v247_v28  ;;  %v377_v16 = vadd.f32 %v3086_v30, %v249_v18  ;;  %v246_v17 = vmul.f32 0.99, %v182_v20 }
  0x36   :  { %v702_v24 = vpack.c.bf16 %v381_v51, %v379_v27  ;;  %588 = vmatpush2.bf16.msra.mxu0 %v521_v31  ;;  %720 = vmatprep.subr.bf16.mxu1 %v703_v21  ;;  %v701_v29 = vpack.c.bf16 %v378_v26, %v376_v22  ;;  %v372_v30 = vadd.f32 %v3094_v33, %v244_v9 }
  0x37   :  { %v5516_v31 = vpack.c.bf16 %v3282_v4, %v3271_v61  ;;  %v700_v33 = vpack.c.bf16 %v377_v16, %v375_v25  ;;  %v374_v5 = vadd.f32 %v3096_v34, %v246_v17 }
  0x38   :  { %721 = vmatpush1.bf16.msra.mxu1 %v702_v24 }
  0x39   :  { %589 = vmatprep.subr.bf16.mxu0 %v5516_v31  ;;  %722 = vmatprep.subr.bf16.mxu1 %v701_v29 }
  0x3b   :  { %v179_v43 = vld [vmem:[%s5515_s26 + $0xa0] sm:$0xff]  ;;  %v181_v52 = vld [vmem:[%s5515_s26 + $0xb0] sm:$0xff]  ;;  %v176_v57 = vld [vmem:[%s5515_s26 + $0x88] sm:$0xff] }
  0x3c   :  { %443 = vst [vmem:[%s5459_s15 + $0xe0] sm:$0xff] %v379_v27  ;;  %445 = vst [vmem:[%s5459_s15 + $0xf0] sm:$0xff] %v381_v51  ;;  %v243_v27 = vmul.f32 0.99, %v179_v43  ;;  %v245_v18 = vmul.f32 0.99, %v181_v52  ;;  %723 = vmatpush1.bf16.msra.mxu1 %v700_v33 }
  0x3d   :  { %v240_v15 = vmul.f32 0.99, %v176_v57  ;;  %v5517_v57 = vpack.c.bf16 %v3298_v1, %v3287_v6 }
  0x3e   :  { %v371_v61 = vadd.f32 %v3098_v35, %v243_v27  ;;  %v373_v4 = vadd.f32 %v3100_v36, %v245_v18  ;;  %v699_v35 = vpack.c.bf16 %v374_v5, %v372_v30 }
  0x3f   :  { %v368_v36 = vadd.f32 %v3102_v37, %v240_v15  ;;  %590 = vmatpush2.bf16.msra.mxu0 %v5517_v57 }
  0x40   :  { %v698_v17 = vpack.c.bf16 %v373_v4, %v371_v61  ;;  %724 = vmatprep.subr.bf16.mxu1 %v699_v35 }
  0x42   :  { %725 = vmatpush1.bf16.msra.mxu1 %v698_v17 }
  0x43   :  { %v178_v39 = vld [vmem:[%s5515_s26 + $0x98] sm:$0xff]  ;;  %v175_v55 = vld [vmem:[%s5515_s26 + $0x80] sm:$0xff]  ;;  %v177_v44 = vld [vmem:[%s5515_s26 + $0x90] sm:$0xff] }
  0x44   :  { %440 = vst [vmem:[%s5459_s15 + $0xc8] sm:$0xff] %v376_v22  ;;  %442 = vst [vmem:[%s5459_s15 + $0xd8] sm:$0xff] %v378_v26  ;;  %v242_v60 = vmul.f32 0.99, %v178_v39  ;;  %v239_v19 = vmul.f32 0.99, %v175_v55 }
  0x45   :  { %v241_v20 = vmul.f32 0.99, %v177_v44  ;;  %v3536_v22 = vld [vmem:[%s5483_s29 + $0x108] sm:$0xff] }
  0x46   :  { %v370_v26 = vadd.f32 %v3104_v38, %v242_v60  ;;  %v3553_v24 = vmul.f32 0.01, %v3536_v22  ;;  %v3562_v37 = vadd.f32 %v3106_v40, %v239_v19  ;;  %v3673_v19 = vld [vmem:[%s5483_s29 + $0x100] sm:$0xff] }
  0x47   :  { %v3565_v38 = vadd.f32 %v3108_v41, %v241_v20 }
  0x48   :  { %v697_v55 = vpack.c.bf16 %v370_v26, %v368_v36 }
  0x4a   :  { %726 = vmatprep.subr.bf16.mxu1 %v697_v55  ;;  %v5524_v55 = vld [vmem:[#allocation31_spill] sm:$0xff] }
  0x4b   :  { %v172_v51 = vld [vmem:[%s5515_s26 + $0x68] sm:$0xff] }
  0x4c   :  { %439 = vst [vmem:[%s5459_s15 + $0xc0] sm:$0xff] %v375_v25  ;;  %441 = vst [vmem:[%s5459_s15 + $0xd0] sm:$0xff] %v377_v16  ;;  %v236_v9 = vmul.f32 0.99, %v172_v51  ;;  %v5518_v16 = vpack.c.bf16 %v3314_v32, %v3303_v56  ;;  %v3591_v32 = vld [vmem:[%s5483_s29 + $0x118] sm:$0xff] }
  0x4d   :  { %v512_v35 = vpack.c.bf16 %v3591_v32, %v3536_v22 }
  0x4e   :  { %591 = vmatprep.subr.bf16.mxu0 %v5518_v16  ;;  %v3583_v40 = vadd.f32 %v3116_v45, %v236_v9 }
  0x53   :  { %v174_v28 = vld [vmem:[%s5515_s26 + $0x78] sm:$0xff] }
  0x54   :  { %436 = vst [vmem:[%s5459_s15 + $0xa8] sm:$0xff] %v372_v30  ;;  %v238_v25 = vmul.f32 0.99, %v174_v28  ;;  %v5520_v28 = vpack.c.bf16 %v3346_v10, %v3335_v47 }
  0x56   :  { %v3602_v45 = vadd.f32 %v3118_v46, %v238_v25 }
  0x5b   :  { %v171_v34 = vld [vmem:[%s5515_s26 + $0x60] sm:$0xff]  ;;  %v173_v21 = vld [vmem:[%s5515_s26 + $0x70] sm:$0xff] }
  0x5c   :  { %438 = vst [vmem:[%s5459_s15 + $0xb8] sm:$0xff] %v374_v5  ;;  %v235_v41 = vmul.f32 0.99, %v171_v34  ;;  %v237_v39 = vmul.f32 0.99, %v173_v21  ;;  %v5519_v5 = vpack.c.bf16 %v3330_v14, %v3319_v0 }
  0x5e   :  { %v3612_v27 = vadd.f32 %v3126_v49, %v235_v41  ;;  %v3615_v18 = vadd.f32 %v3128_v50, %v237_v39  ;;  %592 = vmatpush2.bf16.msra.mxu0 %v5519_v5  ;;  %v3627_v49 = vmul.f32 0.01, %v3591_v32  ;;  %v5529_v5 = vld [vmem:[#allocation7_spill] sm:$0xff] }
  0x5f   :  { %593 = vmatprep.subr.bf16.mxu0 %v5520_v28  ;;  %v3828_v28 = vld [vmem:[%s5506_s30] ss:$8 sps:$4 sm:$0xff]  }
  0x63   :  { %v168_v43 = vld [vmem:[%s5515_s26 + $0x48] sm:$0xff]  ;;  %v170_v52 = vld [vmem:[%s5515_s26 + $0x58] sm:$0xff] }
  0x64   :  { %435 = vst [vmem:[%s5459_s15 + $0xa0] sm:$0xff] %v371_v61  ;;  %437 = vst [vmem:[%s5459_s15 + $0xb0] sm:$0xff] %v373_v4  ;;  %v232_v44 = vmul.f32 0.99, %v168_v43  ;;  %v234_v29 = vmul.f32 0.99, %v170_v52  ;;  %v5521_v43 = vpack.c.bf16 %v3366_v11, %v3356_v42  ;;  %v5522_v11 = vpack.c.bf16 %v3389_v48, %v3380_v23 }
  0x66   :  { %v3634_v50 = vadd.f32 %v3133_v53, %v232_v44  ;;  %v3637_v15 = vadd.f32 %v3135_v54, %v234_v29  ;;  %v696_v53 = vpack.c.bf16 %v3565_v38, %v3562_v37  ;;  %594 = vmatpush2.bf16.msra.mxu0 %v5521_v43 }
  0x67   :  { %595 = vmatprep.subr.bf16.mxu0 %v5522_v11 }
  0x68   :  { %727 = vmatpush1.bf16.msra.mxu1 %v696_v53 }
  0x6b   :  { %v167_v1 = vld [vmem:[%s5515_s26 + $0x40] sm:$0xff]  ;;  %v169_v6 = vld [vmem:[%s5515_s26 + $0x50] sm:$0xff] }
  0x6c   :  { %432 = vst [vmem:[%s5459_s15 + $0x88] sm:$0xff] %v368_v36  ;;  %434 = vst [vmem:[%s5459_s15 + $0x98] sm:$0xff] %v370_v26  ;;  %v231_v51 = vmul.f32 0.99, %v167_v1  ;;  %v233_v46 = vmul.f32 0.99, %v169_v6  ;;  %v693_v6 = vpack.c.bf16 %v3637_v15, %v3634_v50 }
  0x6d   :  { %v3696_v36 = vld [vmem:[%s5483_s29 + $0x110] sm:$0xff] }
  0x6e   :  { %v3659_v54 = vadd.f32 %v3143_v58, %v231_v51  ;;  %v3662_v10 = vadd.f32 %v3145_v59, %v233_v46  ;;  %v695_v58 = vpack.c.bf16 %v3602_v45, %v3583_v40  ;;  %v511_v41 = vpack.c.bf16 %v3696_v36, %v3673_v19 }
  0x70   :  { %728 = vmatprep.subr.bf16.mxu1 %v695_v58  ;;  %v692_v29 = vpack.c.bf16 %v3662_v10, %v3659_v54 }
  0x73   :  { %v164_v56 = vld [vmem:[%s5515_s26 + $0x28] sm:$0xff] }
  0x74   :  { %431 = vst [vmem:[%s5459_s15 + $0x80] sm:$0xff] %v3562_v37  ;;  %433 = vst [vmem:[%s5459_s15 + $0x90] sm:$0xff] %v3565_v38  ;;  %v228_v60 = vmul.f32 0.99, %v164_v56 }
  0x76   :  { %v3686_v59 = vadd.f32 %v3153_v62, %v228_v60 }
  0x7b   :  { %v166_v30 = vld [vmem:[%s5515_s26 + $0x38] sm:$0xff] }
  0x7c   :  { %428 = vst [vmem:[%s5459_s15 + $0x68] sm:$0xff] %v3583_v40  ;;  %v230_v47 = vmul.f32 0.99, %v166_v30  ;;  %v5527_v30 = vld [vmem:[#allocation5_spill] sm:$0xff] }
  0x7e   :  { %v3707_v62 = vadd.f32 %v3155_v63, %v230_v47  ;;  %v5531_v47 = vld [vmem:[#allocation9_spill] sm:$0xff] }
  0x80   :  { %v691_v53 = vpack.c.bf16 %v3707_v62, %v3686_v59 }
  0x83   :  { %v163_v31 = vld [vmem:[%s5515_s26 + $0x20] sm:$0xff]  ;;  %v165_v33 = vld [vmem:[%s5515_s26 + $0x30] sm:$0xff] }
  0x84   :  { %430 = vst [vmem:[%s5459_s15 + $0x78] sm:$0xff] %v3602_v45  ;;  %v227_v20 = vmul.f32 0.99, %v163_v31  ;;  %v229_v34 = vmul.f32 0.99, %v165_v33  ;;  %v5525_v45 = vld [vmem:[#allocation29_spill] sm:$0xff] }
  0x85   :  { %v5526_v44 = vpack.c.bf16 %v5524_v55, %v5525_v45  ;;  %v5528_v31 = vld [vmem:[#allocation6_spill] sm:$0xff]  ;;  %v5539_v55 = vld [vmem:[#allocation17_spill] sm:$0xff] }
  0x86   :  { %v3720_v52 = vadd.f32 %v3163_v2, %v227_v20  ;;  %v3723_v63 = vadd.f32 %v3165_v3, %v229_v34  ;;  %v694_v2 = vpack.c.bf16 %v3615_v18, %v3612_v27  ;;  %v3851_v20 = vld [vmem:[%s5506_s30 + $0x14] ss:$8 sps:$4 sm:$0xff]  }
  0x87   :  { %596 = vmatpush2.bf16.msra.mxu0 %v5526_v44  ;;  %v5532_v34 = vld [vmem:[#allocation10_spill] sm:$0xff] }
  0x88   :  { %597 = vmatprep.subr.bf16.mxu0 %v512_v35  ;;  %729 = vmatpush1.bf16.msra.mxu1 %v694_v2  ;;  %v5533_v35 = vld [vmem:[#allocation11_spill] sm:$0xff]  ;;  %v690_v43 = vpack.c.bf16 %v3723_v63, %v3720_v52 }
  0x89   :  { %730 = vmatprep.subr.bf16.mxu1 %v693_v6  ;;  %v5537_v6 = vld [vmem:[#allocation15_spill] sm:$0xff] }
  0x8b   :  { %v160_v0 = vld [vmem:[%s5515_s26 + $0x8] sm:$0xff]  ;;  %v162_v14 = vld [vmem:[%s5515_s26 + $0x18] sm:$0xff]  ;;  %598 = vmatpush2.bf16.msra.mxu0 %v511_v41 }
  0x8c   :  { %427 = vst [vmem:[%s5459_s15 + $0x60] sm:$0xff] %v3612_v27  ;;  %429 = vst [vmem:[%s5459_s15 + $0x70] sm:$0xff] %v3615_v18  ;;  %v224_v26 = vmul.f32 0.99, %v160_v0  ;;  %v226_v22 = vmul.f32 0.99, %v162_v14  ;;  %731 = vmatpush1.bf16.msra.mxu1 %v692_v29 }
  0x8d   :  { %732 = vmatprep.subr.bf16.mxu1 %v691_v53 }
  0x8e   :  { %v3741_v3 = vadd.f32 %v3173_v7, %v224_v26  ;;  %v3744_v25 = vadd.f32 %v3175_v8, %v226_v22  ;;  %600 = vmatmul.mubr.bf16.vlgmr.msra.gmra.mxu0 %v3828_v28 }
  0x8f   :  { %609 = vmatprep.mubr.bf16.mxu0 %v3851_v20 }
  0x90   :  { %733 = vmatpush1.bf16.msra.mxu1 %v690_v43 }
  0x93   :  { %v159_v61 = vld [vmem:[%s5515_s26] sm:$0xff]  ;;  %v161_v4 = vld [vmem:[%s5515_s26 + $0x10] sm:$0xff] }
  0x94   :  { %424 = vst [vmem:[%s5459_s15 + $0x48] sm:$0xff] %v3634_v50  ;;  %426 = vst [vmem:[%s5459_s15 + $0x58] sm:$0xff] %v3637_v15  ;;  %v223_v57 = vmul.f32 0.99, %v159_v61  ;;  %v225_v37 = vmul.f32 0.99, %v161_v4 }
  0x96   :  { %v3763_v7 = vadd.f32 %v3183_v12, %v223_v57  ;;  %v3766_v8 = vadd.f32 %v3185_v13, %v225_v37  ;;  %v5523_v12 = vld [vmem:[#allocation4_spill] sm:$0xff] }
  0x97   :  { %v5534_v57 = vld [vmem:[#allocation12_spill] sm:$0xff] }
  0x9b   :  { %v220_v21 = vld [vmem:[%s5515_s26 + $0x1e8] sm:$0xff] }
  0x9c   :  { %423 = vst [vmem:[%s5459_s15 + $0x40] sm:$0xff] %v3659_v54  ;;  %425 = vst [vmem:[%s5459_s15 + $0x50] sm:$0xff] %v3662_v10  ;;  %v284_v1 = vmul.f32 0.99, %v220_v21  ;;  %v5530_v54 = vld [vmem:[#allocation8_spill] sm:$0xff] }
  0x9e   :  { %v3785_v13 = vadd.f32 %v5523_v12, %v284_v1 }
  0xa3   :  { %v222_v9 = vld [vmem:[%s5515_s26 + $0x1f8] sm:$0xff] }
  0xa4   :  { %420 = vst [vmem:[%s5459_s15 + $0x28] sm:$0xff] %v3686_v59  ;;  %v286_v16 = vmul.f32 0.99, %v222_v9 }
  0xa6   :  { %v3804_v27 = vadd.f32 %v5527_v30, %v286_v16  ;;  %v3942_v30 = vmul.f32 0.01, %v3696_v36 }
  0xab   :  { %v219_v38 = vld [vmem:[%s5515_s26 + $0x1e0] sm:$0xff]  ;;  %v221_v42 = vld [vmem:[%s5515_s26 + $0x1f0] sm:$0xff] }
  0xac   :  { %422 = vst [vmem:[%s5459_s15 + $0x38] sm:$0xff] %v3707_v62  ;;  %v283_v39 = vmul.f32 0.99, %v219_v38  ;;  %v285_v56 = vmul.f32 0.99, %v221_v42 }
  0xae   :  { %v3814_v33 = vadd.f32 %v5528_v31, %v283_v39  ;;  %v3817_v50 = vadd.f32 %v5529_v5, %v285_v56  ;;  %v3922_v39 = vmul.f32 0.01, %v3673_v19  ;;  %v5538_v56 = vld [vmem:[#allocation16_spill] sm:$0xff] }
  0xb3   :  { %v216_v48 = vld [vmem:[%s5515_s26 + $0x1c8] sm:$0xff]  ;;  %v218_v23 = vld [vmem:[%s5515_s26 + $0x1d8] sm:$0xff] }
  0xb4   :  { %419 = vst [vmem:[%s5459_s15 + $0x20] sm:$0xff] %v3720_v52  ;;  %421 = vst [vmem:[%s5459_s15 + $0x30] sm:$0xff] %v3723_v63  ;;  %v280_v18 = vmul.f32 0.99, %v216_v48  ;;  %v282_v51 = vmul.f32 0.99, %v218_v23  ;;  %v689_v52 = vpack.c.bf16 %v3744_v25, %v3741_v3 }
  0xb5   :  { %v5535_v63 = vld [vmem:[#allocation13_spill] sm:$0xff] }
  0xb6   :  { %v3837_v10 = vadd.f32 %v5530_v54, %v280_v18  ;;  %v3840_v61 = vadd.f32 %v5531_v47, %v282_v51  ;;  %v5540_v18 = vld [vmem:[#allocation18_spill] sm:$0xff]  ;;  %734 = vmatprep.subr.bf16.mxu1 %v689_v52 }
  0xbb   :  { %v215_v17 = vld [vmem:[%s5515_s26 + $0x1c0] sm:$0xff]  ;;  %v217_v40 = vld [vmem:[%s5515_s26 + $0x1d0] sm:$0xff] }
  0xbc   :  { %416 = vst [vmem:[%s5459_s15 + $0x8] sm:$0xff] %v3741_v3  ;;  %418 = vst [vmem:[%s5459_s15 + $0x18] sm:$0xff] %v3744_v25  ;;  %v279_v15 = vmul.f32 0.99, %v215_v17  ;;  %v281_v60 = vmul.f32 0.99, %v217_v40 }
  0xbd   :  { %v5536_v3 = vld [vmem:[#allocation14_spill] sm:$0xff] }
  0xbe   :  { %v3862_v21 = vadd.f32 %v5532_v34, %v279_v15  ;;  %v3865_v62 = vadd.f32 %v5533_v35, %v281_v60  ;;  %v3968_v60 = vld [vmem:[%s5506_s30 + $0x10] ss:$8 sps:$4 sm:$0xff]  }
  0xbf   :  { %610 = vmatmul.mubr.bf16.gmra.mxu0 %v3968_v60 }
  0xc3   :  { %v212_v32 = vld [vmem:[%s5515_s26 + $0x1a8] sm:$0xff] }
  0xc4   :  { %415 = vst [vmem:[%s5459_s15] sm:$0xff] %v3763_v7  ;;  %417 = vst [vmem:[%s5459_s15 + $0x10] sm:$0xff] %v3766_v8  ;;  %v276_v4 = vmul.f32 0.99, %v212_v32 }
  0xc6   :  { %v3884_v37 = vadd.f32 %v5534_v57, %v276_v4 }
  0xcb   :  { %v214_v46 = vld [vmem:[%s5515_s26 + $0x1b8] sm:$0xff] }
  0xcc   :  { %476 = vst [vmem:[%s5459_s15 + $0x1e8] sm:$0xff] %v3785_v13  ;;  %v278_v26 = vmul.f32 0.99, %v214_v46  ;;  %v5541_v46 = vld [vmem:[#allocation19_spill] sm:$0xff] }
  0xce   :  { %v3900_v2 = vadd.f32 %v5535_v63, %v278_v26  ;;  %v5545_v26 = vld [vmem:[#allocation23_spill] sm:$0xff]  ;;  %v5547_v63 = vld [vmem:[#allocation25_spill] sm:$0xff] }
  0xd3   :  { %v211_v0 = vld [vmem:[%s5515_s26 + $0x1a0] sm:$0xff]  ;;  %v213_v14 = vld [vmem:[%s5515_s26 + $0x1b0] sm:$0xff] }
  0xd4   :  { %478 = vst [vmem:[%s5459_s15 + $0x1f8] sm:$0xff] %v3804_v27  ;;  %v275_v38 = vmul.f32 0.99, %v211_v0  ;;  %v277_v42 = vmul.f32 0.99, %v213_v14  ;;  %v688_v0 = vpack.c.bf16 %v3766_v8, %v3763_v7  ;;  %v5542_v14 = vld [vmem:[#allocation20_spill] sm:$0xff]  ;;  %v719_v7 = vpack.c.bf16 %v3804_v27, %v3785_v13 }
  0xd5   :  { %v5543_v8 = vld [vmem:[#allocation21_spill] sm:$0xff]  ;;  %v5544_v13 = vld [vmem:[#allocation22_spill] sm:$0xff] }
  0xd6   :  { %v3910_v25 = vadd.f32 %v5536_v3, %v275_v38  ;;  %v3913_v16 = vadd.f32 %v5537_v6, %v277_v42  ;;  %v4021_v42 = vld [vmem:[%s5506_s30 + $0x24] ss:$8 sps:$4 sm:$0xff]   ;;  %735 = vmatpush1.bf16.msra.mxu1 %v688_v0  ;;  %v718_v6 = vpack.c.bf16 %v3817_v50, %v3814_v33 }
  0xd7   :  { %736 = vmatprep.subr.bf16.mxu1 %v719_v7  ;;  %619 = vmatprep.mubr.bf16.mxu0 %v4021_v42  ;;  %v5553_v0 = vld [vmem:[#allocation33_spill] sm:$0xff] }
  0xda   :  { %737 = vmatpush2.bf16.msra.mxu1 %v718_v6  ;;  %v4223_v6 = vld [vmem:[%s5460_s4 + $0x40] sm:$0xff] }
  0xdb   :  { %v208_v58 = vld [vmem:[%s5515_s26 + $0x188] sm:$0xff]  ;;  %v210_v59 = vld [vmem:[%s5515_s26 + $0x198] sm:$0xff] }
  0xdc   :  { %475 = vst [vmem:[%s5459_s15 + $0x1e0] sm:$0xff] %v3814_v33  ;;  %477 = vst [vmem:[%s5459_s15 + $0x1f0] sm:$0xff] %v3817_v50  ;;  %v272_v1 = vmul.f32 0.99, %v208_v58  ;;  %v274_v48 = vmul.f32 0.99, %v210_v59  ;;  %v717_v50 = vpack.c.bf16 %v3840_v61, %v3837_v10 }
  0xde   :  { %v3930_v32 = vadd.f32 %v5538_v56, %v272_v1  ;;  %v3933_v45 = vadd.f32 %v5539_v55, %v274_v48  ;;  %738 = vmatprep.subr.bf16.mxu1 %v717_v50 }
  0xe3   :  { %v207_v22 = vld [vmem:[%s5515_s26 + $0x180] sm:$0xff]  ;;  %v209_v9 = vld [vmem:[%s5515_s26 + $0x190] sm:$0xff] }
  0xe4   :  { %472 = vst [vmem:[%s5459_s15 + $0x1c8] sm:$0xff] %v3837_v10  ;;  %474 = vst [vmem:[%s5459_s15 + $0x1d8] sm:$0xff] %v3840_v61  ;;  %v271_v17 = vmul.f32 0.99, %v207_v22  ;;  %v273_v40 = vmul.f32 0.99, %v209_v9 }
  0xe5   :  { %v5551_v10 = vld [vmem:[#allocation30_spill] sm:$0xff] }
  0xe6   :  { %v3954_v51 = vadd.f32 %v5540_v18, %v271_v17  ;;  %v3957_v31 = vadd.f32 %v5541_v46, %v273_v40  ;;  %v5548_v17 = vld [vmem:[#allocation26_spill] sm:$0xff] }
  0xeb   :  { %v204_v11 = vld [vmem:[%s5515_s26 + $0x168] sm:$0xff] }
  0xec   :  { %471 = vst [vmem:[%s5459_s15 + $0x1c0] sm:$0xff] %v3862_v21  ;;  %473 = vst [vmem:[%s5459_s15 + $0x1d0] sm:$0xff] %v3865_v62  ;;  %v268_v44 = vmul.f32 0.99, %v204_v11  ;;  %v5546_v11 = vld [vmem:[#allocation24_spill] sm:$0xff] }
  0xee   :  { %v3981_v53 = vadd.f32 %v5542_v14, %v268_v44  ;;  %v5550_v44 = vld [vmem:[#allocation28_spill] sm:$0xff] }
  0xf3   :  { %v206_v23 = vld [vmem:[%s5515_s26 + $0x178] sm:$0xff] }
  0xf4   :  { %468 = vst [vmem:[%s5459_s15 + $0x1a8] sm:$0xff] %v3884_v37  ;;  %v270_v36 = vmul.f32 0.99, %v206_v23 }
  0xf6   :  { %v3997_v58 = vadd.f32 %v5543_v8, %v270_v36 }
  0xfb   :  { %v203_v41 = vld [vmem:[%s5515_s26 + $0x160] sm:$0xff]  ;;  %v205_v12 = vld [vmem:[%s5515_s26 + $0x170] sm:$0xff] }
  0xfc   :  { %470 = vst [vmem:[%s5459_s15 + $0x1b8] sm:$0xff] %v3900_v2  ;;  %v267_v54 = vmul.f32 0.99, %v203_v41  ;;  %v269_v47 = vmul.f32 0.99, %v205_v12  ;;  %v5549_v41 = vld [vmem:[#allocation27_spill] sm:$0xff] }
  0xfe   :  { %v4007_v27 = vadd.f32 %v5544_v13, %v267_v54  ;;  %v4010_v22 = vadd.f32 %v5545_v26, %v269_v47  ;;  %v4168_v26 = vld [vmem:[%s5460_s4 + $0xe8] sm:$0xff] }
 0x103   :  { %v200_v29 = vld [vmem:[%s5515_s26 + $0x148] sm:$0xff]  ;;  %v202_v19 = vld [vmem:[%s5515_s26 + $0x158] sm:$0xff] }
 0x104   :  { %467 = vst [vmem:[%s5459_s15 + $0x1a0] sm:$0xff] %v3910_v25  ;;  %469 = vst [vmem:[%s5459_s15 + $0x1b0] sm:$0xff] %v3913_v16  ;;  %v264_v59 = vmul.f32 0.99, %v200_v29  ;;  %v266_v34 = vmul.f32 0.99, %v202_v19 }
 0x106   :  { %v4028_v52 = vadd.f32 %v5546_v11, %v264_v59  ;;  %v4031_v1 = vadd.f32 %v5547_v63, %v266_v34  ;;  %v715_v59 = vpack.c.bf16 %v3900_v2, %v3884_v37  ;;  %v714_v37 = vpack.c.bf16 %v3913_v16, %v3910_v25  ;;  %v2841_v34 = vld [vmem:[%s5506_s30 + $0x30] ss:$8 sps:$4 sm:$0xff]  }
 0x107   :  { %v713_v2 = vpack.c.bf16 %v3933_v45, %v3930_v32  ;;  %v710_v25 = vpack.c.bf16 %v4010_v22, %v4007_v27  ;;  %v4204_v63 = vld [vmem:[%s5460_s4 + $0x58] sm:$0xff] }
 0x108   :  { %v709_v16 = vpack.c.bf16 %v4031_v1, %v4028_v52 }
 0x10b   :  { %v199_v5 = vld [vmem:[%s5515_s26 + $0x140] sm:$0xff]  ;;  %v201_v15 = vld [vmem:[%s5515_s26 + $0x150] sm:$0xff] }
 0x10c   :  { %464 = vst [vmem:[%s5459_s15 + $0x188] sm:$0xff] %v3930_v32  ;;  %466 = vst [vmem:[%s5459_s15 + $0x198] sm:$0xff] %v3933_v45  ;;  %v263_v9 = vmul.f32 0.99, %v199_v5  ;;  %v265_v43 = vmul.f32 0.99, %v201_v15 }
 0x10d   :  { %v5552_v5 = vld [vmem:[#allocation32_spill] sm:$0xff] }
 0x10e   :  { %v391_v40 = vadd.f32 %v5548_v17, %v263_v9  ;;  %v393_v12 = vadd.f32 %v5549_v41, %v265_v43  ;;  %v4175_v9 = vld [vmem:[%s5460_s4 + $0x60] sm:$0xff]  ;;  %v4180_v43 = vld [vmem:[%s5460_s4 + $0x68] sm:$0xff]  ;;  %v4235_v41 = vld [vmem:[%s5460_s4 + $0xb0] sm:$0xff] }
 0x10f   :  { %v4228_v17 = vld [vmem:[%s5460_s4 + $0x48] sm:$0xff] }
 0x110   :  { %v708_v32 = vpack.c.bf16 %v393_v12, %v391_v40 }
 0x113   :  { %v196_v4 = vld [vmem:[%s5515_s26 + $0x128] sm:$0xff] }
 0x114   :  { %463 = vst [vmem:[%s5459_s15 + $0x180] sm:$0xff] %v3954_v51  ;;  %465 = vst [vmem:[%s5459_s15 + $0x190] sm:$0xff] %v3957_v31  ;;  %v260_v48 = vmul.f32 0.99, %v196_v4  ;;  %v716_v4 = vpack.c.bf16 %v3865_v62, %v3862_v21 }
 0x116   :  { %v388_v29 = vadd.f32 %v5550_v44, %v260_v48  ;;  %739 = vmatpush2.bf16.msra.mxu1 %v716_v4  ;;  %v4211_v48 = vld [vmem:[%s5460_s4 + $0xc0] sm:$0xff] }
 0x117   :  { %740 = vmatprep.subr.bf16.mxu1 %v715_v59  ;;  %v4259_v44 = vld [vmem:[%s5460_s4 + $0xa0] sm:$0xff] }
 0x11a   :  { %741 = vmatpush2.bf16.msra.mxu1 %v714_v37 }
 0x11b   :  { %v198_v35 = vld [vmem:[%s5515_s26 + $0x138] sm:$0xff]  ;;  %742 = vmatprep.subr.bf16.mxu1 %v713_v2 }
 0x11c   :  { %460 = vst [vmem:[%s5459_s15 + $0x168] sm:$0xff] %v3981_v53  ;;  %v262_v56 = vmul.f32 0.99, %v198_v35  ;;  %v4144_v35 = vld [vmem:[%s5460_s4 + $0xf8] sm:$0xff] }
 0x11e   :  { %v390_v61 = vadd.f32 %v5551_v10, %v262_v56  ;;  %v1747_v10 = vld [vmem:[%s5460_s4 + $0x28] sm:$0xff] }
 0x120   :  { %v707_v45 = vpack.c.bf16 %v390_v61, %v388_v29 }
 0x123   :  { %v195_v57 = vld [vmem:[%s5515_s26 + $0x120] sm:$0xff]  ;;  %v197_v38 = vld [vmem:[%s5515_s26 + $0x130] sm:$0xff] }
 0x124   :  { %462 = vst [vmem:[%s5459_s15 + $0x178] sm:$0xff] %v3997_v58  ;;  %v259_v19 = vmul.f32 0.99, %v195_v57  ;;  %v261_v18 = vmul.f32 0.99, %v197_v38  ;;  %v1788_v57 = vpack.c.bf16 %v4180_v43, %v4175_v9  ;;  %v4187_v38 = vld [vmem:[%s5460_s4 + $0xd0] sm:$0xff] }
 0x126   :  { %v387_v15 = vadd.f32 %v5552_v5, %v259_v19  ;;  %v389_v14 = vadd.f32 %v5553_v0, %v261_v18  ;;  %v1746_v18 = vld [vmem:[%s5460_s4 + $0x20] sm:$0xff]  ;;  %v1745_v0 = vld [vmem:[%s5460_s4 + $0x18] sm:$0xff] }
 0x12b   :  { %v192_v23 = vld [vmem:[%s5515_s26 + $0x108] sm:$0xff]  ;;  %v194_v3 = vld [vmem:[%s5515_s26 + $0x118] sm:$0xff] }
 0x12c   :  { %459 = vst [vmem:[%s5459_s15 + $0x160] sm:$0xff] %v4007_v27  ;;  %461 = vst [vmem:[%s5459_s15 + $0x170] sm:$0xff] %v4010_v22  ;;  %v256_v46 = vmul.f32 0.99, %v192_v23  ;;  %v258_v36 = vmul.f32 0.99, %v194_v3 }
 0x12d   :  { %v4163_v27 = vld [vmem:[%s5460_s4 + $0xe0] sm:$0xff]  ;;  %v4216_v23 = vld [vmem:[%s5460_s4 + $0xc8] sm:$0xff] }
 0x12e   :  { %v384_v7 = vadd.f32 %v3553_v24, %v256_v46  ;;  %v386_v8 = vadd.f32 %v3627_v49, %v258_v36  ;;  %v2838_v24 = vld [vmem:[%s5506_s30 + $0x20] ss:$8 sps:$4 sm:$0xff]   ;;  %v2839_v49 = vld [vmem:[%s5506_s30 + $0x34] ss:$8 sps:$4 sm:$0xff]   ;;  %v1796_v22 = vpack.c.bf16 %v4168_v26, %v4163_v27  ;;  %v1794_v3 = vpack.c.bf16 %v4216_v23, %v4211_v48 }
 0x12f   :  { %620 = vmatmul.mubr.bf16.gmra.mxu0 %v2838_v24  ;;  %v1760_v46 = vld [vmem:[%s5460_s4 + $0x90] sm:$0xff]  ;;  %v1761_v36 = vld [vmem:[%s5460_s4 + $0x98] sm:$0xff] }
 0x130   :  { %629 = vmatprep.mubr.bf16.mxu0 %v2839_v49  ;;  %v1791_v5 = vpack.c.bf16 %v1761_v36, %v1760_v46 }
 0x133   :  { %v191_v55 = vld [vmem:[%s5515_s26 + $0x100] sm:$0xff]  ;;  %v193_v33 = vld [vmem:[%s5515_s26 + $0x110] sm:$0xff] }
 0x134   :  { %456 = vst [vmem:[%s5459_s15 + $0x148] sm:$0xff] %v4028_v52  ;;  %458 = vst [vmem:[%s5459_s15 + $0x158] sm:$0xff] %v4031_v1  ;;  %v255_v54 = vmul.f32 0.99, %v191_v55  ;;  %v257_v47 = vmul.f32 0.99, %v193_v33 }
 0x135   :  { %455 = vst [vmem:[%s5459_s15 + $0x140] sm:$0xff] %v391_v40  ;;  %457 = vst [vmem:[%s5459_s15 + $0x150] sm:$0xff] %v393_v12  ;;  %v4199_v52 = vld [vmem:[%s5460_s4 + $0x50] sm:$0xff]  ;;  %v1786_v40 = vpack.c.bf16 %v4228_v17, %v4223_v6  ;;  %v4240_v12 = vld [vmem:[%s5460_s4 + $0xb8] sm:$0xff] }
 0x136   :  { %452 = vst [vmem:[%s5459_s15 + $0x128] sm:$0xff] %v388_v29  ;;  %454 = vst [vmem:[%s5459_s15 + $0x138] sm:$0xff] %v390_v61  ;;  %v383_v21 = vadd.f32 %v3922_v39, %v255_v54  ;;  %v385_v62 = vadd.f32 %v3942_v30, %v257_v47  ;;  %v712_v39 = vpack.c.bf16 %v3957_v31, %v3954_v51  ;;  %v4247_v55 = vld [vmem:[%s5460_s4 + $0x30] sm:$0xff]  ;;  %v4252_v33 = vld [vmem:[%s5460_s4 + $0x38] sm:$0xff] }
 0x137   :  { %451 = vst [vmem:[%s5459_s15 + $0x120] sm:$0xff] %v387_v15  ;;  %453 = vst [vmem:[%s5459_s15 + $0x130] sm:$0xff] %v389_v14  ;;  %v711_v30 = vpack.c.bf16 %v3997_v58, %v3981_v53  ;;  %630 = vmatmul.mubr.bf16.gmra.mxu0 %v2841_v34  ;;  %v706_v51 = vpack.c.bf16 %v389_v14, %v387_v15  ;;  %v705_v31 = vpack.c.bf16 %v386_v8, %v384_v7  ;;  %v4139_v58 = vld [vmem:[%s5460_s4 + $0xf0] sm:$0xff]  ;;  %v4264_v29 = vld [vmem:[%s5460_s4 + $0xa8] sm:$0xff] }
 0x138   :  { %448 = vst [vmem:[%s5459_s15 + $0x108] sm:$0xff] %v384_v7  ;;  %450 = vst [vmem:[%s5459_s15 + $0x118] sm:$0xff] %v386_v8  ;;  %743 = vmatpush2.bf16.msra.mxu1 %v712_v39  ;;  %v704_v53 = vpack.c.bf16 %v385_v62, %v383_v21  ;;  %v1787_v1 = vpack.c.bf16 %v4204_v63, %v4199_v52  ;;  %v1793_v56 = vpack.c.bf16 %v4240_v12, %v4235_v41  ;;  %v1744_v15 = vld [vmem:[%s5460_s4 + $0x10] sm:$0xff]  ;;  %v1758_v54 = vld [vmem:[%s5460_s4 + $0x80] sm:$0xff] }
 0x139   :  { %447 = vst [vmem:[%s5459_s15 + $0x100] sm:$0xff] %v383_v21  ;;  %449 = vst [vmem:[%s5459_s15 + $0x110] sm:$0xff] %v385_v62  ;;  %744 = vmatprep.subr.bf16.mxu1 %v711_v30  ;;  %v1785_v50 = vpack.c.bf16 %v4252_v33, %v4247_v55  ;;  %v1792_v19 = vpack.c.bf16 %v4264_v29, %v4259_v44  ;;  %v1784_v61 = vpack.c.bf16 %v1747_v10, %v1746_v18  ;;  %v1759_v47 = vld [vmem:[%s5460_s4 + $0x88] sm:$0xff]  ;;  %v1742_v7 = vld [vmem:[%s5460_s4] sm:$0xff] }
 0x13a   :  { %v1783_v14 = vpack.c.bf16 %v1745_v0, %v1744_v15  ;;  %v1790_v4 = vpack.c.bf16 %v1759_v47, %v1758_v54  ;;  %v1743_v8 = vld [vmem:[%s5460_s4 + $0x8] sm:$0xff]  ;;  %v830_v21 = vld [vmem:[%s5461_s2] sm:$0x3]  ;;  %v962_v47 = vmul.f32 0.01, %v4163_v27 }
 0x13b   :  { %v1782_v59 = vpack.c.bf16 %v1743_v8, %v1742_v7  ;;  %v831_v62 = vmul.f32 0.01, %v830_v21  ;;  %v850_v18 = vld [vmem:[%s5465_s12 + $0x60] sm:$0xff]  ;;  %v851_v15 = vld [vmem:[%s5465_s12 + $0x68] sm:$0xff]  ;;  %v865_v7 = vld [vmem:[%s5465_s12 + $0xd8] sm:$0xff] }
 0x13c   :  { %745 = vmatpush2.bf16.msra.mxu1 %v710_v25  ;;  %v963_v27 = vmul.f32 0.01, %v4168_v26  ;;  %v882_v21 = vmul.f32 0.99, %v850_v18 }
 0x13d   :  { %746 = vmatprep.subr.bf16.mxu1 %v709_v16  ;;  %v1490_v16 = vld [vmem:[%s5461_s2] sm:$0x3] }
 0x140   :  { %747 = vmatpush2.bf16.msra.mxu1 %v708_v32  ;;  %v1491_v32 = vld [vmem:[%s5464_s3] sm:$0x3] }
 0x141   :  { %748 = vmatprep.subr.bf16.mxu1 %v707_v45  ;;  %v964_v45 = vmul.f32 0.01, %v4139_v58 }
 0x144   :  { %749 = vmatpush2.bf16.msra.mxu1 %v706_v51  ;;  %v965_v51 = vmul.f32 0.01, %v4144_v35 }
 0x145   :  { %750 = vmatprep.subr.bf16.mxu1 %v705_v31 }
 0x148   :  { %751 = vmatpush2.bf16.msra.mxu1 %v704_v53  ;;  %v868_v53 = vld [vmem:[%s5465_s12 + $0xf0] sm:$0xff] }
 0x14b   :  { %753 = vmatmul.mubr.bf16.vlgmr.msra.gmra.mxu1 %v3828_v28  ;;  %v1797_v28 = vpack.c.bf16 %v4144_v35, %v4139_v58 }
 0x14c   :  { %762 = vmatprep.mubr.bf16.mxu1 %v3851_v20  ;;  %v4151_v20 = vld [vmem:[%s5460_s4 + $0x70] sm:$0xff] }
 0x14d   :  { %2749 = vmatprep.subr.bf16.mxu1 %v1797_v28  ;;  %v948_v31 = vmul.f32 0.01, %v4151_v20  ;;  %v869_v28 = vld [vmem:[%s5465_s12 + $0xf8] sm:$0xff] }
 0x153   :  { %763 = vmatmul.mubr.bf16.gmra.mxu1 %v3968_v60  ;;  %v4156_v60 = vld [vmem:[%s5460_s4 + $0x78] sm:$0xff] }
 0x154   :  { %772 = vmatprep.mubr.bf16.mxu1 %v4021_v42  ;;  %v1789_v13 = vpack.c.bf16 %v4156_v60, %v4151_v20  ;;  %v4192_v42 = vld [vmem:[%s5460_s4 + $0xd8] sm:$0xff]  ;;  %v900_v20 = vmul.f32 0.99, %v868_v53 }
 0x155   :  { %v1795_v11 = vpack.c.bf16 %v4192_v42, %v4187_v38  ;;  %v961_v18 = vmul.f32 0.01, %v4192_v42 }
 0x156   :  { %2750 = vmatpush3.bf16.msra.mxu1 %v1789_v13  ;;  %v852_v13 = vld [vmem:[%s5465_s12 + $0x70] sm:$0xff] }
 0x157   :  { %2751 = vmatprep.subr.bf16.mxu1 %v1796_v22  ;;  %v949_v22 = vmul.f32 0.01, %v4156_v60 }
 0x15a   :  { %2752 = vmatpush3.bf16.msra.mxu1 %v1788_v57  ;;  %v4339_v57 = vpop.f32.mrf.mxu0 }
 0x15b   :  { %773 = vmatmul.mubr.bf16.gmra.mxu1 %v2838_v24  ;;  %2753 = vmatprep.subr.bf16.mxu1 %v1795_v11  ;;  %v998_v24 = vlaneseq  ;;  %v901_v11 = vmul.f32 0.99, %v869_v28  ;;  %v1512_v0 = vmul.f32 %v4339_v57, %v4339_v57 }
 0x15c   :  { %782 = vmatprep.mubr.bf16.mxu1 %v2839_v49  ;;  %v828_v49 = vld [vmem:[%s5462_s10] sm:$0x3]  ;;  %v4365_v10 = vpop.f32.mrf.mxu0 }
 0x15d   :  { %v829_v37 = vmul.f32 0.99, %v828_v49  ;;  %vm4304_vm0 = vcmp.lt.s32.totalorder %v998_v24, 256  ;;  %v1129_v30 = vshrl.u32 %v998_v24, 7  ;;  %v997_v46 = vadd.f32 %v965_v51, %v901_v11 }
 0x15e   :  { %2754 = vmatpush3.bf16.msra.mxu1 %v1787_v1  ;;  %v853_v1 = vld [vmem:[%s5465_s12 + $0x78] sm:$0xff]  ;;  %v4379_v8 = vpop.f32.mrf.mxu0  ;;  %v1513_v24 = vmul.f32 %v4365_v10, %v4365_v10 }
 0x15f   :  { %2755 = vmatprep.subr.bf16.mxu1 %v1794_v3  ;;  %v4308_v39 = vadd.f32 %v831_v62, %v829_v37  ;;  %v4318_v25 = vsub.s32 1, %v1129_v30  ;;  %v866_v3 = vld [vmem:[%s5465_s12 + $0xe0] sm:$0xff]  ;;  %v883_v62 = vmul.f32 0.99, %v851_v15  ;;  %v1514_v49 = vmul.f32 %v4379_v8, %v4379_v8 }
 0x160   :  { %v898_v36 = vmul.f32 0.99, %v866_v3  ;;  %v960_v3 = vmul.f32 0.01, %v4187_v38 }
 0x161   :  { %1002 = vst.msk [vmem:[%s5463_s16] sm:$0x3] %vm4304_vm0, %v4308_v39  ;;  %v4345_v35 = vrot.slane %v1490_v16, %v4318_v25  ;;  %v1520_v53 = vadd.f32 %v1514_v49, %v1512_v0 }
 0x162   :  { %2756 = vmatpush3.bf16.msra.mxu1 %v1786_v40  ;;  %v4357_v40 = vrot.slane %v1491_v32, %v4318_v25 }
 0x163   :  { %783 = vmatmul.mubr.bf16.gmra.mxu1 %v2841_v34  ;;  %2757 = vmatprep.subr.bf16.mxu1 %v1793_v56  ;;  %v4316_v34 = vsub.s32 0, %v1129_v30  ;;  %v884_v56 = vmul.f32 0.99, %v852_v13  ;;  %v994_v30 = vadd.f32 %v962_v47, %v898_v36  ;;  %v897_v13 = vmul.f32 0.99, %v865_v7 }
 0x165   :  { %v4342_v58 = vrot.slane %v1490_v16, %v4316_v34  ;;  %v4354_v60 = vrot.slane %v1491_v32, %v4316_v34  ;;  %v4398_v16 = vpop.f32.mrf.mxu0  ;;  %v946_v32 = vmul.f32 0.01, %v4175_v9 }
 0x166   :  { %2758 = vmatpush3.bf16.msra.mxu1 %v1785_v50  ;;  %v885_v50 = vmul.f32 0.99, %v853_v1  ;;  %v1515_v28 = vmul.f32 %v4398_v16, %v4398_v16 }
 0x167   :  { %2759 = vmatprep.subr.bf16.mxu1 %v1792_v19  ;;  %v867_v19 = vld [vmem:[%s5465_s12 + $0xe8] sm:$0xff]  ;;  %v978_v11 = vadd.f32 %v946_v32, %v882_v21 }
 0x168   :  { %v981_v54 = vadd.f32 %v949_v22, %v885_v50  ;;  %v1529_v50 = vadd.f32 %v1515_v28, %v1513_v24 }
 0x16a   :  { %2760 = vmatpush3.bf16.msra.mxu1 %v1784_v61  ;;  %v996_v61 = vadd.f32 %v964_v45, %v900_v20  ;;  %v947_v45 = vmul.f32 0.01, %v4180_v43 }
 0x16b   :  { %2761 = vmatprep.subr.bf16.mxu1 %v1791_v5  ;;  %v899_v5 = vmul.f32 0.99, %v867_v19 }
 0x16c   :  { %v979_v1 = vadd.f32 %v947_v45, %v883_v62  ;;  %v958_v45 = vmul.f32 0.01, %v4211_v48 }
 0x16d   :  { %v995_v26 = vadd.f32 %v963_v27, %v899_v5  ;;  %v945_v27 = vmul.f32 0.01, %v4204_v63 }
 0x16e   :  { %2762 = vmatpush3.bf16.msra.mxu1 %v1783_v14  ;;  %v980_v14 = vadd.f32 %v948_v31, %v884_v56  ;;  %v1492_v31 = vadd.f32 %v4379_v8, %v4339_v57  ;;  %v1501_v56 = vadd.f32 %v4398_v16, %v4365_v10  ;;  %v1317_v38 = vpack.c.bf16 %v979_v1, %v978_v11 }
 0x16f   :  { %2763 = vmatprep.subr.bf16.mxu1 %v1790_v4  ;;  %v864_v4 = vld [vmem:[%s5465_s12 + $0xd0] sm:$0xff]  ;;  %v1325_v20 = vpack.c.bf16 %v995_v26, %v994_v30 }
 0x170   :  { %1034 = vst [vmem:[%s5466_s18 + $0xf0] sm:$0xff] %v996_v61  ;;  %1035 = vst [vmem:[%s5466_s18 + $0xf8] sm:$0xff] %v997_v46  ;;  %v1318_v37 = vpack.c.bf16 %v981_v54, %v980_v14  ;;  %v896_v51 = vmul.f32 0.99, %v864_v4 }
 0x171   :  { %1018 = vst [vmem:[%s5466_s18 + $0x70] sm:$0xff] %v980_v14  ;;  %1019 = vst [vmem:[%s5466_s18 + $0x78] sm:$0xff] %v981_v54  ;;  %v993_v54 = vadd.f32 %v961_v18, %v897_v13  ;;  %v835_v13 = vld [vmem:[%s5464_s3] sm:$0x3] }
 0x172   :  { %2764 = vmatpush3.bf16.msra.mxu1 %v1782_v59  ;;  %v1326_v59 = vpack.c.bf16 %v997_v46, %v996_v61  ;;  %1032 = vst [vmem:[%s5466_s18 + $0xe0] sm:$0xff] %v994_v30  ;;  %v992_v36 = vadd.f32 %v960_v3, %v896_v51 }
 0x174   :  { %2709 = vmatprep.subr.bf16.mxu0 %v1326_v59  ;;  %v944_v59 = vmul.f32 0.01, %v4199_v52 }
 0x175   :  { %2710 = vmatpush3.bf16.msra.mxu0 %v1318_v37  ;;  %v1324_v37 = vpack.c.bf16 %v993_v54, %v992_v36 }
 0x176   :  { %2711 = vmatprep.subr.bf16.mxu0 %v1325_v20  ;;  %v959_v20 = vmul.f32 0.01, %v4216_v23 }
 0x179   :  { %v848_v9 = vld [vmem:[%s5465_s12 + $0x50] sm:$0xff]  ;;  %v849_v43 = vld [vmem:[%s5465_s12 + $0x58] sm:$0xff]  ;;  %2712 = vmatpush3.bf16.msra.mxu0 %v1317_v38 }
 0x17a   :  { %1033 = vst [vmem:[%s5466_s18 + $0xe8] sm:$0xff] %v995_v26  ;;  %v880_v5 = vmul.f32 0.99, %v848_v9  ;;  %v881_v15 = vmul.f32 0.99, %v849_v43  ;;  %2713 = vmatprep.subr.bf16.mxu0 %v1324_v37 }
 0x17c   :  { %v976_v52 = vadd.f32 %v944_v59, %v880_v5  ;;  %v977_v63 = vadd.f32 %v945_v27, %v881_v15  ;;  %v942_v5 = vmul.f32 0.01, %v4223_v6 }
 0x17e   :  { %v1316_v48 = vpack.c.bf16 %v977_v63, %v976_v52 }
 0x17f   :  { %v4415_v22 = vpop.f32.mrf.mxu0 }
 0x180   :  { %v1516_v19 = vmul.f32 %v4415_v22, %v4415_v22  ;;  %v1493_v42 = vadd.f32 %v1492_v31, %v4415_v22  ;;  %2714 = vmatpush3.bf16.msra.mxu0 %v1316_v48 }
 0x181   :  { %v862_v61 = vld [vmem:[%s5465_s12 + $0xc0] sm:$0xff]  ;;  %v4429_v46 = vpop.f32.mrf.mxu0 }
 0x182   :  { %1016 = vst [vmem:[%s5466_s18 + $0x60] sm:$0xff] %v978_v11  ;;  %1017 = vst [vmem:[%s5466_s18 + $0x68] sm:$0xff] %v979_v1  ;;  %v1521_v0 = vadd.f32 %v1520_v53, %v1516_v19  ;;  %v1517_v14 = vmul.f32 %v4429_v46, %v4429_v46  ;;  %v1502_v4 = vadd.f32 %v1501_v56, %v4429_v46  ;;  %v894_v21 = vmul.f32 0.99, %v862_v61 }
 0x183   :  { %v4444_v7 = vpop.f32.mrf.mxu0  ;;  %v4483_v61 = vmul.f32 0.01, %v835_v13 }
 0x184   :  { %v1530_v62 = vadd.f32 %v1529_v50, %v1517_v14  ;;  %v1494_v24 = vadd.f32 %v1493_v42, %v4444_v7  ;;  %v1518_v49 = vmul.f32 %v4444_v7, %v4444_v7  ;;  %v990_v11 = vadd.f32 %v958_v45, %v894_v21 }
 0x185   :  { %v4460_v26 = vpop.f32.mrf.mxu0 }
 0x186   :  { %v1495_v51 = vrot.slane %v1494_v24, 4  ;;  %v1522_v31 = vadd.f32 %v1521_v0, %v1518_v49  ;;  %v1503_v53 = vadd.f32 %v1502_v4, %v4460_v26  ;;  %v1519_v28 = vmul.f32 %v4460_v26, %v4460_v26 }
 0x187   :  { %v943_v4 = vmul.f32 0.01, %v4228_v17 }
 0x188   :  { %v1496_v3 = vadd.f32 %v1495_v51, %v1494_v24  ;;  %v1523_v56 = vrot.slane %v1522_v31, 4  ;;  %v1504_v50 = vrot.slane %v1503_v53, 4  ;;  %v1531_v19 = vadd.f32 %v1530_v62, %v1519_v28 }
 0x189   :  { %v863_v47 = vld [vmem:[%s5465_s12 + $0xc8] sm:$0xff] }
 0x18a   :  { %1030 = vst [vmem:[%s5466_s18 + $0xd0] sm:$0xff] %v992_v36  ;;  %1031 = vst [vmem:[%s5466_s18 + $0xd8] sm:$0xff] %v993_v54  ;;  %v895_v32 = vmul.f32 0.99, %v863_v47  ;;  %v1497_v23 = vrot.slane %v1496_v3, 2  ;;  %v1524_v15 = vadd.f32 %v1523_v56, %v1522_v31  ;;  %v1505_v42 = vadd.f32 %v1504_v50, %v1503_v53 }
 0x18b   :  { %v1532_v0 = vrot.slane %v1531_v19, 4  ;;  %v4493_v54 = vrot.slane %v4308_v39, %v4316_v34 }
 0x18c   :  { %v991_v38 = vadd.f32 %v959_v20, %v895_v32  ;;  %v1498_v27 = vadd.f32 %v1497_v23, %v1496_v3  ;;  %v1525_v6 = vrot.slane %v1524_v15, 2  ;;  %v1506_v21 = vrot.slane %v1505_v42, 2 }
 0x18d   :  { %v1533_v62 = vadd.f32 %v1532_v0, %v1531_v19 }
 0x18e   :  { %v1323_v47 = vpack.c.bf16 %v991_v38, %v990_v11  ;;  %v1526_v32 = vadd.f32 %v1525_v6, %v1524_v15  ;;  %v1507_v45 = vadd.f32 %v1506_v21, %v1505_v42 }
 0x18f   :  { %v1534_v51 = vrot.slane %v1533_v62, 2 }
 0x190   :  { %2715 = vmatprep.subr.bf16.mxu0 %v1323_v47  ;;  %v1527_v20 = vrot.slane %v1526_v32, 1 }
 0x191   :  { %v846_v30 = vld [vmem:[%s5465_s12 + $0x40] sm:$0xff]  ;;  %v847_v9 = vld [vmem:[%s5465_s12 + $0x48] sm:$0xff] }
 0x192   :  { %1014 = vst [vmem:[%s5466_s18 + $0x50] sm:$0xff] %v976_v52  ;;  %1015 = vst [vmem:[%s5466_s18 + $0x58] sm:$0xff] %v977_v63  ;;  %v878_v1 = vmul.f32 0.99, %v846_v30  ;;  %v879_v36 = vmul.f32 0.99, %v847_v9  ;;  %v1528_v23 = vadd.f32 %v1527_v20, %v1526_v32 }
 0x193   :  { %1028 = vst [vmem:[%s5466_s18 + $0xc0] sm:$0xff] %v990_v11  ;;  %1029 = vst [vmem:[%s5466_s18 + $0xc8] sm:$0xff] %v991_v38  ;;  %v1499_v63 = vrot.slane %v1498_v27, 1  ;;  %v1508_v11 = vrot.slane %v1507_v45, 1 }
 0x194   :  { %v974_v59 = vadd.f32 %v942_v5, %v878_v1  ;;  %v975_v17 = vadd.f32 %v943_v4, %v879_v36  ;;  %v1535_v1 = vadd.f32 %v1534_v51, %v1533_v62  ;;  %v1538_v6 = vmul.f32 0.03125, %v1528_v23 }
 0x195   :  { %v1500_v48 = vadd.f32 %v1499_v63, %v1498_v27  ;;  %v1509_v15 = vadd.f32 %v1508_v11, %v1507_v45  ;;  %v956_v63 = vmul.f32 0.01, %v4235_v41 }
 0x196   :  { %v1315_v13 = vpack.c.bf16 %v975_v17, %v974_v59  ;;  %v1536_v42 = vrot.slane %v1535_v1, 1 }
 0x197   :  { %v4533_v5 = vmul.f32 0.03125, %v1500_v48  ;;  %v4542_v62 = vmul.f32 0.03125, %v1509_v15 }
 0x198   :  { %2716 = vmatpush3.bf16.msra.mxu0 %v1315_v13 }
 0x199   :  { %v1540_v21 = vmul.f32 %v4533_v5, %v4533_v5  ;;  %v1541_v45 = vmul.f32 %v4542_v62, %v4542_v62  ;;  %v1553_v41 = vsub.f32 %v4460_v26, %v4542_v62 }
 0x19a   :  { %v860_v24 = vld [vmem:[%s5465_s12 + $0xb0] sm:$0xff] }
 0x19b   :  { %1012 = vst [vmem:[%s5466_s18 + $0x40] sm:$0xff] %v974_v59  ;;  %1013 = vst [vmem:[%s5466_s18 + $0x48] sm:$0xff] %v975_v17  ;;  %v4522_v9 = vmul.f32 0.99, %v860_v24  ;;  %v1542_v32 = vsub.f32 %v1538_v6, %v1540_v21 }
 0x19d   :  { %v1544_v11 = vmax.f32 %v1542_v32, 0.0 }
 0x19f   :  { %v1554_v23 = vadd.f32 1e-05, %v1544_v11 }
 0x1a1   :  { %2882 = vrsqrt.f32 %v1554_v23 }
 0x1a2   :  { %v861_v3 = vld [vmem:[%s5465_s12 + $0xb8] sm:$0xff] }
 0x1a3   :  { %v893_v27 = vmul.f32 0.99, %v861_v3 }
 0x1ef   :  { %v4472_v43 = vpop.f32.mrf.mxu0 }
 0x1f0   :  { %v1632_v49 = vmul.f32 %v4472_v43, %v4472_v43 }
 0x1f1   :  { %v4481_v18 = vpop.f32.mrf.mxu0 }
 0x1f2   :  { %v1633_v37 = vmul.f32 %v4481_v18, %v4481_v18 }
 0x1f3   :  { %v4489_v14 = vpop.f32.mrf.mxu0 }
 0x1f4   :  { %v1634_v30 = vmul.f32 %v4489_v14, %v4489_v14  ;;  %v1612_v31 = vadd.f32 %v4489_v14, %v4472_v43 }
 0x1f5   :  { %v4508_v52 = vpop.f32.mrf.mxu0 }
 0x1f6   :  { %v1635_v53 = vmul.f32 %v4508_v52, %v4508_v52  ;;  %v1640_v56 = vadd.f32 %v1634_v30, %v1632_v49  ;;  %v1621_v50 = vadd.f32 %v4508_v52, %v4481_v18  ;;  %v1537_v49 = vadd.f32 %v1536_v42, %v1535_v1 }
 0x1f7   :  { %v4517_v28 = vpop.f32.mrf.mxu0  ;;  %v1552_v1 = vsub.f32 %v4444_v7, %v4533_v5  ;;  %v1547_v42 = vsub.f32 %v4365_v10, %v4542_v62 }
 0x1f8   :  { %v1649_v19 = vadd.f32 %v1635_v53, %v1633_v37  ;;  %v1636_v38 = vmul.f32 %v4517_v28, %v4517_v28  ;;  %v1613_v0 = vadd.f32 %v1612_v31, %v4517_v28  ;;  %v1539_v53 = vmul.f32 0.03125, %v1537_v49 }
 0x1f9   :  { %v4531_v36 = vpop.f32.mrf.mxu0 }
 0x1fa   :  { %v1641_v47 = vadd.f32 %v1640_v56, %v1636_v38  ;;  %v1637_v4 = vmul.f32 %v4531_v36, %v4531_v36  ;;  %v1622_v24 = vadd.f32 %v1621_v50, %v4531_v36  ;;  %v1543_v56 = vsub.f32 %v1539_v53, %v1541_v45  ;;  %v845_v53 = vld [vmem:[%s5465_s12 + $0x38] sm:$0xff] }
 0x1fb   :  { %v4538_v59 = vpop.f32.mrf.mxu0 }
 0x1fc   :  { %v1614_v37 = vadd.f32 %v1613_v0, %v4538_v59  ;;  %v1638_v30 = vmul.f32 %v4538_v59, %v4538_v59  ;;  %v1650_v51 = vadd.f32 %v1649_v19, %v1637_v4 }
 0x1fd   :  { %v4548_v17 = vpop.f32.mrf.mxu0 }
 0x1fe   :  { %v1623_v31 = vadd.f32 %v1622_v24, %v4548_v17  ;;  %v1615_v13 = vrot.slane %v1614_v37, 4  ;;  %v1642_v48 = vadd.f32 %v1641_v47, %v1638_v30  ;;  %v1639_v20 = vmul.f32 %v4548_v17, %v4548_v17  ;;  %v844_v24 = vld [vmem:[%s5465_s12 + $0x30] sm:$0xff] }
 0x1ff   :  { %v1545_v47 = vmax.f32 %v1543_v56, 0.0  ;;  %v1548_v30 = vsub.f32 %v4379_v8, %v4533_v5  ;;  %v876_v11 = vmul.f32 0.99, %v844_v24 }
 0x200   :  { %v1624_v3 = vrot.slane %v1623_v31, 4  ;;  %v1616_v50 = vadd.f32 %v1615_v13, %v1614_v37  ;;  %v1643_v38 = vrot.slane %v1642_v48, 4  ;;  %v1651_v19 = vadd.f32 %v1650_v51, %v1639_v20 }
 0x201   :  { %v1546_v37 = vsub.f32 %v4339_v57, %v4533_v5  ;;  %v1555_v32 = vadd.f32 1e-05, %v1545_v47  ;;  %v988_v20 = vadd.f32 %v956_v63, %v4522_v9  ;;  %v1551_v9 = vsub.f32 %v4429_v46, %v4542_v62 }
 0x202   :  { %v1625_v15 = vadd.f32 %v1624_v3, %v1623_v31  ;;  %v1617_v4 = vrot.slane %v1616_v50, 2  ;;  %v1644_v6 = vadd.f32 %v1643_v38, %v1642_v48  ;;  %v1652_v21 = vrot.slane %v1651_v19, 4 }
 0x203   :  { %v957_v48 = vmul.f32 0.01, %v4240_v12  ;;  %2884 = vrsqrt.f32 %v1555_v32  ;;  %1026 = vst [vmem:[%s5466_s18 + $0xb0] sm:$0xff] %v988_v20 }
 0x204   :  { %v1626_v49 = vrot.slane %v1625_v15, 2  ;;  %v1618_v45 = vadd.f32 %v1617_v4, %v1616_v50  ;;  %v1645_v51 = vrot.slane %v1644_v6, 2  ;;  %v1653_v31 = vadd.f32 %v1652_v21, %v1651_v19 }
 0x205   :  { %v989_v50 = vadd.f32 %v957_v48, %v893_v27  ;;  %v877_v19 = vmul.f32 0.99, %v845_v53  ;;  %v941_v21 = vmul.f32 0.01, %v4252_v33 }
 0x206   :  { %v1627_v13 = vadd.f32 %v1626_v49, %v1625_v15  ;;  %v1619_v3 = vrot.slane %v1618_v45, 1  ;;  %v1646_v56 = vadd.f32 %v1645_v51, %v1644_v6  ;;  %v1654_v38 = vrot.slane %v1653_v31, 2 }
 0x207   :  { %v940_v15 = vmul.f32 0.01, %v4247_v55  ;;  %1027 = vst [vmem:[%s5466_s18 + $0xb8] sm:$0xff] %v989_v50  ;;  %v1322_v27 = vpack.c.bf16 %v989_v50, %v988_v20  ;;  %v1550_v51 = vsub.f32 %v4415_v22, %v4533_v5  ;;  %v4607_v48 = vadd.f32 %v941_v21, %v877_v19 }
 0x208   :  { %v1628_v23 = vrot.slane %v1627_v13, 1  ;;  %v1620_v47 = vadd.f32 %v1619_v3, %v1618_v45  ;;  %v1647_v12 = vrot.slane %v1646_v56, 1  ;;  %v1655_v4 = vadd.f32 %v1654_v38, %v1653_v31 }
 0x209   :  { %v4590_v24 = vadd.f32 %v940_v15, %v876_v11  ;;  %2717 = vmatprep.subr.bf16.mxu0 %v1322_v27 }
 0x20a   :  { %v1629_v63 = vadd.f32 %v1628_v23, %v1627_v13  ;;  %v4595_v49 = vmul.f32 0.03125, %v1620_v47  ;;  %v1648_v32 = vadd.f32 %v1647_v12, %v1646_v56  ;;  %v1656_v45 = vrot.slane %v1655_v4, 1 }
 0x20b   :  { %v4576_v0 = vpop.f32.mrf.mxu1 }
 0x20c   :  { %v4599_v31 = vmul.f32 0.03125, %v1629_v63  ;;  %v1073_v53 = vmul.f32 %v4576_v0, %v4576_v0  ;;  %v1658_v20 = vmul.f32 0.03125, %v1648_v32  ;;  %v1660_v22 = vmul.f32 %v4595_v49, %v4595_v49 }
 0x20d   :  { %v4584_v6 = vpop.f32.mrf.mxu1  ;;  %v1657_v11 = vadd.f32 %v1656_v45, %v1655_v4  ;;  %v2883_v45 = vpop.eup %2882 }
 0x20e   :  { %v858_v55 = vld [vmem:[%s5465_s12 + $0xa0] sm:$0xff]  ;;  %v1074_v33 = vmul.f32 %v4584_v6, %v4584_v6  ;;  %v1661_v38 = vmul.f32 %v4599_v31, %v4599_v31  ;;  %v1662_v15 = vsub.f32 %v1658_v20, %v1660_v22  ;;  %v1564_v27 = vmul.f32 %v2883_v45, %v1552_v1 }
 0x20f   :  { %v4605_v13 = vpop.f32.mrf.mxu1  ;;  %1010 = vst [vmem:[%s5466_s18 + $0x30] sm:$0xff] %v4590_v24  ;;  %v4615_v3 = vmul.f32 0.99, %v858_v55  ;;  %1011 = vst [vmem:[%s5466_s18 + $0x38] sm:$0xff] %v4607_v48  ;;  %v1659_v47 = vmul.f32 0.03125, %v1657_v11  ;;  %v1558_v50 = vmul.f32 %v2883_v45, %v1546_v37  ;;  %v1560_v23 = vmul.f32 %v2883_v45, %v1548_v30 }
 0x210   :  { %v1075_v55 = vmul.f32 %v4605_v13, %v4605_v13  ;;  %v1664_v20 = vmax.f32 %v1662_v15, 0.0  ;;  %v1052_v11 = vadd.f32 %v4605_v13, %v4576_v0  ;;  %v1562_v15 = vmul.f32 %v2883_v45, %v1550_v51  ;;  %v2885_v56 = vpop.eup %2884 }
 0x211   :  { %v4625_v19 = vpop.f32.mrf.mxu1  ;;  %v1663_v22 = vsub.f32 %v1659_v47, %v1661_v38  ;;  %v1583_v7 = vmul.f32 %v4342_v58, %v1564_v27  ;;  %v1577_v1 = vmul.f32 %v4342_v58, %v1558_v50  ;;  %v1579_v57 = vmul.f32 %v4342_v58, %v1560_v23 }
 0x212   :  { %v1061_v12 = vadd.f32 %v4625_v19, %v4584_v6  ;;  %v1674_v47 = vadd.f32 1e-05, %v1664_v20  ;;  %v1081_v63 = vadd.f32 %v1075_v55, %v1073_v53  ;;  %v1076_v4 = vmul.f32 %v4625_v19, %v4625_v19 }
 0x213   :  { %v4643_v32 = vpop.f32.mrf.mxu1  ;;  %v1665_v21 = vmax.f32 %v1663_v22, 0.0  ;;  %v1581_v37 = vmul.f32 %v4342_v58, %v1562_v15  ;;  %v1565_v5 = vmul.f32 %v2885_v56, %v1553_v41  ;;  %v1559_v51 = vmul.f32 %v2885_v56, %v1547_v42 }
 0x214   :  { %2886 = vrsqrt.f32 %v1674_v47  ;;  %v5556_v53 = vsub.f32 %v4398_v16, %v4542_v62  ;;  %v1596_v23 = vadd.f32 %v4354_v60, %v1577_v1  ;;  %v1598_v27 = vadd.f32 %v4354_v60, %v1579_v57 }
 0x215   :  { %v4658_v38 = vpop.f32.mrf.mxu1  ;;  %v1675_v30 = vadd.f32 1e-05, %v1665_v21  ;;  %v1563_v55 = vmul.f32 %v2885_v56, %v1551_v9  ;;  %v1584_v41 = vmul.f32 %v4345_v35, %v1565_v5  ;;  %v1578_v10 = vmul.f32 %v4345_v35, %v1559_v51 }
 0x216   :  { %v1561_v50 = vmul.f32 %v2885_v56, %v5556_v53  ;;  %v1600_v42 = vadd.f32 %v4354_v60, %v1581_v37  ;;  %v1604_v21 = vmax.f32 %v1596_v23, 0.0  ;;  %v1090_v20 = vadd.f32 %v1076_v4, %v1074_v33 }
 0x217   :  { %v4666_v8 = vpop.f32.mrf.mxu1  ;;  %2888 = vrsqrt.f32 %v1675_v30  ;;  %v1582_v45 = vmul.f32 %v4345_v35, %v1563_v55  ;;  %v1597_v46 = vadd.f32 %v4357_v40, %v1578_v10  ;;  %v1606_v62 = vmax.f32 %v1598_v27, 0.0 }
 0x218   :  { %v1580_v16 = vmul.f32 %v4345_v35, %v1561_v50  ;;  %v1603_v9 = vadd.f32 %v4357_v40, %v1584_v41  ;;  %v1602_v56 = vadd.f32 %v4354_v60, %v1583_v7  ;;  %v1608_v1 = vmax.f32 %v1600_v42, 0.0 }
 0x219   :  { %v4682_v26 = vpop.f32.mrf.mxu1  ;;  %v1601_v47 = vadd.f32 %v4357_v40, %v1582_v45  ;;  %v1053_v57 = vadd.f32 %v1052_v11, %v4643_v32  ;;  %v1605_v5 = vmax.f32 %v1597_v46, 0.0  ;;  %v1077_v30 = vmul.f32 %v4643_v32, %v4643_v32 }
 0x21a   :  { %v1599_v15 = vadd.f32 %v4357_v40, %v1580_v16  ;;  %v1611_v33 = vmax.f32 %v1603_v9, 0.0  ;;  %v1610_v4 = vmax.f32 %v1602_v56, 0.0  ;;  %v1062_v50 = vadd.f32 %v1061_v12, %v4658_v38 }
 0x21b   :  { %v4689_v22 = vpop.f32.mrf.mxu1  ;;  %v1609_v53 = vmax.f32 %v1601_v47, 0.0  ;;  %v1078_v7 = vmul.f32 %v4658_v38, %v4658_v38  ;;  %v1774_v27 = vpack.c.bf16 %v1606_v62, %v1604_v21  ;;  %v1082_v55 = vadd.f32 %v1081_v63, %v1077_v30 }
 0x21c   :  { %v1607_v51 = vmax.f32 %v1599_v15, 0.0  ;;  %v1054_v11 = vadd.f32 %v1053_v57, %v4666_v8  ;;  %v1079_v41 = vmul.f32 %v4666_v8, %v4666_v8  ;;  %v1776_v42 = vpack.c.bf16 %v1610_v4, %v1608_v1 }
 0x21d   :  { %v4697_v37 = vpop.f32.mrf.mxu1  ;;  %v1091_v16 = vadd.f32 %v1090_v20, %v1078_v7  ;;  %v1063_v45 = vadd.f32 %v1062_v50, %v4682_v26  ;;  %v1080_v12 = vmul.f32 %v4682_v26, %v4682_v26  ;;  %v1193_v56 = vmul.f32 %v4689_v22, %v4689_v22 }
 0x21e   :  { %v1775_v10 = vpack.c.bf16 %v1607_v51, %v1605_v5  ;;  %v1055_v46 = vrot.slane %v1054_v11, 4  ;;  %v1083_v9 = vadd.f32 %v1082_v55, %v1079_v41  ;;  %v1777_v63 = vpack.c.bf16 %v1611_v33, %v1609_v53 }
 0x21f   :  { %v4704_v23 = vpop.f32.mrf.mxu1  ;;  %v1064_v62 = vrot.slane %v1063_v45, 4  ;;  %v1092_v57 = vadd.f32 %v1091_v16, %v1080_v12  ;;  %v1194_v5 = vmul.f32 %v4697_v37, %v4697_v37  ;;  %v5557_v50 = vsub.f32 %v4538_v59, %v4595_v49 }
 0x220   :  { %1830 = vmatprep.mubr.bf16.mxu1 %v1775_v10  ;;  %v1173_v15 = vadd.f32 %v4704_v23, %v4689_v22  ;;  %v1195_v20 = vmul.f32 %v4704_v23, %v4704_v23  ;;  %v1056_v47 = vadd.f32 %v1055_v46, %v1054_v11  ;;  %v1084_v1 = vrot.slane %v1083_v9, 4 }
 0x221   :  { %v4714_v21 = vpop.f32.mrf.mxu1  ;;  %1831 = vmatmul.mubr.bf16.vlgmr.msra.gmra.mxu1 %v1774_v27  ;;  %v2887_v4 = vpop.eup %2886  ;;  %v1065_v30 = vadd.f32 %v1064_v62, %v1063_v45  ;;  %v5558_v27 = vsub.f32 %v4472_v43, %v4595_v49  ;;  %v5559_v11 = vsub.f32 %v4489_v14, %v4595_v49  ;;  %v5560_v10 = vsub.f32 %v4517_v28, %v4595_v49 }
 0x222   :  { %1838 = vmatprep.mubr.bf16.mxu1 %v1777_v63  ;;  %v4722_v51 = vadd.f32 %v1195_v20, %v1193_v56  ;;  %v1182_v33 = vadd.f32 %v4714_v21, %v4697_v37  ;;  %v1196_v53 = vmul.f32 %v4714_v21, %v4714_v21  ;;  %v1684_v7 = vmul.f32 %v2887_v4, %v5557_v50 }
 0x223   :  { %v1678_v55 = vmul.f32 %v2887_v4, %v5558_v27  ;;  %v1680_v41 = vmul.f32 %v2887_v4, %v5559_v11  ;;  %v1682_v16 = vmul.f32 %v2887_v4, %v5560_v10  ;;  %v4740_v45 = vpop.f32.mrf.mxu1  ;;  %v1057_v12 = vrot.slane %v1056_v47, 2 }
 0x224   :  { %v2889_v46 = vpop.eup %2888  ;;  %v1085_v56 = vadd.f32 %v1084_v1, %v1083_v9  ;;  %v1066_v63 = vrot.slane %v1065_v30, 2  ;;  %v1174_v59 = vadd.f32 %v1173_v15, %v4740_v45  ;;  %v1692_v62 = vmul.f32 %v1684_v7, %v4342_v58 }
 0x225   :  { %v5561_v43 = vsub.f32 %v4548_v17, %v4599_v31  ;;  %v5562_v14 = vsub.f32 %v4481_v18, %v4599_v31  ;;  %v5563_v28 = vsub.f32 %v4508_v52, %v4599_v31  ;;  %v1686_v4 = vmul.f32 %v1678_v55, %v4342_v58  ;;  %v4763_v52 = vpop.f32.mrf.mxu1 }
 0x226   :  { %v1688_v9 = vmul.f32 %v1680_v41, %v4342_v58  ;;  %v5564_v15 = vsub.f32 %v4531_v36, %v4599_v31  ;;  %v1690_v7 = vmul.f32 %v1682_v16, %v4342_v58  ;;  %v1700_v11 = vadd.f32 %v1692_v62, %v4354_v60 }
 0x227   :  { %v1685_v20 = vmul.f32 %v2889_v46, %v5561_v43  ;;  %v1679_v50 = vmul.f32 %v2889_v46, %v5562_v14  ;;  %v1681_v49 = vmul.f32 %v2889_v46, %v5563_v28  ;;  %v1694_v55 = vadd.f32 %v1686_v4, %v4354_v60 }
 0x228   :  { %v1683_v1 = vmul.f32 %v2889_v46, %v5564_v15  ;;  %v1696_v41 = vadd.f32 %v1688_v9, %v4354_v60  ;;  %v1698_v36 = vadd.f32 %v1690_v7, %v4354_v60  ;;  %v1093_v46 = vrot.slane %v1092_v57, 4 }
 0x229   :  { %v1693_v17 = vmul.f32 %v1685_v20, %v4345_v35  ;;  %v1687_v27 = vmul.f32 %v1679_v50, %v4345_v35  ;;  %v1689_v18 = vmul.f32 %v1681_v49, %v4345_v35  ;;  %1839 = vmatmul.mubr.bf16.gmra.mxu1 %v1776_v42  ;;  %v1702_v43 = vmax.f32 %v1694_v55, 0.0 }
 0x22a   :  { %v1691_v10 = vmul.f32 %v1683_v1, %v4345_v35  ;;  %v1704_v62 = vmax.f32 %v1696_v41, 0.0  ;;  %v1708_v14 = vmax.f32 %v1700_v11, 0.0  ;;  %v1058_v4 = vadd.f32 %v1057_v12, %v1056_v47  ;;  %v4773_v35 = vpop.f32.mrf.mxu1 }
 0x22b   :  { %v1695_v58 = vadd.f32 %v1687_v27, %v4357_v40  ;;  %v1697_v31 = vadd.f32 %v1689_v18, %v4357_v40  ;;  %v1701_v16 = vadd.f32 %v1693_v17, %v4357_v40  ;;  %v1706_v9 = vmax.f32 %v1698_v36, 0.0  ;;  %v859_v36 = vld [vmem:[%s5465_s12 + $0xa8] sm:$0xff] }
 0x22c   :  { %v1699_v20 = vadd.f32 %v1691_v10, %v4357_v40  ;;  %v1778_v60 = vpack.c.bf16 %v1704_v62, %v1702_v43  ;;  %v1086_v15 = vrot.slane %v1085_v56, 2  ;;  %v1059_v7 = vrot.slane %v1058_v4, 1 }
 0x22d   :  { %v1703_v50 = vmax.f32 %v1695_v58, 0.0  ;;  %v1705_v28 = vmax.f32 %v1697_v31, 0.0  ;;  %v1709_v49 = vmax.f32 %v1701_v16, 0.0  ;;  %v1067_v27 = vadd.f32 %v1066_v63, %v1065_v30  ;;  %v4778_v58 = vpop.f32.mrf.mxu1 }
 0x22e   :  { %v1707_v42 = vmax.f32 %v1699_v20, 0.0  ;;  %v1094_v17 = vadd.f32 %v1093_v46, %v1092_v57  ;;  %v1087_v55 = vadd.f32 %v1086_v15, %v1085_v56  ;;  %v1210_v41 = vadd.f32 %v1196_v53, %v1194_v5 }
 0x22f   :  { %v1779_v1 = vpack.c.bf16 %v1705_v28, %v1703_v50  ;;  %v1197_v40 = vmul.f32 %v4740_v45, %v4740_v45  ;;  %v1060_v11 = vadd.f32 %v1059_v7, %v1058_v4  ;;  %v1068_v10 = vrot.slane %v1067_v27, 1 }
 0x230   :  { %v1781_v18 = vpack.c.bf16 %v1709_v49, %v1707_v42  ;;  %v1095_v47 = vrot.slane %v1094_v17, 2  ;;  %v1183_v12 = vadd.f32 %v1182_v33, %v4763_v52  ;;  %v1088_v30 = vrot.slane %v1087_v55, 1 }
 0x231   :  { %1846 = vmatprep.mubr.bf16.mxu1 %v1779_v1  ;;  %v1202_v57 = vadd.f32 %v4722_v51, %v1197_v40  ;;  %v1198_v5 = vmul.f32 %v4763_v52, %v4763_v52  ;;  %v1175_v53 = vadd.f32 %v1174_v59, %v4773_v35  ;;  %v4787_v56 = vmul.f32 0.03125, %v1060_v11 }
 0x232   :  { %1847 = vmatmul.mubr.bf16.gmra.mxu1 %v1778_v60  ;;  %v1069_v63 = vadd.f32 %v1068_v10, %v1067_v27  ;;  %v1096_v31 = vadd.f32 %v1095_v47, %v1094_v17  ;;  %v1199_v33 = vmul.f32 %v4773_v35, %v4773_v35  ;;  %v1089_v16 = vadd.f32 %v1088_v30, %v1087_v55 }
 0x233   :  { %1854 = vmatprep.mubr.bf16.mxu1 %v1781_v18  ;;  %v1176_v46 = vrot.slane %v1175_v53, 4  ;;  %v1184_v43 = vadd.f32 %v1183_v12, %v4778_v58  ;;  %v891_v62 = vmul.f32 0.99, %v859_v36  ;;  %v1101_v51 = vmul.f32 %v4787_v56, %v4787_v56  ;;  %v842_v36 = vld [vmem:[%s5465_s12 + $0x20] sm:$0xff] }
 0x234   :  { %v4794_v20 = vmul.f32 0.03125, %v1069_v63  ;;  %v1097_v59 = vrot.slane %v1096_v31, 1  ;;  %v1211_v50 = vadd.f32 %v1210_v41, %v1198_v5  ;;  %v1099_v28 = vmul.f32 0.03125, %v1089_v16 }
 0x235   :  { %v1177_v49 = vadd.f32 %v1176_v46, %v1175_v53  ;;  %v1203_v4 = vadd.f32 %v1202_v57, %v1199_v33  ;;  %v1185_v60 = vrot.slane %v1184_v43, 4  ;;  %v1780_v42 = vpack.c.bf16 %v1708_v14, %v1706_v9 }
 0x236   :  { %v1098_v15 = vadd.f32 %v1097_v59, %v1096_v31  ;;  %v1102_v1 = vmul.f32 %v4794_v20, %v4794_v20  ;;  %v1200_v7 = vmul.f32 %v4778_v58, %v4778_v58  ;;  %v1103_v27 = vsub.f32 %v1099_v28, %v1101_v51  ;;  %v843_v31 = vld [vmem:[%s5465_s12 + $0x28] sm:$0xff] }
 0x237   :  { %v1178_v17 = vrot.slane %v1177_v49, 2  ;;  %v1204_v18 = vrot.slane %v1203_v4, 4  ;;  %v1186_v55 = vadd.f32 %v1185_v60, %v1184_v43  ;;  %v1314_v41 = vpack.c.bf16 %v4607_v48, %v4590_v24 }
 0x238   :  { %v1100_v40 = vmul.f32 0.03125, %v1098_v15  ;;  %v1212_v11 = vadd.f32 %v1211_v50, %v1200_v7  ;;  %v954_v10 = vmul.f32 0.01, %v4259_v44  ;;  %v1105_v47 = vmax.f32 %v1103_v27, 0.0  ;;  %v2918_v15 = vld [vmem:[%s5460_s4 + $0x20] sm:$0xff] }
 0x239   :  { %v1179_v14 = vadd.f32 %v1178_v17, %v1177_v49  ;;  %v1205_v9 = vadd.f32 %v1204_v18, %v1203_v4  ;;  %v1187_v12 = vrot.slane %v1186_v55, 2  ;;  %2718 = vmatpush3.bf16.msra.mxu0 %v1314_v41  ;;  %v955_v5 = vmul.f32 0.01, %v4264_v29  ;;  %v2919_v18 = vld [vmem:[%s5460_s4 + $0x28] sm:$0xff] }
 0x23a   :  { %1855 = vmatmul.mubr.bf16.gmra.mxu1 %v1780_v42  ;;  %v1104_v30 = vsub.f32 %v1100_v40, %v1102_v1  ;;  %v1213_v57 = vrot.slane %v1212_v11, 4  ;;  %v986_v53 = vadd.f32 %v954_v10, %v4615_v3  ;;  %v1115_v63 = vadd.f32 1e-05, %v1105_v47 }
 0x23b   :  { %v1180_v24 = vrot.slane %v1179_v14, 1  ;;  %v1206_v48 = vrot.slane %v1205_v9, 2  ;;  %v1188_v44 = vadd.f32 %v1187_v12, %v1186_v55  ;;  %v987_v46 = vadd.f32 %v955_v5, %v891_v62 }
 0x23c   :  { %v1106_v33 = vmax.f32 %v1104_v30, 0.0  ;;  %v1214_v16 = vadd.f32 %v1213_v57, %v1212_v11  ;;  %1024 = vst [vmem:[%s5466_s18 + $0xa0] sm:$0xff] %v986_v53  ;;  %v874_v43 = vmul.f32 0.99, %v842_v36  ;;  %2890 = vrsqrt.f32 %v1115_v63  ;;  %v2920_v63 = vld [vmem:[%s5460_s4 + $0x90] sm:$0xff] }
 0x23d   :  { %v1181_v29 = vadd.f32 %v1180_v24, %v1179_v14  ;;  %v1207_v51 = vadd.f32 %v1206_v48, %v1205_v9  ;;  %v1189_v3 = vrot.slane %v1188_v44, 1  ;;  %1025 = vst [vmem:[%s5466_s18 + $0xa8] sm:$0xff] %v987_v46  ;;  %v1321_v28 = vpack.c.bf16 %v987_v46, %v986_v53 }
 0x23e   :  { %v1116_v59 = vadd.f32 1e-05, %v1106_v33  ;;  %v1215_v50 = vrot.slane %v1214_v16, 2  ;;  %v875_v49 = vmul.f32 0.99, %v843_v31  ;;  %v1113_v27 = vsub.f32 %v4666_v8, %v4787_v56  ;;  %v2921_v33 = vld [vmem:[%s5460_s4 + $0x98] sm:$0xff] }
 0x23f   :  { %v4820_v4 = vmul.f32 0.03125, %v1181_v29  ;;  %v1208_v60 = vrot.slane %v1207_v51, 1  ;;  %v1190_v42 = vadd.f32 %v1189_v3, %v1188_v44  ;;  %v938_v1 = vmul.f32 0.01, %v2918_v15  ;;  %2719 = vmatprep.subr.bf16.mxu0 %v1321_v28 }
 0x240   :  { %2892 = vrsqrt.f32 %v1116_v59  ;;  %v1216_v17 = vadd.f32 %v1215_v50, %v1214_v16  ;;  %v939_v55 = vmul.f32 0.01, %v2919_v18  ;;  %v1114_v57 = vsub.f32 %v4682_v26, %v4794_v20  ;;  %v2922_v59 = vld [vmem:[%s5460_s4 + $0x10] sm:$0xff] }
 0x241   :  { %v1209_v40 = vadd.f32 %v1208_v60, %v1207_v51  ;;  %v1221_v11 = vmul.f32 %v4820_v4, %v4820_v4  ;;  %v4835_v41 = vmul.f32 0.03125, %v1190_v42  ;;  %v970_v9 = vadd.f32 %v938_v1, %v874_v43  ;;  %v2923_v60 = vld [vmem:[%s5460_s4 + $0x18] sm:$0xff] }
 0x242   :  { %v1217_v14 = vrot.slane %v1216_v17, 1  ;;  %v971_v12 = vadd.f32 %v939_v55, %v875_v49  ;;  %v952_v24 = vmul.f32 0.01, %v2920_v63  ;;  %v953_v16 = vmul.f32 0.01, %v2921_v33  ;;  %v2924_v55 = vld [vmem:[%s5460_s4 + $0x80] sm:$0xff] }
 0x243   :  { %v1219_v5 = vmul.f32 0.03125, %v1209_v40  ;;  %v1222_v53 = vmul.f32 %v4835_v41, %v4835_v41  ;;  %v936_v50 = vmul.f32 0.01, %v2922_v59  ;;  %v937_v42 = vmul.f32 0.01, %v2923_v60 }
 0x244   :  { %v856_v62 = vld [vmem:[%s5465_s12 + $0x90] sm:$0xff]  ;;  %v857_v7 = vld [vmem:[%s5465_s12 + $0x98] sm:$0xff]  ;;  %v854_v48 = vld [vmem:[%s5465_s12 + $0x80] sm:$0xff]  ;;  %v1218_v44 = vadd.f32 %v1217_v14, %v1216_v17  ;;  %v1313_v31 = vpack.c.bf16 %v971_v12, %v970_v9  ;;  %v950_v40 = vmul.f32 0.01, %v2924_v55  ;;  %v1108_v59 = vsub.f32 %v4584_v6, %v4794_v20 }
 0x245   :  { %v888_v10 = vmul.f32 0.99, %v856_v62  ;;  %v840_v47 = vld [vmem:[%s5465_s12 + $0x10] sm:$0xff]  ;;  %v889_v36 = vmul.f32 0.99, %v857_v7  ;;  %v841_v30 = vld [vmem:[%s5465_s12 + $0x18] sm:$0xff]  ;;  %v1223_v29 = vsub.f32 %v1219_v5, %v1221_v11  ;;  %v1110_v60 = vsub.f32 %v4625_v19, %v4794_v20 }
 0x246   :  { %1008 = vst [vmem:[%s5466_s18 + $0x20] sm:$0xff] %v970_v9  ;;  %1009 = vst [vmem:[%s5466_s18 + $0x28] sm:$0xff] %v971_v12  ;;  %v872_v46 = vmul.f32 0.99, %v840_v47  ;;  %v873_v3 = vmul.f32 0.99, %v841_v30  ;;  %2720 = vmatpush3.bf16.msra.mxu0 %v1313_v31  ;;  %v1107_v8 = vsub.f32 %v4576_v0, %v4787_v56 }
 0x247   :  { %v984_v51 = vadd.f32 %v952_v24, %v888_v10  ;;  %v1220_v49 = vmul.f32 0.03125, %v1218_v44  ;;  %v985_v62 = vadd.f32 %v953_v16, %v889_v36  ;;  %v886_v15 = vmul.f32 0.99, %v854_v48  ;;  %v2925_v14 = vld [vmem:[%s5460_s4 + $0x88] sm:$0xff]  ;;  %v833_v12 = vld [vmem:[%s5467_s11] sm:$0x3] }
 0x248   :  { %v1225_v7 = vmax.f32 %v1223_v29, 0.0  ;;  %v968_v17 = vadd.f32 %v936_v50, %v872_v46  ;;  %v969_v47 = vadd.f32 %v937_v42, %v873_v3  ;;  %v951_v9 = vmul.f32 0.01, %v2925_v14  ;;  %v2926_v31 = vld [vmem:[%s5460_s4] sm:$0xff]  ;;  %v2927_v46 = vld [vmem:[%s5460_s4 + $0x8] sm:$0xff] }
 0x249   :  { %v1224_v11 = vsub.f32 %v1220_v49, %v1222_v53  ;;  %v1320_v10 = vpack.c.bf16 %v985_v62, %v984_v51  ;;  %v982_v30 = vadd.f32 %v950_v40, %v886_v15  ;;  %v2891_v63 = vpop.eup %2890  ;;  %v934_v33 = vmul.f32 0.01, %v2926_v31 }
 0x24a   :  { %v1235_v36 = vadd.f32 1e-05, %v1225_v7  ;;  %v1312_v48 = vpack.c.bf16 %v969_v47, %v968_v17  ;;  %v4903_v16 = vrot.slane %v4308_v39, %v4318_v25  ;;  %v834_v29 = vmul.f32 0.99, %v833_v12 }
 0x24b   :  { %v1226_v24 = vmax.f32 %v1224_v11, 0.0  ;;  %2721 = vmatprep.subr.bf16.mxu0 %v1320_v10  ;;  %v1119_v15 = vmul.f32 %v2891_v63, %v1107_v8 }
 0x24c   :  { %2894 = vrsqrt.f32 %v1235_v36  ;;  %2722 = vmatpush3.bf16.msra.mxu0 %v1312_v48 }
 0x24d   :  { %v855_v43 = vld [vmem:[%s5465_s12 + $0x88] sm:$0xff]  ;;  %v838_v28 = vld [vmem:[%s5465_s12] sm:$0xff]  ;;  %v2893_v50 = vpop.eup %2892  ;;  %v1138_v40 = vmul.f32 %v4493_v54, %v1119_v15 }
 0x24e   :  { %v839_v1 = vld [vmem:[%s5465_s12 + $0x8] sm:$0xff]  ;;  %v887_v18 = vmul.f32 0.99, %v855_v43  ;;  %v870_v5 = vmul.f32 0.99, %v838_v28  ;;  %v1125_v28 = vmul.f32 %v2891_v63, %v1113_v27  ;;  %v1126_v42 = vmul.f32 %v2893_v50, %v1114_v57 }
 0x24f   :  { %1022 = vst [vmem:[%s5466_s18 + $0x90] sm:$0xff] %v984_v51  ;;  %1023 = vst [vmem:[%s5466_s18 + $0x98] sm:$0xff] %v985_v62  ;;  %v871_v53 = vmul.f32 0.99, %v839_v1  ;;  %v935_v43 = vmul.f32 0.01, %v2927_v46  ;;  %v837_v62 = vadd.f32 %v4483_v61, %v834_v29  ;;  %v1120_v6 = vmul.f32 %v2893_v50, %v1108_v59 }
 0x250   :  { %1006 = vst [vmem:[%s5466_s18 + $0x10] sm:$0xff] %v968_v17  ;;  %1007 = vst [vmem:[%s5466_s18 + $0x18] sm:$0xff] %v969_v47  ;;  %v983_v44 = vadd.f32 %v951_v9, %v887_v18  ;;  %v1236_v51 = vadd.f32 1e-05, %v1226_v24  ;;  %v966_v39 = vadd.f32 %v934_v33, %v870_v5  ;;  %v1122_v19 = vmul.f32 %v2893_v50, %v1110_v60 }
 0x251   :  { %1020 = vst [vmem:[%s5466_s18 + $0x80] sm:$0xff] %v982_v30  ;;  %v967_v49 = vadd.f32 %v935_v43, %v871_v53  ;;  %1003 = vst.msk [vmem:[%s5468_s17] sm:$0x3] %vm4304_vm0, %v837_v62  ;;  %v4939_v26 = vrot.slane %v837_v62, %v4318_v25  ;;  %v1109_v27 = vsub.f32 %v4605_v13, %v4787_v56 }
 0x252   :  { %1021 = vst [vmem:[%s5466_s18 + $0x88] sm:$0xff] %v983_v44  ;;  %v1319_v3 = vpack.c.bf16 %v983_v44, %v982_v30  ;;  %2896 = vrsqrt.f32 %v1236_v51  ;;  %1004 = vst [vmem:[%s5466_s18] sm:$0xff] %v966_v39  ;;  %v1145_v0 = vmul.f32 %v4903_v16, %v1126_v42  ;;  %v1139_v57 = vmul.f32 %v4903_v16, %v1120_v6 }
 0x253   :  { %1005 = vst [vmem:[%s5466_s18 + $0x8] sm:$0xff] %v967_v49  ;;  %v1311_v61 = vpack.c.bf16 %v967_v49, %v966_v39  ;;  %v4946_v1 = vrot.slane %v837_v62, %v4316_v34  ;;  %v1141_v2 = vmul.f32 %v4903_v16, %v1122_v19  ;;  %v1121_v7 = vmul.f32 %v2891_v63, %v1109_v27 }
 0x254   :  { %2723 = vmatprep.subr.bf16.mxu0 %v1319_v3  ;;  %v1112_v17 = vsub.f32 %v4658_v38, %v4794_v20  ;;  %v1111_v18 = vsub.f32 %v4643_v32, %v4787_v56  ;;  %v1144_v13 = vmul.f32 %v4493_v54, %v1125_v28  ;;  %v1158_v55 = vadd.f32 %v4939_v26, %v1139_v57 }
 0x255   :  { %2724 = vmatpush3.bf16.msra.mxu0 %v1311_v61  ;;  %v1164_v11 = vadd.f32 %v4939_v26, %v1145_v0  ;;  %v1160_v10 = vadd.f32 %v4939_v26, %v1141_v2  ;;  %v1140_v47 = vmul.f32 %v4493_v54, %v1121_v7  ;;  %v1157_v38 = vadd.f32 %v4946_v1, %v1138_v40 }
 0x256   :  { %v1124_v14 = vmul.f32 %v2893_v50, %v1112_v17  ;;  %v1123_v9 = vmul.f32 %v2891_v63, %v1111_v18  ;;  %v1166_v12 = vmax.f32 %v1158_v55, 0.0  ;;  %v1163_v53 = vadd.f32 %v4946_v1, %v1144_v13 }
 0x257   :  { %v1168_v20 = vmax.f32 %v1160_v10, 0.0  ;;  %v1159_v32 = vadd.f32 %v4946_v1, %v1140_v47  ;;  %v1165_v30 = vmax.f32 %v1157_v38, 0.0  ;;  %v1172_v5 = vmax.f32 %v1164_v11, 0.0 }
 0x258   :  { %v1143_v56 = vmul.f32 %v4903_v16, %v1124_v14  ;;  %v1142_v36 = vmul.f32 %v4493_v54, %v1123_v9  ;;  %v1227_v24 = vsub.f32 %v4689_v22, %v4820_v4  ;;  %v1234_v46 = vsub.f32 %v4778_v58, %v4835_v41 }
 0x259   :  { %v1304_v48 = vpack.c.bf16 %v1168_v20, %v1166_v12  ;;  %v1167_v44 = vmax.f32 %v1159_v32, 0.0  ;;  %v2895_v33 = vpop.eup %2894  ;;  %v1228_v43 = vsub.f32 %v4697_v37, %v4835_v41  ;;  %v1230_v29 = vsub.f32 %v4714_v21, %v4835_v41 }
 0x25a   :  { %v1162_v63 = vadd.f32 %v4939_v26, %v1143_v56  ;;  %v1161_v31 = vadd.f32 %v4946_v1, %v1142_v36  ;;  %v1229_v51 = vsub.f32 %v4704_v23, %v4820_v4  ;;  %v1233_v22 = vsub.f32 %v4773_v35, %v4820_v4  ;;  %v2842_v36 = vld [vmem:[%s5469_s5 + $0x70] ss:$8 sps:$4 sm:$0xff]  }
 0x25b   :  { %1359 = vmatprep.mubr.bf16.mxu0 %v1304_v48  ;;  %v1303_v3 = vpack.c.bf16 %v1167_v44, %v1165_v30  ;;  %v1232_v59 = vsub.f32 %v4763_v52, %v4835_v41  ;;  %v1239_v50 = vmul.f32 %v2895_v33, %v1227_v24  ;;  %v1231_v37 = vsub.f32 %v4740_v45, %v4820_v4  ;;  %v2845_v30 = vld [vmem:[%s5469_s5 + $0x60] ss:$8 sps:$4 sm:$0xff]   ;;  %v2853_v24 = vld [vmem:[%s5469_s5 + $0x44] ss:$8 sps:$4 sm:$0xff]   ;;  %v2856_v44 = vld [vmem:[%s5469_s5 + $0x34] ss:$8 sps:$4 sm:$0xff]  }
 0x25c   :  { %v1170_v39 = vmax.f32 %v1162_v63, 0.0  ;;  %v1241_v58 = vmul.f32 %v2895_v33, %v1229_v51  ;;  %v1169_v49 = vmax.f32 %v1161_v31, 0.0  ;;  %v1171_v62 = vmax.f32 %v1163_v53, 0.0  ;;  %v2848_v53 = vld [vmem:[%s5469_s5 + $0x50] ss:$8 sps:$4 sm:$0xff]  }
 0x25d   :  { %1360 = vmatmul.mubr.bf16.vlgmr.msra.gmra.mxu0 %v1303_v3  ;;  %v1247_v35 = vmul.f32 %v1239_v50, %v4493_v54  ;;  %v1245_v6 = vmul.f32 %v2895_v33, %v1233_v22  ;;  %v1243_v4 = vmul.f32 %v2895_v33, %v1231_v37  ;;  %v2851_v48 = vld [vmem:[%s5469_s5 + $0x40] ss:$8 sps:$4 sm:$0xff]   ;;  %v2854_v63 = vld [vmem:[%s5469_s5 + $0x30] ss:$8 sps:$4 sm:$0xff]   ;;  %v2859_v31 = vld [vmem:[%s5469_s5 + $0x24] ss:$8 sps:$4 sm:$0xff]  }
 0x25e   :  { %v1306_v21 = vpack.c.bf16 %v1172_v5, %v1170_v39  ;;  %v1249_v8 = vmul.f32 %v1241_v58, %v4493_v54  ;;  %v1305_v19 = vpack.c.bf16 %v1171_v62, %v1169_v49  ;;  %v2850_v5 = vld [vmem:[%s5469_s5 + $0x54] ss:$8 sps:$4 sm:$0xff]   ;;  %v2857_v33 = vld [vmem:[%s5469_s5 + $0x20] ss:$8 sps:$4 sm:$0xff]   ;;  %v2865_v51 = vld [vmem:[%s5469_s5 + $0x4] ss:$8 sps:$4 sm:$0xff]  }
 0x25f   :  { %v2897_v28 = vpop.eup %2896  ;;  %v1255_v27 = vadd.f32 %v1247_v35, %v4946_v1  ;;  %v1253_v55 = vmul.f32 %v1245_v6, %v4493_v54  ;;  %v1251_v10 = vmul.f32 %v1243_v4, %v4493_v54  ;;  %v2844_v54 = vld [vmem:[%s5469_s5 + $0x74] ss:$8 sps:$4 sm:$0xff]   ;;  %v2928_v22 = vmov 0  }
 0x260   :  { %v1246_v23 = vmul.f32 %v2897_v28, %v1234_v46  ;;  %v1240_v60 = vmul.f32 %v2897_v28, %v1228_v43  ;;  %v1242_v42 = vmul.f32 %v2897_v28, %v1230_v29  ;;  %1367 = vmatprep.mubr.bf16.mxu0 %v1306_v21  ;;  %v1244_v52 = vmul.f32 %v2897_v28, %v1232_v59  ;;  %v2862_v46 = vld [vmem:[%s5469_s5 + $0x14] ss:$8 sps:$4 sm:$0xff]   ;;  %v2860_v43 = vld [vmem:[%s5469_s5 + $0x10] ss:$8 sps:$4 sm:$0xff]   ;;  %v2863_v29 = vld [vmem:[%s5469_s5] ss:$8 sps:$4 sm:$0xff]  }
 0x261   :  { %v1257_v0 = vadd.f32 %v1249_v8, %v4946_v1  ;;  %v1263_v40 = vmax.f32 %v1255_v27, 0.0  ;;  %v1259_v12 = vadd.f32 %v1251_v10, %v4946_v1  ;;  %v1261_v38 = vadd.f32 %v1253_v55, %v4946_v1  ;;  %2037 = vmatprep.subr.bf16.mxu0 %v2844_v54  ;;  %v2847_v1 = vld [vmem:[%s5469_s5 + $0x64] ss:$8 sps:$4 sm:$0xff]  }
 0x262   :  { %v1254_v41 = vmul.f32 %v1246_v23, %v4903_v16  ;;  %v1248_v61 = vmul.f32 %v1240_v60, %v4903_v16  ;;  %v1250_v45 = vmul.f32 %v1242_v42, %v4903_v16  ;;  %v1252_v57 = vmul.f32 %v1244_v52, %v4903_v16  ;;  %2038 = vmatpush1.bf16.msra.mxu0 %v2842_v36 }
 0x263   :  { %v1265_v11 = vmax.f32 %v1257_v0, 0.0  ;;  %v1269_v32 = vmax.f32 %v1261_v38, 0.0  ;;  %2039 = vmatprep.subr.bf16.mxu0 %v2847_v1 }
 0x264   :  { %v1256_v15 = vadd.f32 %v1248_v61, %v4939_v26  ;;  %v1258_v2 = vadd.f32 %v1250_v45, %v4939_v26  ;;  %v1262_v7 = vadd.f32 %v1254_v41, %v4939_v26  ;;  %v1260_v17 = vadd.f32 %v1252_v57, %v4939_v26 }
 0x265   :  { %1368 = vmatmul.mubr.bf16.gmra.mxu0 %v1305_v19  ;;  %v1307_v9 = vpack.c.bf16 %v1265_v11, %v1263_v40  ;;  %v1267_v26 = vmax.f32 %v1259_v12, 0.0 }
 0x266   :  { %v1264_v18 = vmax.f32 %v1256_v15, 0.0  ;;  %v1266_v13 = vmax.f32 %v1258_v2, 0.0  ;;  %v1268_v14 = vmax.f32 %v1260_v17, 0.0  ;;  %v1270_v16 = vmax.f32 %v1262_v7, 0.0  ;;  %2040 = vmatpush1.bf16.msra.mxu0 %v2845_v30 }
 0x267   :  { %v1309_v56 = vpack.c.bf16 %v1269_v32, %v1267_v26  ;;  %2041 = vmatprep.subr.bf16.mxu0 %v2850_v5 }
 0x268   :  { %v1308_v47 = vpack.c.bf16 %v1266_v13, %v1264_v18  ;;  %v1310_v20 = vpack.c.bf16 %v1270_v16, %v1268_v14 }
 0x26a   :  { %1375 = vmatprep.mubr.bf16.mxu0 %v1308_v47  ;;  %2042 = vmatpush1.bf16.msra.mxu0 %v2848_v53 }
 0x26b   :  { %2043 = vmatprep.subr.bf16.mxu0 %v2853_v24 }
 0x26d   :  { %1376 = vmatmul.mubr.bf16.gmra.mxu0 %v1307_v9 }
 0x26e   :  { %1383 = vmatprep.mubr.bf16.mxu0 %v1310_v20  ;;  %2044 = vmatpush1.bf16.msra.mxu0 %v2851_v48 }
 0x26f   :  { %2045 = vmatprep.subr.bf16.mxu0 %v2856_v44 }
 0x272   :  { %2046 = vmatpush1.bf16.msra.mxu0 %v2854_v63 }
 0x273   :  { %2047 = vmatprep.subr.bf16.mxu0 %v2859_v31 }
 0x275   :  { %1384 = vmatmul.mubr.bf16.gmra.mxu0 %v1309_v56 }
 0x276   :  { %2048 = vmatpush1.bf16.msra.mxu0 %v2857_v33  ;;  %2069 = vmatprep.mubr.bf16.mxu0 %v2928_v22 }
 0x277   :  { %2049 = vmatprep.subr.bf16.mxu0 %v2862_v46 }
 0x27a   :  { %2050 = vmatpush1.bf16.msra.mxu0 %v2860_v43 }
 0x27b   :  { %2051 = vmatprep.subr.bf16.mxu0 %v2865_v51 }
 0x27e   :  { %2052 = vmatpush1.bf16.msra.mxu0 %v2863_v29 }
 0x2e1   :  { %v2765_v3 = vpop.f32.mrf.mxu1 }
 0x2e3   :  { %v2766_v39 = vpop.f32.mrf.mxu1 }
 0x2e4   :  { %v5049_v28 = vadd.f32 %v2766_v39, %v2765_v3 }
 0x2e5   :  { %v2768_v59 = vpop.f32.mrf.mxu1 }
 0x2e6   :  { %v1873_v60 = vmul.f32 %v5049_v28, %v5049_v28 }
 0x2e7   :  { %v2769_v50 = vpop.f32.mrf.mxu1 }
 0x2e8   :  { %v5047_v58 = vadd.f32 %v2769_v50, %v2768_v59 }
 0x2e9   :  { %v2771_v37 = vpop.f32.mrf.mxu1 }
 0x2ea   :  { %v1874_v49 = vmul.f32 %v5047_v58, %v5047_v58  ;;  %v1863_v42 = vadd.f32 %v5047_v58, %v5049_v28 }
 0x2eb   :  { %v2772_v21 = vpop.f32.mrf.mxu1 }
 0x2ec   :  { %v5053_v62 = vadd.f32 %v2772_v21, %v2771_v37  ;;  %v1877_v8 = vadd.f32 %v1874_v49, %v1873_v60 }
 0x2ed   :  { %v2774_v23 = vpop.f32.mrf.mxu1 }
 0x2ee   :  { %v1875_v35 = vmul.f32 %v5053_v62, %v5053_v62  ;;  %v1864_v52 = vadd.f32 %v5053_v62, %v1863_v42 }
 0x2ef   :  { %v2775_v6 = vpop.f32.mrf.mxu1 }
 0x2f0   :  { %v5062_v41 = vadd.f32 %v2775_v6, %v2774_v23  ;;  %v1878_v45 = vadd.f32 %v1877_v8, %v1875_v35 }
 0x2f2   :  { %v2777_v61 = vpop.f32.mrf.mxu1  ;;  %v1865_v4 = vadd.f32 %v5062_v41, %v1864_v52  ;;  %v1876_v19 = vmul.f32 %v5062_v41, %v5062_v41 }
 0x2f4   :  { %v2778_v27 = vpop.f32.mrf.mxu1  ;;  %v1866_v0 = vrot.slane %v1865_v4, 4  ;;  %v1879_v57 = vadd.f32 %v1878_v45, %v1876_v19 }
 0x2f5   :  { %v5069_v47 = vadd.f32 %v2778_v27, %v2777_v61 }
 0x2f6   :  { %v2780_v15 = vpop.f32.mrf.mxu1  ;;  %v1867_v2 = vadd.f32 %v1866_v0, %v1865_v4  ;;  %v1880_v7 = vrot.slane %v1879_v57, 4 }
 0x2f7   :  { %v1910_v54 = vmul.f32 %v5069_v47, %v5069_v47 }
 0x2f8   :  { %v2781_v17 = vpop.f32.mrf.mxu1  ;;  %v1868_v18 = vrot.slane %v1867_v2, 2  ;;  %v1881_v13 = vadd.f32 %v1880_v7, %v1879_v57 }
 0x2f9   :  { %v5067_v55 = vadd.f32 %v2781_v17, %v2780_v15 }
 0x2fa   :  { %v2783_v40 = vpop.f32.mrf.mxu1  ;;  %v1869_v11 = vadd.f32 %v1868_v18, %v1867_v2  ;;  %v1882_v10 = vrot.slane %v1881_v13, 2 }
 0x2fb   :  { %v1911_v38 = vmul.f32 %v5067_v55, %v5067_v55  ;;  %v1900_v56 = vadd.f32 %v5067_v55, %v5069_v47 }
 0x2fc   :  { %v2784_v14 = vpop.f32.mrf.mxu1  ;;  %v1870_v16 = vrot.slane %v1869_v11, 1  ;;  %v1883_v9 = vadd.f32 %v1882_v10, %v1881_v13 }
 0x2fd   :  { %v5071_v12 = vadd.f32 %v2784_v14, %v2783_v40  ;;  %v1914_v48 = vadd.f32 %v1911_v38, %v1910_v54 }
 0x2fe   :  { %v2786_v20 = vpop.f32.mrf.mxu1  ;;  %v1871_v26 = vadd.f32 %v1870_v16, %v1869_v11  ;;  %v1884_v32 = vrot.slane %v1883_v9, 1 }
 0x2ff   :  { %v1912_v36 = vmul.f32 %v5071_v12, %v5071_v12  ;;  %v1901_v53 = vadd.f32 %v5071_v12, %v1900_v56 }
 0x300   :  { %v2787_v1 = vpop.f32.mrf.mxu1  ;;  %v1872_v30 = vmul.f32 0.03125, %v1871_v26  ;;  %v1885_v5 = vadd.f32 %v1884_v32, %v1883_v9 }
 0x301   :  { %v5082_v24 = vadd.f32 %v2787_v1, %v2786_v20  ;;  %v1915_v33 = vadd.f32 %v1914_v48, %v1912_v36 }
 0x302   :  { %v1886_v44 = vmul.f32 0.03125, %v1885_v5  ;;  %v1887_v63 = vmul.f32 %v1872_v30, %v1872_v30  ;;  %v1890_v19 = vsub.f32 %v5049_v28, %v1872_v30  ;;  %v1891_v27 = vsub.f32 %v5047_v58, %v1872_v30 }
 0x303   :  { %v1902_v31 = vadd.f32 %v5082_v24, %v1901_v53  ;;  %v1913_v46 = vmul.f32 %v5082_v24, %v5082_v24  ;;  %v1893_v13 = vsub.f32 %v5062_v41, %v1872_v30  ;;  %v1892_v40 = vsub.f32 %v5053_v62, %v1872_v30 }
 0x304   :  { %v1888_v43 = vsub.f32 %v1886_v44, %v1887_v63 }
 0x305   :  { %v1903_v29 = vrot.slane %v1902_v31, 4  ;;  %v1916_v51 = vadd.f32 %v1915_v33, %v1913_v46 }
 0x306   :  { %v1889_v3 = vmax.f32 %v1888_v43, 0.0 }
 0x307   :  { %v1904_v39 = vadd.f32 %v1903_v29, %v1902_v31  ;;  %v1917_v59 = vrot.slane %v1916_v51, 4 }
 0x308   :  { %v1894_v50 = vadd.f32 1e-05, %v1889_v3 }
 0x309   :  { %v1905_v37 = vrot.slane %v1904_v39, 2  ;;  %v1918_v21 = vadd.f32 %v1917_v59, %v1916_v51 }
 0x30a   :  { %2898 = vrsqrt.f32 %v1894_v50 }
 0x30b   :  { %v1906_v49 = vadd.f32 %v1905_v37, %v1904_v39  ;;  %v1919_v23 = vrot.slane %v1918_v21, 2 }
 0x30d   :  { %v1907_v60 = vrot.slane %v1906_v49, 1  ;;  %v1920_v42 = vadd.f32 %v1919_v23, %v1918_v21 }
 0x30f   :  { %v1908_v35 = vadd.f32 %v1907_v60, %v1906_v49  ;;  %v1921_v6 = vrot.slane %v1920_v42, 1 }
 0x311   :  { %v1909_v8 = vmul.f32 0.03125, %v1908_v35  ;;  %v1922_v52 = vadd.f32 %v1921_v6, %v1920_v42 }
 0x313   :  { %v1924_v61 = vmul.f32 %v1909_v8, %v1909_v8  ;;  %v1923_v45 = vmul.f32 0.03125, %v1922_v52  ;;  %v1927_v1 = vsub.f32 %v5069_v47, %v1909_v8  ;;  %v1928_v30 = vsub.f32 %v5067_v55, %v1909_v8 }
 0x314   :  { %v1930_v3 = vsub.f32 %v5082_v24, %v1909_v8  ;;  %v1929_v39 = vsub.f32 %v5071_v12, %v1909_v8 }
 0x315   :  { %v1925_v4 = vsub.f32 %v1923_v45, %v1924_v61 }
 0x317   :  { %v2899_v0 = vpop.eup %2898  ;;  %v1926_v57 = vmax.f32 %v1925_v4, 0.0 }
 0x318   :  { %v1896_v15 = vmul.f32 %v2899_v0, %v1890_v19  ;;  %v1897_v2 = vmul.f32 %v2899_v0, %v1891_v27  ;;  %v1898_v10 = vmul.f32 %v2899_v0, %v1892_v40  ;;  %v1899_v28 = vmul.f32 %v2899_v0, %v1893_v13 }
 0x319   :  { %v1931_v7 = vadd.f32 1e-05, %v1926_v57 }
 0x31a   :  { %v1953_v17 = vpack.c.bf16 %v1897_v2, %v1896_v15  ;;  %v1954_v38 = vpack.c.bf16 %v1899_v28, %v1898_v10 }
 0x31b   :  { %2900 = vrsqrt.f32 %v1931_v7 }
 0x31c   :  { %2070 = vmatmul.mubr.bf16.vlgmr.msra.gmra.mxu0 %v1953_v17 }
 0x31d   :  { %v2725_v18 = vpop.f32.mrf.mxu0  ;;  %2079 = vmatprep.mubr.bf16.mxu0 %v2928_v22 }
 0x31f   :  { %v2726_v11 = vpop.f32.mrf.mxu0 }
 0x320   :  { %v5092_v14 = vadd.f32 %v2726_v11, %v2725_v18 }
 0x321   :  { %v2728_v58 = vpop.f32.mrf.mxu0 }
 0x322   :  { %v1402_v20 = vmul.f32 %v5092_v14, %v5092_v14 }
 0x323   :  { %v2729_v16 = vpop.f32.mrf.mxu0 }
 0x324   :  { %v5094_v9 = vadd.f32 %v2729_v16, %v2728_v58  ;;  %2080 = vmatmul.mubr.bf16.gmra.mxu0 %v1954_v38 }
 0x325   :  { %v2731_v26 = vpop.f32.mrf.mxu0  ;;  %2089 = vmatprep.mubr.bf16.mxu0 %v2928_v22 }
 0x326   :  { %v1403_v41 = vmul.f32 %v5094_v9, %v5094_v9  ;;  %v1392_v62 = vadd.f32 %v5094_v9, %v5092_v14 }
 0x327   :  { %v2732_v32 = vpop.f32.mrf.mxu0 }
 0x328   :  { %v5103_v56 = vadd.f32 %v2732_v32, %v2731_v26  ;;  %v1406_v54 = vadd.f32 %v1403_v41, %v1402_v20  ;;  %v2901_v53 = vpop.eup %2900 }
 0x329   :  { %v2734_v36 = vpop.f32.mrf.mxu0  ;;  %v1933_v63 = vmul.f32 %v2901_v53, %v1927_v1  ;;  %v1934_v31 = vmul.f32 %v2901_v53, %v1928_v30  ;;  %v1935_v49 = vmul.f32 %v2901_v53, %v1929_v39  ;;  %v1936_v23 = vmul.f32 %v2901_v53, %v1930_v3 }
 0x32a   :  { %v1404_v5 = vmul.f32 %v5103_v56, %v5103_v56  ;;  %v1393_v48 = vadd.f32 %v5103_v56, %v1392_v62 }
 0x32b   :  { %v2735_v44 = vpop.f32.mrf.mxu0  ;;  %v1955_v29 = vpack.c.bf16 %v1934_v31, %v1933_v63  ;;  %v1956_v8 = vpack.c.bf16 %v1936_v23, %v1935_v49 }
 0x32c   :  { %v1407_v33 = vadd.f32 %v1406_v54, %v1404_v5  ;;  %v5110_v46 = vadd.f32 %v2735_v44, %v2734_v36 }
 0x32d   :  { %v2737_v43 = vpop.f32.mrf.mxu0  ;;  %2090 = vmatmul.mubr.bf16.gmra.mxu0 %v1955_v29 }
 0x32e   :  { %v1394_v51 = vadd.f32 %v5110_v46, %v1393_v48  ;;  %v1405_v47 = vmul.f32 %v5110_v46, %v5110_v46  ;;  %2099 = vmatprep.mubr.bf16.mxu0 %v2928_v22 }
 0x32f   :  { %v2738_v55 = vpop.f32.mrf.mxu0 }
 0x330   :  { %v5117_v59 = vadd.f32 %v2738_v55, %v2737_v43  ;;  %v1395_v50 = vrot.slane %v1394_v51, 4  ;;  %v1408_v37 = vadd.f32 %v1407_v33, %v1405_v47 }
 0x331   :  { %v2740_v21 = vpop.f32.mrf.mxu0 }
 0x332   :  { %v1396_v60 = vadd.f32 %v1395_v50, %v1394_v51  ;;  %v1409_v42 = vrot.slane %v1408_v37, 4  ;;  %v1439_v6 = vmul.f32 %v5117_v59, %v5117_v59 }
 0x333   :  { %v2741_v35 = vpop.f32.mrf.mxu0 }
 0x334   :  { %v5122_v52 = vadd.f32 %v2741_v35, %v2740_v21  ;;  %v1397_v24 = vrot.slane %v1396_v60, 2  ;;  %v1410_v61 = vadd.f32 %v1409_v42, %v1408_v37 }
 0x335   :  { %v2743_v12 = vpop.f32.mrf.mxu0  ;;  %2100 = vmatmul.mubr.bf16.gmra.mxu0 %v1956_v8 }
 0x336   :  { %v1429_v22 = vadd.f32 %v5122_v52, %v5117_v59  ;;  %v1440_v45 = vmul.f32 %v5122_v52, %v5122_v52  ;;  %v1398_v4 = vadd.f32 %v1397_v24, %v1396_v60  ;;  %v1411_v19 = vrot.slane %v1410_v61, 2 }
 0x337   :  { %v2744_v27 = vpop.f32.mrf.mxu0 }
 0x338   :  { %v1443_v0 = vadd.f32 %v1440_v45, %v1439_v6  ;;  %v5128_v57 = vadd.f32 %v2744_v27, %v2743_v12  ;;  %v1399_v15 = vrot.slane %v1398_v4, 1  ;;  %v1412_v2 = vadd.f32 %v1411_v19, %v1410_v61  ;;  %v2868_v19 = vld [vmem:[%s5471_s8 + $0x70] sm:$0xff]  }
 0x339   :  { %v2746_v7 = vpop.f32.mrf.mxu0  ;;  %v2869_v27 = vld [vmem:[%s5471_s8 + $0x30] sm:$0xff]  }
 0x33a   :  { %v1430_v17 = vadd.f32 %v5128_v57, %v1429_v22  ;;  %v1441_v18 = vmul.f32 %v5128_v57, %v5128_v57  ;;  %v1400_v13 = vadd.f32 %v1399_v15, %v1398_v4  ;;  %v1413_v40 = vrot.slane %v1412_v2, 1  ;;  %v2872_v15 = vld [vmem:[%s5471_s8 + $0x60] sm:$0xff]  }
 0x33b   :  { %v2747_v11 = vpop.f32.mrf.mxu0 }
 0x33c   :  { %v1444_v10 = vadd.f32 %v1443_v0, %v1441_v18  ;;  %v2748_v28 = vadd.f32 %v2747_v11, %v2746_v7  ;;  %v1401_v58 = vmul.f32 0.03125, %v1400_v13  ;;  %v1414_v16 = vadd.f32 %v1413_v40, %v1412_v2  ;;  %v2870_v0 = vld [vmem:[%s5471_s8 + $0x68] sm:$0xff]   ;;  %v2873_v2 = vld [vmem:[%s5471_s8 + $0x20] sm:$0xff]   ;;  %v2874_v7 = vld [vmem:[%s5471_s8 + $0x58] sm:$0xff]  }
 0x33d   :  { %v2876_v18 = vld [vmem:[%s5471_s8 + $0x50] sm:$0xff]   ;;  %v2878_v40 = vld [vmem:[%s5471_s8 + $0x48] sm:$0xff]  }
 0x33e   :  { %v1431_v38 = vadd.f32 %v2748_v28, %v1430_v17  ;;  %v1442_v20 = vmul.f32 %v2748_v28, %v2748_v28  ;;  %v1415_v26 = vmul.f32 0.03125, %v1414_v16  ;;  %v1416_v41 = vmul.f32 %v1401_v58, %v1401_v58  ;;  %v2875_v17 = vld [vmem:[%s5471_s8 + $0x18] sm:$0xff]   ;;  %v2877_v13 = vld [vmem:[%s5471_s8 + $0x10] sm:$0xff]   ;;  %v2879_v11 = vld [vmem:[%s5471_s8 + $0x8] sm:$0xff]  }
 0x33f   :  { %v1419_v50 = vsub.f32 %v5092_v14, %v1401_v58  ;;  %v1420_v37 = vsub.f32 %v5094_v9, %v1401_v58  ;;  %v1421_v21 = vsub.f32 %v5103_v56, %v1401_v58  ;;  %v1422_v49 = vsub.f32 %v5110_v46, %v1401_v58 }
 0x340   :  { %v1432_v62 = vrot.slane %v1431_v38, 4  ;;  %v1445_v32 = vadd.f32 %v1444_v10, %v1442_v20  ;;  %v1417_v54 = vsub.f32 %v1415_v26, %v1416_v41  ;;  %v2880_v10 = vld [vmem:[%s5471_s8 + $0x40] sm:$0xff]  }
 0x342   :  { %v1433_v36 = vadd.f32 %v1432_v62, %v1431_v38  ;;  %v1446_v1 = vrot.slane %v1445_v32, 4  ;;  %v1418_v30 = vmax.f32 %v1417_v54, 0.0 }
 0x344   :  { %v1434_v5 = vrot.slane %v1433_v36, 2  ;;  %v1447_v53 = vadd.f32 %v1446_v1, %v1445_v32  ;;  %v1423_v48 = vadd.f32 1e-05, %v1418_v30 }
 0x346   :  { %v1435_v44 = vadd.f32 %v1434_v5, %v1433_v36  ;;  %v1448_v63 = vrot.slane %v1447_v53, 2  ;;  %2902 = vrsqrt.f32 %v1423_v48 }
 0x348   :  { %v1436_v31 = vrot.slane %v1435_v44, 1  ;;  %v1449_v33 = vadd.f32 %v1448_v63, %v1447_v53 }
 0x34a   :  { %v1437_v43 = vadd.f32 %v1436_v31, %v1435_v44  ;;  %v1450_v29 = vrot.slane %v1449_v33, 1 }
 0x34c   :  { %v1438_v51 = vmul.f32 0.03125, %v1437_v43  ;;  %v1451_v47 = vadd.f32 %v1450_v29, %v1449_v33 }
 0x34e   :  { %v1452_v55 = vmul.f32 0.03125, %v1451_v47  ;;  %v1453_v3 = vmul.f32 %v1438_v51, %v1438_v51  ;;  %v1456_v14 = vsub.f32 %v5117_v59, %v1438_v51  ;;  %v1457_v9 = vsub.f32 %v5122_v52, %v1438_v51  ;;  %v2866_v59 = vld [vmem:[%s5471_s8 + $0x78] sm:$0xff]  }
 0x34f   :  { %v1458_v56 = vsub.f32 %v5128_v57, %v1438_v51  ;;  %v1459_v46 = vsub.f32 %v2748_v28, %v1438_v51  ;;  %v2867_v52 = vld [vmem:[%s5471_s8 + $0x38] sm:$0xff]   ;;  %2789 = vmatprep.subr.bf16.mxu1 %v2866_v59  ;;  %v2871_v57 = vld [vmem:[%s5471_s8 + $0x28] sm:$0xff]   ;;  %v2881_v28 = vld [vmem:[%s5471_s8] sm:$0xff]  }
 0x350   :  { %v1454_v39 = vsub.f32 %v1452_v55, %v1453_v3  ;;  %2790 = vmatpush3.bf16.msra.mxu1 %v2867_v52 }
 0x351   :  { %2791 = vmatprep.subr.bf16.mxu1 %v2868_v19 }
 0x352   :  { %v1455_v23 = vmax.f32 %v1454_v39, 0.0 }
 0x353   :  { %v2903_v60 = vpop.eup %2902 }
 0x354   :  { %v1460_v42 = vadd.f32 1e-05, %v1455_v23  ;;  %v1425_v35 = vmul.f32 %v2903_v60, %v1419_v50  ;;  %v1426_v6 = vmul.f32 %v2903_v60, %v1420_v37  ;;  %v1427_v24 = vmul.f32 %v2903_v60, %v1421_v21  ;;  %2792 = vmatpush3.bf16.msra.mxu1 %v2869_v27 }
 0x355   :  { %v1428_v61 = vmul.f32 %v2903_v60, %v1422_v49  ;;  %2793 = vmatprep.subr.bf16.mxu1 %v2870_v0 }
 0x356   :  { %2904 = vrsqrt.f32 %v1460_v42  ;;  %1466 = vst [vmem:[%s5470_s14] sm:$0xff] %v1425_v35  ;;  %1467 = vst [vmem:[%s5470_s14 + $0x8] sm:$0xff] %v1426_v6 }
 0x357   :  { %1468 = vst [vmem:[%s5470_s14 + $0x10] sm:$0xff] %v1427_v24  ;;  %1469 = vst [vmem:[%s5470_s14 + $0x18] sm:$0xff] %v1428_v61 }
 0x358   :  { %2794 = vmatpush3.bf16.msra.mxu1 %v2871_v57 }
 0x359   :  { %2795 = vmatprep.subr.bf16.mxu1 %v2872_v15 }
 0x35c   :  { %2796 = vmatpush3.bf16.msra.mxu1 %v2873_v2 }
 0x35d   :  { %2797 = vmatprep.subr.bf16.mxu1 %v2874_v7 }
 0x360   :  { %2798 = vmatpush3.bf16.msra.mxu1 %v2875_v17 }
 0x361   :  { %2799 = vmatprep.subr.bf16.mxu1 %v2876_v18 }
 0x363   :  { %v2905_v12 = vpop.eup %2904 }
 0x364   :  { %v1462_v8 = vmul.f32 %v2905_v12, %v1456_v14  ;;  %v1463_v22 = vmul.f32 %v2905_v12, %v1457_v9  ;;  %v1464_v45 = vmul.f32 %v2905_v12, %v1458_v56  ;;  %v1465_v4 = vmul.f32 %v2905_v12, %v1459_v46  ;;  %2800 = vmatpush3.bf16.msra.mxu1 %v2877_v13 }
 0x365   :  { %2801 = vmatprep.subr.bf16.mxu1 %v2878_v40 }
 0x366   :  { %1470 = vst [vmem:[%s5470_s14 + $0x20] sm:$0xff] %v1462_v8  ;;  %1471 = vst [vmem:[%s5470_s14 + $0x28] sm:$0xff] %v1463_v22 }
 0x367   :  { %1472 = vst [vmem:[%s5470_s14 + $0x30] sm:$0xff] %v1464_v45  ;;  %1473 = vst [vmem:[%s5470_s14 + $0x38] sm:$0xff] %v1465_v4 }
 0x368   :  { %2802 = vmatpush3.bf16.msra.mxu1 %v2879_v11 }
 0x369   :  { %2803 = vmatprep.subr.bf16.mxu1 %v2880_v10 }
 0x36c   :  { %2804 = vmatpush3.bf16.msra.mxu1 %v2881_v28 }
 0x3dc   :  { %v5212_v58 = vpop.f32.mrf.mxu0 }
 0x3dd   :  { %v2132_v32 = vmul.f32 %v5212_v58, %v5212_v58 }
 0x3de   :  { %v5214_v16 = vpop.f32.mrf.mxu0 }
 0x3df   :  { %v2133_v1 = vmul.f32 %v5214_v16, %v5214_v16 }
 0x3e0   :  { %v5216_v38 = vpop.f32.mrf.mxu0 }
 0x3e1   :  { %v2134_v26 = vmul.f32 %v5216_v38, %v5216_v38  ;;  %v2112_v54 = vadd.f32 %v5216_v38, %v5212_v58 }
 0x3e2   :  { %v5218_v20 = vpop.f32.mrf.mxu0 }
 0x3e3   :  { %v2135_v41 = vmul.f32 %v5218_v20, %v5218_v20  ;;  %v2140_v5 = vadd.f32 %v2134_v26, %v2132_v32  ;;  %v2121_v53 = vadd.f32 %v5218_v20, %v5214_v16 }
 0x3e4   :  { %v5224_v62 = vpop.f32.mrf.mxu0 }
 0x3e5   :  { %v2136_v36 = vmul.f32 %v5224_v62, %v5224_v62  ;;  %v2113_v48 = vadd.f32 %v2112_v54, %v5224_v62  ;;  %v2149_v63 = vadd.f32 %v2135_v41, %v2133_v1 }
 0x3e6   :  { %v5234_v30 = vpop.f32.mrf.mxu0 }
 0x3e7   :  { %v2137_v44 = vmul.f32 %v5234_v30, %v5234_v30  ;;  %v2141_v33 = vadd.f32 %v2140_v5, %v2136_v36  ;;  %v2122_v43 = vadd.f32 %v2121_v53, %v5234_v30 }
 0x3e8   :  { %v5241_v31 = vpop.f32.mrf.mxu0 }
 0x3e9   :  { %v2114_v29 = vadd.f32 %v2113_v48, %v5241_v31  ;;  %v2138_v51 = vmul.f32 %v5241_v31, %v5241_v31  ;;  %v2150_v47 = vadd.f32 %v2149_v63, %v2137_v44 }
 0x3ea   :  { %v5247_v55 = vpop.f32.mrf.mxu0 }
 0x3eb   :  { %v2115_v3 = vrot.slane %v2114_v29, 4  ;;  %v2142_v39 = vadd.f32 %v2141_v33, %v2138_v51  ;;  %v2123_v50 = vadd.f32 %v2122_v43, %v5247_v55  ;;  %v2139_v37 = vmul.f32 %v5247_v55, %v5247_v55 }
 0x3ed   :  { %v2116_v21 = vadd.f32 %v2115_v3, %v2114_v29  ;;  %v2143_v49 = vrot.slane %v2142_v39, 4  ;;  %v2124_v23 = vrot.slane %v2123_v50, 4  ;;  %v2151_v60 = vadd.f32 %v2150_v47, %v2139_v37  ;;  %v5252_v42 = vpop.f32.mrf.mxu0 }
 0x3ee   :  { %v2252_v27 = vmul.f32 %v5252_v42, %v5252_v42 }
 0x3ef   :  { %v2117_v35 = vrot.slane %v2116_v21, 2  ;;  %v2144_v6 = vadd.f32 %v2143_v49, %v2142_v39  ;;  %v2125_v24 = vadd.f32 %v2124_v23, %v2123_v50  ;;  %v2152_v61 = vrot.slane %v2151_v60, 4  ;;  %v5254_v14 = vpop.f32.mrf.mxu0 }
 0x3f0   :  { %v2253_v32 = vmul.f32 %v5254_v14, %v5254_v14 }
 0x3f1   :  { %v2118_v9 = vadd.f32 %v2117_v35, %v2116_v21  ;;  %v2145_v56 = vrot.slane %v2144_v6, 2  ;;  %v2126_v46 = vrot.slane %v2125_v24, 2  ;;  %v2153_v12 = vadd.f32 %v2152_v61, %v2151_v60  ;;  %v5256_v8 = vpop.f32.mrf.mxu0 }
 0x3f2   :  { %v2254_v22 = vmul.f32 %v5256_v8, %v5256_v8  ;;  %v2232_v17 = vadd.f32 %v5256_v8, %v5252_v42 }
 0x3f3   :  { %v2119_v45 = vrot.slane %v2118_v9, 1  ;;  %v2146_v4 = vadd.f32 %v2145_v56, %v2144_v6  ;;  %v2127_v59 = vadd.f32 %v2126_v46, %v2125_v24  ;;  %v2154_v52 = vrot.slane %v2153_v12, 2  ;;  %v5260_v19 = vpop.f32.mrf.mxu0 }
 0x3f4   :  { %v2260_v18 = vadd.f32 %v2254_v22, %v2252_v27  ;;  %v2255_v13 = vmul.f32 %v5260_v19, %v5260_v19  ;;  %v2241_v54 = vadd.f32 %v5260_v19, %v5254_v14 }
 0x3f5   :  { %v2120_v0 = vadd.f32 %v2119_v45, %v2118_v9  ;;  %v2147_v57 = vrot.slane %v2146_v4, 1  ;;  %v2128_v15 = vrot.slane %v2127_v59, 1  ;;  %v2155_v2 = vadd.f32 %v2154_v52, %v2153_v12  ;;  %v5264_v7 = vpop.f32.mrf.mxu0 }
 0x3f6   :  { %v2256_v40 = vmul.f32 %v5264_v7, %v5264_v7  ;;  %v2233_v36 = vadd.f32 %v2232_v17, %v5264_v7  ;;  %v2269_v39 = vadd.f32 %v2255_v13, %v2253_v32 }
 0x3f7   :  { %v5272_v11 = vmul.f32 0.03125, %v2120_v0  ;;  %v2148_v10 = vadd.f32 %v2147_v57, %v2146_v4  ;;  %v2129_v28 = vadd.f32 %v2128_v15, %v2127_v59  ;;  %v2156_v26 = vrot.slane %v2155_v2, 1  ;;  %v5274_v41 = vpop.f32.mrf.mxu0 }
 0x3f8   :  { %v2261_v1 = vadd.f32 %v2260_v18, %v2256_v40  ;;  %v2257_v44 = vmul.f32 %v5274_v41, %v5274_v41  ;;  %v2242_v43 = vadd.f32 %v2241_v54, %v5274_v41  ;;  %v2110_v54 = vld [vmem:[%s5472_s6] sm:$0x3] }
 0x3f9   :  { %v2158_v5 = vmul.f32 0.03125, %v2148_v10  ;;  %v2160_v53 = vmul.f32 %v5272_v11, %v5272_v11  ;;  %v5283_v48 = vmul.f32 0.03125, %v2129_v28  ;;  %v5287_v63 = vpop.f32.mrf.mxu0  ;;  %v2157_v33 = vadd.f32 %v2156_v26, %v2155_v2 }
 0x3fa   :  { %v2234_v29 = vadd.f32 %v2233_v36, %v5287_v63  ;;  %v2258_v51 = vmul.f32 %v5287_v63, %v5287_v63  ;;  %v2270_v35 = vadd.f32 %v2269_v39, %v2257_v44  ;;  %v2111_v44 = vld [vmem:[%s5473_s7] sm:$0x3] }
 0x3fb   :  { %v2162_v47 = vsub.f32 %v2158_v5, %v2160_v53  ;;  %v2161_v3 = vmul.f32 %v5283_v48, %v5283_v48  ;;  %v5295_v50 = vpop.f32.mrf.mxu0  ;;  %v2159_v37 = vmul.f32 0.03125, %v2157_v33 }
 0x3fc   :  { %v2235_v21 = vrot.slane %v2234_v29, 4  ;;  %v2262_v49 = vadd.f32 %v2261_v1, %v2258_v51  ;;  %v2243_v23 = vadd.f32 %v2242_v43, %v5295_v50  ;;  %v2259_v6 = vmul.f32 %v5295_v50, %v5295_v50 }
 0x3fd   :  { %v2164_v60 = vmax.f32 %v2162_v47, 0.0  ;;  %v2163_v24 = vsub.f32 %v2159_v37, %v2161_v3  ;;  %v5313_v51 = vrot.slane %v2110_v54, %v4316_v34  ;;  %v5316_v3 = vrot.slane %v2110_v54, %v4318_v25 }
 0x3fe   :  { %v2236_v61 = vadd.f32 %v2235_v21, %v2234_v29  ;;  %v2263_v9 = vrot.slane %v2262_v49, 4  ;;  %v2244_v56 = vrot.slane %v2243_v23, 4  ;;  %v2271_v12 = vadd.f32 %v2270_v35, %v2259_v6 }
 0x3ff   :  { %v2174_v46 = vadd.f32 1e-05, %v2164_v60  ;;  %v2165_v22 = vmax.f32 %v2163_v24, 0.0  ;;  %v5321_v21 = vrot.slane %v2111_v44, %v4316_v34  ;;  %v2166_v60 = vsub.f32 %v5212_v58, %v5272_v11 }
 0x400   :  { %v2237_v45 = vrot.slane %v2236_v61, 2  ;;  %v2264_v4 = vadd.f32 %v2263_v9, %v2262_v49  ;;  %v2245_v59 = vadd.f32 %v2244_v56, %v2243_v23  ;;  %v2272_v52 = vrot.slane %v2271_v12, 4 }
 0x401   :  { %2906 = vrsqrt.f32 %v2174_v46  ;;  %v2175_v27 = vadd.f32 1e-05, %v2165_v22  ;;  %v5324_v23 = vrot.slane %v2111_v44, %v4318_v25  ;;  %v2168_v35 = vsub.f32 %v5216_v38, %v5272_v11 }
 0x402   :  { %v2238_v0 = vadd.f32 %v2237_v45, %v2236_v61  ;;  %v2265_v57 = vrot.slane %v2264_v4, 2  ;;  %v2246_v15 = vrot.slane %v2245_v59, 2  ;;  %v2273_v2 = vadd.f32 %v2272_v52, %v2271_v12 }
 0x403   :  { %2908 = vrsqrt.f32 %v2175_v27  ;;  %v2172_v24 = vsub.f32 %v5241_v31, %v5272_v11  ;;  %v2173_v61 = vsub.f32 %v5247_v55, %v5283_v48  ;;  %v2167_v34 = vsub.f32 %v5214_v16, %v5283_v48 }
 0x404   :  { %v2239_v17 = vrot.slane %v2238_v0, 1  ;;  %v2266_v18 = vadd.f32 %v2265_v57, %v2264_v4  ;;  %v2247_v13 = vadd.f32 %v2246_v15, %v2245_v59  ;;  %v2274_v40 = vrot.slane %v2273_v2, 2 }
 0x405   :  { %v2170_v58 = vsub.f32 %v5224_v62, %v5272_v11  ;;  %v2169_v38 = vsub.f32 %v5218_v20, %v5283_v48  ;;  %v2171_v31 = vsub.f32 %v5234_v30, %v5283_v48 }
 0x406   :  { %v2240_v10 = vadd.f32 %v2239_v17, %v2238_v0  ;;  %v2267_v28 = vrot.slane %v2266_v18, 1  ;;  %v2248_v26 = vrot.slane %v2247_v13, 1  ;;  %v2275_v32 = vadd.f32 %v2274_v40, %v2273_v2 }
 0x408   :  { %v5303_v36 = vmul.f32 0.03125, %v2240_v10  ;;  %v2268_v1 = vadd.f32 %v2267_v28, %v2266_v18  ;;  %v2249_v5 = vadd.f32 %v2248_v26, %v2247_v13  ;;  %v2276_v53 = vrot.slane %v2275_v32, 1 }
 0x40a   :  { %v2278_v33 = vmul.f32 0.03125, %v2268_v1  ;;  %v2280_v43 = vmul.f32 %v5303_v36, %v5303_v36  ;;  %v5310_v29 = vmul.f32 0.03125, %v2249_v5  ;;  %v2277_v47 = vadd.f32 %v2276_v53, %v2275_v32 }
 0x40c   :  { %v2282_v39 = vsub.f32 %v2278_v33, %v2280_v43  ;;  %v2281_v37 = vmul.f32 %v5310_v29, %v5310_v29  ;;  %v2279_v49 = vmul.f32 0.03125, %v2277_v47 }
 0x40e   :  { %v2907_v6 = vpop.eup %2906  ;;  %v2284_v9 = vmax.f32 %v2282_v39, 0.0  ;;  %v2283_v56 = vsub.f32 %v2279_v49, %v2281_v37 }
 0x40f   :  { %v2178_v25 = vmul.f32 %v2907_v6, %v2166_v60  ;;  %v2180_v46 = vmul.f32 %v2907_v6, %v2168_v35  ;;  %v2184_v12 = vmul.f32 %v2907_v6, %v2172_v24  ;;  %v2182_v59 = vmul.f32 %v2907_v6, %v2170_v58 }
 0x410   :  { %v2294_v22 = vadd.f32 1e-05, %v2284_v9  ;;  %v2909_v45 = vpop.eup %2908  ;;  %v2285_v55 = vmax.f32 %v2283_v56, 0.0  ;;  %v2286_v60 = vsub.f32 %v5252_v42, %v5303_v36  ;;  %v2288_v35 = vsub.f32 %v5256_v8, %v5303_v36 }
 0x411   :  { %v2197_v4 = vmul.f32 %v5313_v51, %v2178_v25  ;;  %v2199_v16 = vmul.f32 %v5313_v51, %v2180_v46  ;;  %v2185_v52 = vmul.f32 %v2909_v45, %v2173_v61  ;;  %v2179_v27 = vmul.f32 %v2909_v45, %v2167_v34 }
 0x412   :  { %2910 = vrsqrt.f32 %v2294_v22  ;;  %v2181_v0 = vmul.f32 %v2909_v45, %v2169_v38  ;;  %v2295_v62 = vadd.f32 1e-05, %v2285_v55  ;;  %v2183_v20 = vmul.f32 %v2909_v45, %v2171_v31 }
 0x413   :  { %v2216_v11 = vadd.f32 %v5321_v21, %v2197_v4  ;;  %v2218_v57 = vadd.f32 %v5321_v21, %v2199_v16  ;;  %v2204_v15 = vmul.f32 %v5316_v3, %v2185_v52  ;;  %v2198_v30 = vmul.f32 %v5316_v3, %v2179_v27 }
 0x414   :  { %v2200_v48 = vmul.f32 %v5316_v3, %v2181_v0  ;;  %v2203_v2 = vmul.f32 %v5313_v51, %v2184_v12  ;;  %2912 = vrsqrt.f32 %v2295_v62  ;;  %v2202_v17 = vmul.f32 %v5316_v3, %v2183_v20 }
 0x415   :  { %v2217_v18 = vadd.f32 %v5324_v23, %v2198_v30  ;;  %v2223_v40 = vadd.f32 %v5324_v23, %v2204_v15  ;;  %v2201_v10 = vmul.f32 %v5313_v51, %v2182_v59  ;;  %v2224_v28 = vmax.f32 %v2216_v11, 0.0 }
 0x416   :  { %v2219_v13 = vadd.f32 %v5324_v23, %v2200_v48  ;;  %v2226_v26 = vmax.f32 %v2218_v57, 0.0  ;;  %v2221_v32 = vadd.f32 %v5324_v23, %v2202_v17  ;;  %v2222_v43 = vadd.f32 %v5321_v21, %v2203_v2 }
 0x417   :  { %v2225_v54 = vmax.f32 %v2217_v18, 0.0  ;;  %v2231_v5 = vmax.f32 %v2223_v40, 0.0  ;;  %v2220_v33 = vadd.f32 %v5321_v21, %v2201_v10  ;;  %v2292_v24 = vsub.f32 %v5287_v63, %v5303_v36 }
 0x418   :  { %v2227_v1 = vmax.f32 %v2219_v13, 0.0  ;;  %v2229_v53 = vmax.f32 %v2221_v32, 0.0  ;;  %v2394_v47 = vpack.c.bf16 %v2226_v26, %v2224_v28  ;;  %v2230_v49 = vmax.f32 %v2222_v43, 0.0 }
 0x419   :  { %v2228_v37 = vmax.f32 %v2220_v33, 0.0  ;;  %v2293_v34 = vsub.f32 %v5295_v50, %v5310_v29  ;;  %v2287_v56 = vsub.f32 %v5254_v14, %v5310_v29  ;;  %v2289_v25 = vsub.f32 %v5260_v19, %v5310_v29 }
 0x41a   :  { %v2395_v44 = vpack.c.bf16 %v2227_v1, %v2225_v54  ;;  %v2397_v39 = vpack.c.bf16 %v2231_v5, %v2229_v53  ;;  %v2291_v42 = vsub.f32 %v5274_v41, %v5310_v29  ;;  %v2290_v12 = vsub.f32 %v5264_v7, %v5303_v36 }
 0x41b   :  { %v2396_v8 = vpack.c.bf16 %v2230_v49, %v2228_v37 }
 0x41c   :  { %2530 = vmatprep.mubr.bf16.mxu1 %v2395_v44 }
 0x41d   :  { %2531 = vmatmul.mubr.bf16.vlgmr.msra.gmra.mxu1 %v2394_v47 }
 0x41e   :  { %2538 = vmatprep.mubr.bf16.mxu1 %v2397_v39 }
 0x41f   :  { %v2911_v6 = vpop.eup %2910 }
 0x420   :  { %v2298_v61 = vmul.f32 %v2911_v6, %v2286_v60  ;;  %v2300_v9 = vmul.f32 %v2911_v6, %v2288_v35  ;;  %v2304_v14 = vmul.f32 %v2911_v6, %v2292_v24  ;;  %v2302_v55 = vmul.f32 %v2911_v6, %v2290_v12 }
 0x421   :  { %v2913_v46 = vpop.eup %2912 }
 0x422   :  { %v2306_v58 = vmul.f32 %v2298_v61, %v5313_v51  ;;  %v2308_v63 = vmul.f32 %v2300_v9, %v5313_v51  ;;  %v2305_v22 = vmul.f32 %v2913_v46, %v2293_v34  ;;  %v2299_v50 = vmul.f32 %v2913_v46, %v2287_v56 }
 0x423   :  { %v2301_v38 = vmul.f32 %v2913_v46, %v2289_v25  ;;  %v2303_v31 = vmul.f32 %v2913_v46, %v2291_v42  ;;  %v2312_v27 = vmul.f32 %v2304_v14, %v5313_v51  ;;  %v2310_v11 = vmul.f32 %v2302_v55, %v5313_v51 }
 0x424   :  { %v2314_v45 = vadd.f32 %v2306_v58, %v5321_v21  ;;  %v2316_v19 = vadd.f32 %v2308_v63, %v5321_v21  ;;  %v2313_v41 = vmul.f32 %v2305_v22, %v5316_v3  ;;  %v2307_v29 = vmul.f32 %v2299_v50, %v5316_v3 }
 0x425   :  { %2539 = vmatmul.mubr.bf16.gmra.mxu1 %v2396_v8  ;;  %v2309_v4 = vmul.f32 %v2301_v38, %v5316_v3  ;;  %v2311_v16 = vmul.f32 %v2303_v31, %v5316_v3  ;;  %v2318_v2 = vadd.f32 %v2310_v11, %v5321_v21  ;;  %v2320_v17 = vadd.f32 %v2312_v27, %v5321_v21 }
 0x426   :  { %v2315_v7 = vadd.f32 %v2307_v29, %v5324_v23  ;;  %v2321_v52 = vadd.f32 %v2313_v41, %v5324_v23  ;;  %v2322_v0 = vmax.f32 %v2314_v45, 0.0  ;;  %v2324_v62 = vmax.f32 %v2316_v19, 0.0 }
 0x427   :  { %v2317_v36 = vadd.f32 %v2309_v4, %v5324_v23  ;;  %v2319_v59 = vadd.f32 %v2311_v16, %v5324_v23  ;;  %v2326_v23 = vmax.f32 %v2318_v2, 0.0  ;;  %v2328_v13 = vmax.f32 %v2320_v17, 0.0 }
 0x428   :  { %v2323_v57 = vmax.f32 %v2315_v7, 0.0  ;;  %v2329_v30 = vmax.f32 %v2321_v52, 0.0  ;;  %v2398_v3 = vpack.c.bf16 %v2324_v62, %v2322_v0 }
 0x429   :  { %v2325_v20 = vmax.f32 %v2317_v36, 0.0  ;;  %v2327_v15 = vmax.f32 %v2319_v59, 0.0  ;;  %v2400_v40 = vpack.c.bf16 %v2328_v13, %v2326_v23 }
 0x42b   :  { %v2399_v48 = vpack.c.bf16 %v2325_v20, %v2323_v57  ;;  %v2401_v18 = vpack.c.bf16 %v2329_v30, %v2327_v15 }
 0x42d   :  { %2546 = vmatprep.mubr.bf16.mxu1 %v2399_v48 }
 0x42e   :  { %2547 = vmatmul.mubr.bf16.gmra.mxu1 %v2398_v3 }
 0x42f   :  { %2554 = vmatprep.mubr.bf16.mxu1 %v2401_v18 }
 0x436   :  { %2555 = vmatmul.mubr.bf16.gmra.mxu1 %v2400_v40 }
 0x4dd   :  { %v2805_v10 = vpop.f32.mrf.mxu1 }
 0x4df   :  { %v2806_v51 = vpop.f32.mrf.mxu1 }
 0x4e0   :  { %v5392_v1 = vadd.f32 %v2806_v51, %v2805_v10 }
 0x4e1   :  { %v2808_v28 = vpop.f32.mrf.mxu1 }
 0x4e2   :  { %v2573_v33 = vmul.f32 %v5392_v1, %v5392_v1 }
 0x4e3   :  { %v2809_v26 = vpop.f32.mrf.mxu1 }
 0x4e4   :  { %v5390_v32 = vadd.f32 %v2809_v26, %v2808_v28 }
 0x4e5   :  { %v2811_v54 = vpop.f32.mrf.mxu1 }
 0x4e6   :  { %v2574_v21 = vmul.f32 %v5390_v32, %v5390_v32  ;;  %v2563_v43 = vadd.f32 %v5390_v32, %v5392_v1 }
 0x4e7   :  { %v2812_v5 = vpop.f32.mrf.mxu1 }
 0x4e8   :  { %v5396_v53 = vadd.f32 %v2812_v5, %v2811_v54  ;;  %v2577_v37 = vadd.f32 %v2574_v21, %v2573_v33 }
 0x4e9   :  { %v2814_v44 = vpop.f32.mrf.mxu1 }
 0x4ea   :  { %v2575_v47 = vmul.f32 %v5396_v53, %v5396_v53  ;;  %v2564_v49 = vadd.f32 %v5396_v53, %v2563_v43 }
 0x4eb   :  { %v2815_v39 = vpop.f32.mrf.mxu1 }
 0x4ec   :  { %v5405_v60 = vadd.f32 %v2815_v39, %v2814_v44  ;;  %v2578_v35 = vadd.f32 %v2577_v37, %v2575_v47 }
 0x4ee   :  { %v2565_v6 = vadd.f32 %v5405_v60, %v2564_v49  ;;  %v2576_v24 = vmul.f32 %v5405_v60, %v5405_v60  ;;  %v2817_v61 = vpop.f32.mrf.mxu1 }
 0x4f0   :  { %v2566_v9 = vrot.slane %v2565_v6, 4  ;;  %v2579_v34 = vadd.f32 %v2578_v35, %v2576_v24  ;;  %v2818_v56 = vpop.f32.mrf.mxu1 }
 0x4f1   :  { %v5412_v31 = vadd.f32 %v2818_v56, %v2817_v61 }
 0x4f2   :  { %v2567_v25 = vadd.f32 %v2566_v9, %v2565_v6  ;;  %v2580_v42 = vrot.slane %v2579_v34, 4  ;;  %v2820_v46 = vpop.f32.mrf.mxu1 }
 0x4f3   :  { %v2610_v7 = vmul.f32 %v5412_v31, %v5412_v31 }
 0x4f4   :  { %v2568_v8 = vrot.slane %v2567_v25, 2  ;;  %v2581_v58 = vadd.f32 %v2580_v42, %v2579_v34  ;;  %v2821_v63 = vpop.f32.mrf.mxu1 }
 0x4f5   :  { %v5410_v12 = vadd.f32 %v2821_v63, %v2820_v46 }
 0x4f6   :  { %v2569_v22 = vadd.f32 %v2568_v8, %v2567_v25  ;;  %v2582_v50 = vrot.slane %v2581_v58, 2  ;;  %v2823_v38 = vpop.f32.mrf.mxu1 }
 0x4f7   :  { %v2611_v55 = vmul.f32 %v5410_v12, %v5410_v12  ;;  %v2600_v36 = vadd.f32 %v5410_v12, %v5412_v31 }
 0x4f8   :  { %v2570_v14 = vrot.slane %v2569_v22, 1  ;;  %v2583_v45 = vadd.f32 %v2582_v50, %v2581_v58  ;;  %v2824_v19 = vpop.f32.mrf.mxu1 }
 0x4f9   :  { %v5416_v41 = vadd.f32 %v2824_v19, %v2823_v38  ;;  %v2614_v62 = vadd.f32 %v2611_v55, %v2610_v7 }
 0x4fa   :  { %v2571_v29 = vadd.f32 %v2570_v14, %v2569_v22  ;;  %v2584_v4 = vrot.slane %v2583_v45, 1  ;;  %v2826_v16 = vpop.f32.mrf.mxu1 }
 0x4fb   :  { %v2612_v59 = vmul.f32 %v5416_v41, %v5416_v41  ;;  %v2601_v11 = vadd.f32 %v5416_v41, %v2600_v36 }
 0x4fc   :  { %v2572_v52 = vmul.f32 0.03125, %v2571_v29  ;;  %v2585_v27 = vadd.f32 %v2584_v4, %v2583_v45  ;;  %v2827_v0 = vpop.f32.mrf.mxu1 }
 0x4fd   :  { %v2828_v57 = vadd.f32 %v2827_v0, %v2826_v16  ;;  %v2615_v30 = vadd.f32 %v2614_v62, %v2612_v59 }
 0x4fe   :  { %v2586_v20 = vmul.f32 0.03125, %v2585_v27  ;;  %v2587_v15 = vmul.f32 %v2572_v52, %v2572_v52  ;;  %v2590_v35 = vsub.f32 %v5392_v1, %v2572_v52  ;;  %v2591_v6 = vsub.f32 %v5390_v32, %v2572_v52 }
 0x4ff   :  { %v2602_v48 = vadd.f32 %v2828_v57, %v2601_v11  ;;  %v2613_v3 = vmul.f32 %v2828_v57, %v2828_v57  ;;  %v2592_v24 = vsub.f32 %v5396_v53, %v2572_v52  ;;  %v2593_v61 = vsub.f32 %v5405_v60, %v2572_v52 }
 0x500   :  { %v2588_v2 = vsub.f32 %v2586_v20, %v2587_v15 }
 0x501   :  { %v2603_v17 = vrot.slane %v2602_v48, 4  ;;  %v2616_v18 = vadd.f32 %v2615_v30, %v2613_v3 }
 0x502   :  { %v2589_v23 = vmax.f32 %v2588_v2, 0.0 }
 0x503   :  { %v2604_v13 = vadd.f32 %v2603_v17, %v2602_v48  ;;  %v2617_v40 = vrot.slane %v2616_v18, 4 }
 0x504   :  { %v2594_v10 = vadd.f32 1e-05, %v2589_v23 }
 0x505   :  { %v2605_v51 = vrot.slane %v2604_v13, 2  ;;  %v2618_v28 = vadd.f32 %v2617_v40, %v2616_v18 }
 0x506   :  { %2914 = vrsqrt.f32 %v2594_v10 }
 0x507   :  { %v2606_v26 = vadd.f32 %v2605_v51, %v2604_v13  ;;  %v2619_v54 = vrot.slane %v2618_v28, 2 }
 0x509   :  { %v2607_v5 = vrot.slane %v2606_v26, 1  ;;  %v2620_v21 = vadd.f32 %v2619_v54, %v2618_v28 }
 0x50b   :  { %v2608_v44 = vadd.f32 %v2607_v5, %v2606_v26  ;;  %v2621_v33 = vrot.slane %v2620_v21, 1 }
 0x50d   :  { %v2609_v43 = vmul.f32 0.03125, %v2608_v44  ;;  %v2622_v47 = vadd.f32 %v2621_v33, %v2620_v21 }
 0x50f   :  { %v2623_v39 = vmul.f32 0.03125, %v2622_v47  ;;  %v2624_v37 = vmul.f32 %v2609_v43, %v2609_v43  ;;  %v2627_v32 = vsub.f32 %v5412_v31, %v2609_v43  ;;  %v2628_v1 = vsub.f32 %v5410_v12, %v2609_v43 }
 0x510   :  { %v2629_v53 = vsub.f32 %v5416_v41, %v2609_v43  ;;  %v2630_v60 = vsub.f32 %v2828_v57, %v2609_v43 }
 0x511   :  { %v2625_v49 = vsub.f32 %v2623_v39, %v2624_v37 }
 0x513   :  { %v2915_v9 = vpop.eup %2914  ;;  %v2626_v34 = vmax.f32 %v2625_v49, 0.0 }
 0x514   :  { %v2596_v56 = vmul.f32 %v2915_v9, %v2590_v35  ;;  %v2597_v25 = vmul.f32 %v2915_v9, %v2591_v6  ;;  %v2598_v42 = vmul.f32 %v2915_v9, %v2592_v24  ;;  %v2599_v46 = vmul.f32 %v2915_v9, %v2593_v61 }
 0x515   :  { %v2631_v8 = vadd.f32 1e-05, %v2626_v34 }
 0x516   :  { %2637 = vst [vmem:[%s5474_s13] sm:$0xff] %v2596_v56  ;;  %2638 = vst [vmem:[%s5474_s13 + $0x8] sm:$0xff] %v2597_v25 }
 0x517   :  { %2639 = vst [vmem:[%s5474_s13 + $0x10] sm:$0xff] %v2598_v42  ;;  %2640 = vst [vmem:[%s5474_s13 + $0x18] sm:$0xff] %v2599_v46  ;;  %2916 = vrsqrt.f32 %v2631_v8 }
 0x524   :  { %v2917_v58 = vpop.eup %2916 }
 0x525   :  { %v2633_v63 = vmul.f32 %v2917_v58, %v2627_v32  ;;  %v2634_v22 = vmul.f32 %v2917_v58, %v2628_v1  ;;  %v2635_v50 = vmul.f32 %v2917_v58, %v2629_v53  ;;  %v2636_v38 = vmul.f32 %v2917_v58, %v2630_v60 }
 0x527   :  { %2641 = vst [vmem:[%s5474_s13 + $0x20] sm:$0xff] %v2633_v63  ;;  %2642 = vst [vmem:[%s5474_s13 + $0x28] sm:$0xff] %v2634_v22 }
 0x528   :  { %2643 = vst [vmem:[%s5474_s13 + $0x30] sm:$0xff] %v2635_v50  ;;  %2644 = vst [vmem:[%s5474_s13 + $0x38] sm:$0xff] %v2636_v38 }

</bundles_post_ra>
